<compile_context>
chip_gen: v5e
topology: v5e:2x2
jax: 0.10.0
libtpu: 0.0.40
codegen_flags: <defaults>
</compile_context>

<pallas_src>
import functools

import jax
import jax.numpy as jnp
from jax.experimental import pallas as pl
from jax.experimental.pallas import tpu as pltpu


LRELU_SLOPE = 0.1
BN_EPS = 1e-5
VMEM_LIMIT = 32 * 1024 * 1024  # within scoped limits on v5e/v6e/v7x


def _round_up(x, m):
    return (x + m - 1) // m * m


def _pick_tm(m, bytes_per_row, budget_bytes=4 << 20):
    """Rows per grid step: multiple of 8, capped so the double-buffered
    input+output blocks stay well inside every chip's VMEM budget."""
    tm = budget_bytes // max(bytes_per_row, 1)
    tm = max(8, min(512, (tm // 8) * 8))
    return min(tm, _round_up(m, 8))


# ----------------------------------------------------------------------------
# Kernel: (TM, K) @ (K, Np) + bias.  Used for the 2x2 stride-2 transposed conv
# (a per-pixel channel matmul producing the 4 (dy,dx) taps).
# ----------------------------------------------------------------------------
def _matmul_bias_kernel(x_ref, w_ref, b_ref, o_ref):
    acc = jnp.broadcast_to(b_ref[...], o_ref.shape).astype(jnp.float32)
    acc = acc + jnp.dot(x_ref[...], w_ref[...],
                        preferred_element_type=jnp.float32)
    o_ref[...] = acc.astype(o_ref.dtype)


def matmul_bias_pallas(x2d, w, b):
    """(M, K) @ (K, N) + b with N padded to a multiple of 128 (lane-dense)."""
    m, k = x2d.shape
    n = w.shape[1]
    npad = _round_up(n, 128)
    w_p = jnp.pad(w, ((0, 0), (0, npad - n))).astype(jnp.float32)
    b_p = jnp.pad(b, (0, npad - n)).reshape(1, npad).astype(jnp.float32)

    tm = _pick_tm(m, bytes_per_row=4 * (k + 2 * npad))
    m_pad = _round_up(m, tm)
    x_p = jnp.pad(x2d.astype(jnp.float32), ((0, m_pad - m), (0, 0)))
    n_tiles = m_pad // tm

    out = pl.pallas_call(
        _matmul_bias_kernel,
        out_shape=jax.ShapeDtypeStruct((m_pad, npad), jnp.float32),
        grid_spec=pltpu.PrefetchScalarGridSpec(
            num_scalar_prefetch=0,
            grid=(n_tiles,),
            in_specs=[
                pl.BlockSpec((tm, k), lambda i: (i, 0)),
                pl.BlockSpec((k, npad), lambda i: (0, 0)),
                pl.BlockSpec((1, npad), lambda i: (0, 0)),
            ],
            out_specs=pl.BlockSpec((tm, npad), lambda i: (i, 0)),
        ),
        compiler_params=pltpu.CompilerParams(
            dimension_semantics=("parallel",),
            vmem_limit_bytes=VMEM_LIMIT,
        ),
    )(x_p, w_p, b_p)
    return out[:m, :n]


# ----------------------------------------------------------------------------
# Kernel: fat im2col conv matmul + bias, fused with per-channel BatchNorm
# training statistics (per-tile partial sum / sum-of-squares; tile-padding
# rows masked out).  Grid is "parallel" (partials reduced in glue), so it can
# shard across v7x TensorCores.
# ----------------------------------------------------------------------------
def _conv_mm_stats_kernel(p_ref, w_ref, b_ref, y_ref, s_ref, q_ref, *, m_valid):
    tm = p_ref.shape[0]
    acc = jnp.broadcast_to(b_ref[...], y_ref.shape).astype(jnp.float32)
    acc = acc + jnp.dot(p_ref[...], w_ref[...],
                        preferred_element_type=jnp.float32)
    y_ref[...] = acc.astype(y_ref.dtype)

    # Mask rows that are only tile padding (beyond the true N*H*W rows).
    row = pl.program_id(0) * tm + jax.lax.broadcasted_iota(jnp.int32, (tm, 1), 0)
    valid = (row < m_valid).astype(jnp.float32)
    masked = acc * valid
    s_ref[0] = jnp.sum(masked, axis=0, keepdims=True)        # sum(x)
    q_ref[0] = jnp.sum(masked * acc, axis=0, keepdims=True)  # sum(x^2)


def conv3x3_bnstats_pallas(x_nhwc, w_hwio, bias):
    """3x3 SAME conv as a tiled im2col matmul; also returns batch mean/var."""
    n, h, w, cin = x_nhwc.shape
    cout = w_hwio.shape[-1]
    coutp = _round_up(cout, 128)
    k = 9 * cin
    m = n * h * w

    # im2col in glue: kernel sees a lane-dense (rows, 9*Cin) slab.
    xp = jnp.pad(x_nhwc, ((0, 0), (1, 1), (1, 1), (0, 0)))
    taps = [xp[:, dy:dy + h, dx:dx + w, :] for dy in range(3) for dx in range(3)]
    patches = jnp.concatenate(taps, axis=-1).reshape(m, k).astype(jnp.float32)

    w_flat = jnp.pad(w_hwio.reshape(k, cout),
                     ((0, 0), (0, coutp - cout))).astype(jnp.float32)
    b_pad = jnp.pad(bias, (0, coutp - cout)).reshape(1, coutp).astype(jnp.float32)

    tm = _pick_tm(m, bytes_per_row=4 * (k + 2 * coutp))
    m_pad = _round_up(m, tm)
    patches = jnp.pad(patches, ((0, m_pad - m), (0, 0)))
    n_tiles = m_pad // tm

    kernel = functools.partial(_conv_mm_stats_kernel, m_valid=m)
    y, s_part, q_part = pl.pallas_call(
        kernel,
        out_shape=(
            jax.ShapeDtypeStruct((m_pad, coutp), jnp.float32),
            jax.ShapeDtypeStruct((n_tiles, 1, coutp), jnp.float32),
            jax.ShapeDtypeStruct((n_tiles, 1, coutp), jnp.float32),
        ),
        grid_spec=pltpu.PrefetchScalarGridSpec(
            num_scalar_prefetch=0,
            grid=(n_tiles,),
            in_specs=[
                pl.BlockSpec((tm, k), lambda i: (i, 0)),
                pl.BlockSpec((k, coutp), lambda i: (0, 0)),
                pl.BlockSpec((1, coutp), lambda i: (0, 0)),
            ],
            out_specs=[
                pl.BlockSpec((tm, coutp), lambda i: (i, 0)),
                pl.BlockSpec((1, 1, coutp), lambda i: (i, 0, 0)),
                pl.BlockSpec((1, 1, coutp), lambda i: (i, 0, 0)),
            ],
        ),
        compiler_params=pltpu.CompilerParams(
            dimension_semantics=("parallel",),
            vmem_limit_bytes=VMEM_LIMIT,
        ),
    )(patches, w_flat, b_pad)

    count = jnp.float32(m)
    ssum = jnp.sum(s_part[:, 0, :cout], axis=0)
    sqsum = jnp.sum(q_part[:, 0, :cout], axis=0)
    mean = ssum / count
    var = jnp.maximum(sqsum / count - mean * mean, 0.0)  # clamp E[x^2]-E[x]^2
    return y, mean, var, tm


# ----------------------------------------------------------------------------
# Kernel: fused BatchNorm apply (y*scale + shift) + LeakyReLU(0.1), lane-dense.
# ----------------------------------------------------------------------------
def _bn_lrelu_kernel(y_ref, scale_ref, shift_ref, o_ref):
    z = y_ref[...].astype(jnp.float32) * scale_ref[...] + shift_ref[...]
    o_ref[...] = jnp.where(z >= 0, z, LRELU_SLOPE * z).astype(o_ref.dtype)


def bn_lrelu_pallas(y_pad, mean, var, gamma, beta, tm):
    m_pad, coutp = y_pad.shape
    cout = gamma.shape[0]
    scale = (gamma / jnp.sqrt(var + BN_EPS)).astype(jnp.float32)
    shift = (beta - mean * scale).astype(jnp.float32)
    scale_p = jnp.pad(scale, (0, coutp - cout)).reshape(1, coutp)
    shift_p = jnp.pad(shift, (0, coutp - cout)).reshape(1, coutp)
    n_tiles = m_pad // tm

    return pl.pallas_call(
        _bn_lrelu_kernel,
        out_shape=jax.ShapeDtypeStruct((m_pad, coutp), jnp.float32),
        grid_spec=pltpu.PrefetchScalarGridSpec(
            num_scalar_prefetch=0,
            grid=(n_tiles,),
            in_specs=[
                pl.BlockSpec((tm, coutp), lambda i: (i, 0)),
                pl.BlockSpec((1, coutp), lambda i: (0, 0)),
                pl.BlockSpec((1, coutp), lambda i: (0, 0)),
            ],
            out_specs=pl.BlockSpec((tm, coutp), lambda i: (i, 0)),
        ),
        compiler_params=pltpu.CompilerParams(
            dimension_semantics=("parallel",),
            vmem_limit_bytes=VMEM_LIMIT,
        ),
    )(y_pad, scale_p, shift_p)


# ----------------------------------------------------------------------------
# UpConv module: params + forward
# ----------------------------------------------------------------------------
def init_upconv_params(key, in_channels, out_channels, merge_mode="concat"):
    ks = jax.random.split(key, 6)
    c1_in = out_channels if merge_mode == "add" else 2 * out_channels

    def w_init(k, shape, fan_in):
        return jax.random.normal(k, shape, jnp.float32) / jnp.sqrt(float(fan_in))

    return {
        # ConvTranspose2d(in, out, k=2, s=2): stored as (dy, dx, Cin, Cout)
        "up_w": w_init(ks[0], (2, 2, in_channels, out_channels), in_channels * 4),
        "up_b": jax.random.normal(ks[1], (out_channels,), jnp.float32) * 0.01,
        "w1": w_init(ks[2], (3, 3, c1_in, out_channels), c1_in * 9),
        "b1": jax.random.normal(ks[3], (out_channels,), jnp.float32) * 0.01,
        "gamma1": jnp.ones((out_channels,), jnp.float32),
        "beta1": jnp.zeros((out_channels,), jnp.float32),
        "w2": w_init(ks[4], (3, 3, out_channels, out_channels), out_channels * 9),
        "b2": jax.random.normal(ks[5], (out_channels,), jnp.float32) * 0.01,
        "gamma2": jnp.ones((out_channels,), jnp.float32),
        "beta2": jnp.zeros((out_channels,), jnp.float32),
    }


@functools.partial(jax.jit, static_argnames=("merge_mode",))
def upconv_forward(from_down_nchw, from_up_nchw, params, merge_mode="concat"):
    # NCHW (PyTorch) -> NHWC. Callers that can stay NHWC end-to-end should
    # skip these boundary transposes (each is an extra HBM pass).
    fd = jnp.transpose(from_down_nchw, (0, 2, 3, 1)).astype(jnp.float32)
    fu = jnp.transpose(from_up_nchw, (0, 2, 3, 1)).astype(jnp.float32)

    # upconv2x2: per-pixel channel matmul to the 4 (dy,dx) taps, then a
    # pure-layout 2x2 pixel-shuffle interleave in glue.
    n, h, w, cin = fu.shape
    cout = params["up_w"].shape[-1]
    w_up = jnp.transpose(params["up_w"], (2, 0, 1, 3)).reshape(cin, 4 * cout)
    b_up = jnp.tile(params["up_b"], 4)
    up = matmul_bias_pallas(fu.reshape(n * h * w, cin), w_up, b_up)
    up = up.reshape(n, h, w, 2, 2, cout)
    up = jnp.transpose(up, (0, 1, 3, 2, 4, 5)).reshape(n, 2 * h, 2 * w, cout)

    # merge with the encoder feature map
    x = up + fd if merge_mode == "add" else jnp.concatenate([up, fd], axis=-1)
    nb, hh, ww, _ = x.shape
    m = nb * hh * ww

    # conv1 (+ fused BN1 statistics) -> fused BN1 apply + LeakyReLU
    y1, mean1, var1, tm1 = conv3x3_bnstats_pallas(x, params["w1"], params["b1"])
    a1 = bn_lrelu_pallas(y1, mean1, var1, params["gamma1"], params["beta1"], tm1)
    a1 = a1[:m, :cout].reshape(nb, hh, ww, cout)

    # conv2 (+ fused BN2 statistics) -> fused BN2 apply + LeakyReLU
    y2, mean2, var2, tm2 = conv3x3_bnstats_pallas(a1, params["w2"], params["b2"])
    a2 = bn_lrelu_pallas(y2, mean2, var2, params["gamma2"], params["beta2"], tm2)
    a2 = a2[:m, :cout].reshape(nb, hh, ww, cout)

    return jnp.transpose(a2, (0, 3, 1, 2))  # back to NCHW


# ----------------------------------------------------------------------------
# Pure-JAX reference (independent code path) for a correctness sanity check.
# ----------------------------------------------------------------------------
@functools.partial(jax.jit, static_argnames=("merge_mode",))
def _ref_forward(from_down_nchw, from_up_nchw, params, merge_mode="concat",
                 eps=BN_EPS):
    fd = jnp.transpose(from_down_nchw, (0, 2, 3, 1)).astype(jnp.float32)
    fu = jnp.transpose(from_up_nchw, (0, 2, 3, 1)).astype(jnp.float32)

    n, h, w, _ = fu.shape
    co = params["up_w"].shape[-1]
    up = jnp.zeros((n, 2 * h, 2 * w, co), jnp.float32)
    for dy in range(2):
        for dx in range(2):
            tap = jnp.einsum("nhwc,co->nhwo", fu, params["up_w"][dy, dx])
            up = up.at[:, dy::2, dx::2, :].set(tap)
    up = up + params["up_b"]

    x = up + fd if merge_mode == "add" else jnp.concatenate([up, fd], axis=-1)

    def conv(x, wt, b):
        y = jax.lax.conv_general_dilated(
            x, wt, (1, 1), "SAME",
            dimension_numbers=("NHWC", "HWIO", "NHWC"))
        return y + b

    def bn_lrelu(x, g, bt):
        mu = jnp.mean(x, axis=(0, 1, 2))
        va = jnp.mean(jnp.square(x - mu), axis=(0, 1, 2))  # biased (training)
        y = (x - mu) / jnp.sqrt(va + eps) * g + bt
        return jnp.where(y >= 0, y, LRELU_SLOPE * y)

    x = bn_lrelu(conv(x, params["w1"], params["b1"]),
                 params["gamma1"], params["beta1"])
    x = bn_lrelu(conv(x, params["w2"], params["b2"]),
                 params["gamma2"], params["beta2"])
    return jnp.transpose(x, (0, 3, 1, 2))


if __name__ == "__main__":
    key = jax.random.PRNGKey(0)
    kd, ku, kp = jax.random.split(key, 3)

    N, in_ch, out_ch = 2, 8, 4
    h, w = 8, 8            # decoder (from_up) spatial size
    H, W = 2 * h, 2 * w    # encoder (from_down) spatial size

    from_up = jax.random.normal(ku, (N, in_ch, h, w), jnp.float32)
    from_down = jax.random.normal(kd, (N, out_ch, H, W), jnp.float32)
    params = init_upconv_params(kp, in_ch, out_ch, merge_mode="concat")

    out = upconv_forward(from_down, from_up, params)
    out = jax.block_until_ready(out)

    ref = jax.block_until_ready(_ref_forward(from_down, from_up, params))
    assert out.shape == (N, out_ch, H, W), out.shape
    max_err = float(jnp.max(jnp.abs(out - ref)))
    assert jnp.allclose(out, ref, atol=1e-3, rtol=1e-3), max_err

    print("KERNEL_OK")
</pallas_src>

<mosaic_0001>
module attributes {stable_mosaic.version = 11 : i64} {
  func.func @_matmul_bias_kernel(%arg0: i32, %arg1: memref<128x8xf32, #tpu.memory_space<vmem>>, %arg2: memref<8x128xf32, #tpu.memory_space<vmem>>, %arg3: memref<1x128xf32, #tpu.memory_space<vmem>>, %arg4: memref<128x128xf32, #tpu.memory_space<vmem>>) attributes {dimension_semantics = [#tpu.dimension_semantics<parallel>], iteration_bounds = array<i64: 1>, scalar_prefetch = 0 : i64, scratch_operands = 0 : i64, tpu.core_type = #tpu.core_type<tc>, window_params = [{transform_indices = @transform_0, window_bounds = array<i64: 128, 8>}, {pipeline_mode = #tpu.pipeline_mode<synchronous>, transform_indices = @transform_1, window_bounds = array<i64: 8, 128>}, {pipeline_mode = #tpu.pipeline_mode<synchronous>, transform_indices = @transform_2, window_bounds = array<i64: 1, 128>}, {transform_indices = @transform_3, window_bounds = array<i64: 128, 128>}]} {
    %c0 = arith.constant 0 : index
    %c0_0 = arith.constant 0 : index
    %0 = vector.load %arg3[%c0, %c0_0] : memref<1x128xf32, #tpu.memory_space<vmem>>, vector<1x128xf32>
    %1 = vector.shape_cast %0 : vector<1x128xf32> to vector<1x128xf32>
    %2 = vector.broadcast %1 : vector<1x128xf32> to vector<128x128xf32>
    %c0_1 = arith.constant 0 : index
    %c0_2 = arith.constant 0 : index
    %3 = vector.load %arg1[%c0_1, %c0_2] : memref<128x8xf32, #tpu.memory_space<vmem>>, vector<128x8xf32>
    %c0_3 = arith.constant 0 : index
    %c0_4 = arith.constant 0 : index
    %4 = vector.load %arg2[%c0_3, %c0_4] : memref<8x128xf32, #tpu.memory_space<vmem>>, vector<8x128xf32>
    %cst = arith.constant dense<0.000000e+00> : vector<128x128xf32>
    %5 = tpu.matmul %3, %4, %cst {dimension_numbers = #tpu.dot_dimension_numbers<[1], [0], [0], [1], [0, 0, 1, 1], [], []>} : vector<128x8xf32>, vector<8x128xf32>, vector<128x128xf32> -> vector<128x128xf32>
    %6 = arith.addf %2, %5 : vector<128x128xf32>
    %c0_5 = arith.constant 0 : index
    %c0_6 = arith.constant 0 : index
    %7 = vector.load %arg4[%c0_5, %c0_6] : memref<128x128xf32, #tpu.memory_space<vmem>>, vector<128x128xf32>
    tpu.vector_store %arg4[%c0_5, %c0_6], %6 {strides = array<i32>} : memref<128x128xf32, #tpu.memory_space<vmem>>, vector<128x128xf32>,
    return
  }
  func.func @transform_0(%arg0: i32) -> (i32, i32) {
    %c0_i32 = arith.constant 0 : i32
    %c0_i32_0 = arith.constant 0 : i32
    return %arg0, %c0_i32 : i32, i32
  }
  func.func @transform_1(%arg0: i32) -> (i32, i32) {
    %c0_i32 = arith.constant 0 : i32
    %c0_i32_0 = arith.constant 0 : i32
    %c0_i32_1 = arith.constant 0 : i32
    return %c0_i32, %c0_i32_0 : i32, i32
  }
  func.func @transform_2(%arg0: i32) -> (i32, i32) {
    %c0_i32 = arith.constant 0 : i32
    %c0_i32_0 = arith.constant 0 : i32
    %c0_i32_1 = arith.constant 0 : i32
    return %c0_i32, %c0_i32_0 : i32, i32
  }
  func.func @transform_3(%arg0: i32) -> (i32, i32) {
    %c0_i32 = arith.constant 0 : i32
    %c0_i32_0 = arith.constant 0 : i32
    return %arg0, %c0_i32 : i32, i32
  }
}

module attributes {stable_mosaic.version = 11 : i64} {
  func.func @_conv_mm_stats_kernel(%arg0: i32, %arg1: memref<512x72xf32, #tpu.memory_space<vmem>>, %arg2: memref<72x128xf32, #tpu.memory_space<vmem>>, %arg3: memref<1x128xf32, #tpu.memory_space<vmem>>, %arg4: memref<512x128xf32, #tpu.memory_space<vmem>>, %arg5: memref<1x1x128xf32, #tpu.memory_space<vmem>>, %arg6: memref<1x1x128xf32, #tpu.memory_space<vmem>>) attributes {dimension_semantics = [#tpu.dimension_semantics<parallel>], iteration_bounds = array<i64: 1>, scalar_prefetch = 0 : i64, scratch_operands = 0 : i64, tpu.core_type = #tpu.core_type<tc>, window_params = [{transform_indices = @transform_0, window_bounds = array<i64: 512, 72>}, {pipeline_mode = #tpu.pipeline_mode<synchronous>, transform_indices = @transform_1, window_bounds = array<i64: 72, 128>}, {pipeline_mode = #tpu.pipeline_mode<synchronous>, transform_indices = @transform_2, window_bounds = array<i64: 1, 128>}, {transform_indices = @transform_3, window_bounds = array<i64: 512, 128>}, {transform_indices = @transform_4, window_bounds = array<i64: 1, 1, 128>}, {transform_indices = @transform_5, window_bounds = array<i64: 1, 1, 128>}]} {
    %c0 = arith.constant 0 : index
    %c0_0 = arith.constant 0 : index
    %0 = vector.load %arg3[%c0, %c0_0] : memref<1x128xf32, #tpu.memory_space<vmem>>, vector<1x128xf32>
    %1 = vector.shape_cast %0 : vector<1x128xf32> to vector<1x128xf32>
    %2 = vector.broadcast %1 : vector<1x128xf32> to vector<512x128xf32>
    %c0_1 = arith.constant 0 : index
    %c0_2 = arith.constant 0 : index
    %3 = vector.load %arg1[%c0_1, %c0_2] : memref<512x72xf32, #tpu.memory_space<vmem>>, vector<512x72xf32>
    %c0_3 = arith.constant 0 : index
    %c0_4 = arith.constant 0 : index
    %4 = vector.load %arg2[%c0_3, %c0_4] : memref<72x128xf32, #tpu.memory_space<vmem>>, vector<72x128xf32>
    %cst = arith.constant dense<0.000000e+00> : vector<512x128xf32>
    %5 = tpu.matmul %3, %4, %cst {dimension_numbers = #tpu.dot_dimension_numbers<[1], [0], [0], [1], [0, 0, 1, 1], [], []>} : vector<512x72xf32>, vector<72x128xf32>, vector<512x128xf32> -> vector<512x128xf32>
    %6 = arith.addf %2, %5 : vector<512x128xf32>
    %c0_5 = arith.constant 0 : index
    %c0_6 = arith.constant 0 : index
    %7 = vector.load %arg4[%c0_5, %c0_6] : memref<512x128xf32, #tpu.memory_space<vmem>>, vector<512x128xf32>
    tpu.vector_store %arg4[%c0_5, %c0_6], %6 {strides = array<i32>} : memref<512x128xf32, #tpu.memory_space<vmem>>, vector<512x128xf32>,
    %c512_i32 = arith.constant 512 : i32
    %8 = arith.muli %arg0, %c512_i32 : i32
    %9 = tpu.iota {dimensions = array<i32: 0>} : vector<512x1xi32>
    %10 = vector.broadcast %8 : i32 to vector<512x1xi32>
    %11 = arith.addi %10, %9 : vector<512x1xi32>
    %c512_i32_7 = arith.constant 512 : i32
    %12 = vector.broadcast %c512_i32_7 : i32 to vector<512x1xi32>
    %13 = arith.cmpi slt, %11, %12 : vector<512x1xi32>
    %14 = arith.extui %13 : vector<512x1xi1> to vector<512x1xi32>
    %15 = arith.sitofp %14 : vector<512x1xi32> to vector<512x1xf32>
    %16 = vector.broadcast %15 : vector<512x1xf32> to vector<512x128xf32>
    %17 = arith.mulf %6, %16 : vector<512x128xf32>
    %cst_8 = arith.constant dense<0.000000e+00> : vector<128xf32>
    %18 = vector.multi_reduction <add>, %17, %cst_8 [0] : vector<512x128xf32> to vector<128xf32>
    %19 = vector.shape_cast %18 : vector<128xf32> to vector<1x128xf32>
    %c0_9 = arith.constant 0 : index
    %c0_10 = arith.constant 0 : index
    %c0_11 = arith.constant 0 : index
    %20 = vector.load %arg5[%c0_9, %c0_10, %c0_11] : memref<1x1x128xf32, #tpu.memory_space<vmem>>, vector<1x1x128xf32>
    %21 = vector.shape_cast %20 : vector<1x1x128xf32> to vector<1x128xf32>
    %22 = vector.shape_cast %19 : vector<1x128xf32> to vector<1x1x128xf32>
    tpu.vector_store %arg5[%c0_9, %c0_10, %c0_11], %22 {strides = array<i32>} : memref<1x1x128xf32, #tpu.memory_space<vmem>>, vector<1x1x128xf32>,
    %23 = arith.mulf %17, %6 : vector<512x128xf32>
    %cst_12 = arith.constant dense<0.000000e+00> : vector<128xf32>
    %24 = vector.multi_reduction <add>, %23, %cst_12 [0] : vector<512x128xf32> to vector<128xf32>
    %25 = vector.shape_cast %24 : vector<128xf32> to vector<1x128xf32>
    %c0_13 = arith.constant 0 : index
    %c0_14 = arith.constant 0 : index
    %c0_15 = arith.constant 0 : index
    %26 = vector.load %arg6[%c0_13, %c0_14, %c0_15] : memref<1x1x128xf32, #tpu.memory_space<vmem>>, vector<1x1x128xf32>
    %27 = vector.shape_cast %26 : vector<1x1x128xf32> to vector<1x128xf32>
    %28 = vector.shape_cast %25 : vector<1x128xf32> to vector<1x1x128xf32>
    tpu.vector_store %arg6[%c0_13, %c0_14, %c0_15], %28 {strides = array<i32>} : memref<1x1x128xf32, #tpu.memory_space<vmem>>, vector<1x1x128xf32>,
    return
  }
  func.func @transform_0(%arg0: i32) -> (i32, i32) {
    %c0_i32 = arith.constant 0 : i32
    %c0_i32_0 = arith.constant 0 : i32
    return %arg0, %c0_i32 : i32, i32
  }
  func.func @transform_1(%arg0: i32) -> (i32, i32) {
    %c0_i32 = arith.constant 0 : i32
    %c0_i32_0 = arith.constant 0 : i32
    %c0_i32_1 = arith.constant 0 : i32
    return %c0_i32, %c0_i32_0 : i32, i32
  }
  func.func @transform_2(%arg0: i32) -> (i32, i32) {
    %c0_i32 = arith.constant 0 : i32
    %c0_i32_0 = arith.constant 0 : i32
    %c0_i32_1 = arith.constant 0 : i32
    return %c0_i32, %c0_i32_0 : i32, i32
  }
  func.func @transform_3(%arg0: i32) -> (i32, i32) {
    %c0_i32 = arith.constant 0 : i32
    %c0_i32_0 = arith.constant 0 : i32
    return %arg0, %c0_i32 : i32, i32
  }
  func.func @transform_4(%arg0: i32) -> (i32, i32, i32) {
    %c0_i32 = arith.constant 0 : i32
    %c0_i32_0 = arith.constant 0 : i32
    %c0_i32_1 = arith.constant 0 : i32
    return %arg0, %c0_i32, %c0_i32_0 : i32, i32, i32
  }
  func.func @transform_5(%arg0: i32) -> (i32, i32, i32) {
    %c0_i32 = arith.constant 0 : i32
    %c0_i32_0 = arith.constant 0 : i32
    %c0_i32_1 = arith.constant 0 : i32
    return %arg0, %c0_i32, %c0_i32_0 : i32, i32, i32
  }
}

module attributes {stable_mosaic.version = 11 : i64} {
  func.func @_bn_lrelu_kernel(%arg0: i32, %arg1: memref<512x128xf32, #tpu.memory_space<vmem>>, %arg2: memref<1x128xf32, #tpu.memory_space<vmem>>, %arg3: memref<1x128xf32, #tpu.memory_space<vmem>>, %arg4: memref<512x128xf32, #tpu.memory_space<vmem>>) attributes {dimension_semantics = [#tpu.dimension_semantics<parallel>], iteration_bounds = array<i64: 1>, scalar_prefetch = 0 : i64, scratch_operands = 0 : i64, tpu.core_type = #tpu.core_type<tc>, window_params = [{transform_indices = @transform_0, window_bounds = array<i64: 512, 128>}, {pipeline_mode = #tpu.pipeline_mode<synchronous>, transform_indices = @transform_1, window_bounds = array<i64: 1, 128>}, {pipeline_mode = #tpu.pipeline_mode<synchronous>, transform_indices = @transform_2, window_bounds = array<i64: 1, 128>}, {transform_indices = @transform_3, window_bounds = array<i64: 512, 128>}]} {
    %c0 = arith.constant 0 : index
    %c0_0 = arith.constant 0 : index
    %0 = vector.load %arg1[%c0, %c0_0] : memref<512x128xf32, #tpu.memory_space<vmem>>, vector<512x128xf32>
    %c0_1 = arith.constant 0 : index
    %c0_2 = arith.constant 0 : index
    %1 = vector.load %arg2[%c0_1, %c0_2] : memref<1x128xf32, #tpu.memory_space<vmem>>, vector<1x128xf32>
    %2 = vector.broadcast %1 : vector<1x128xf32> to vector<512x128xf32>
    %3 = arith.mulf %0, %2 : vector<512x128xf32>
    %c0_3 = arith.constant 0 : index
    %c0_4 = arith.constant 0 : index
    %4 = vector.load %arg3[%c0_3, %c0_4] : memref<1x128xf32, #tpu.memory_space<vmem>>, vector<1x128xf32>
    %5 = vector.broadcast %4 : vector<1x128xf32> to vector<512x128xf32>
    %6 = arith.addf %3, %5 : vector<512x128xf32>
    %cst = arith.constant 0.000000e+00 : f32
    %7 = vector.broadcast %cst : f32 to vector<512x128xf32>
    %8 = arith.cmpf oge, %6, %7 : vector<512x128xf32>
    %cst_5 = arith.constant 1.000000e-01 : f32
    %9 = vector.broadcast %cst_5 : f32 to vector<512x128xf32>
    %10 = arith.mulf %9, %6 : vector<512x128xf32>
    %11 = arith.select %8, %6, %10 : vector<512x128xi1>, vector<512x128xf32>
    %c0_6 = arith.constant 0 : index
    %c0_7 = arith.constant 0 : index
    %12 = vector.load %arg4[%c0_6, %c0_7] : memref<512x128xf32, #tpu.memory_space<vmem>>, vector<512x128xf32>
    tpu.vector_store %arg4[%c0_6, %c0_7], %11 {strides = array<i32>} : memref<512x128xf32, #tpu.memory_space<vmem>>, vector<512x128xf32>,
    return
  }
  func.func @transform_0(%arg0: i32) -> (i32, i32) {
    %c0_i32 = arith.constant 0 : i32
    %c0_i32_0 = arith.constant 0 : i32
    return %arg0, %c0_i32 : i32, i32
  }
  func.func @transform_1(%arg0: i32) -> (i32, i32) {
    %c0_i32 = arith.constant 0 : i32
    %c0_i32_0 = arith.constant 0 : i32
    %c0_i32_1 = arith.constant 0 : i32
    return %c0_i32, %c0_i32_0 : i32, i32
  }
  func.func @transform_2(%arg0: i32) -> (i32, i32) {
    %c0_i32 = arith.constant 0 : i32
    %c0_i32_0 = arith.constant 0 : i32
    %c0_i32_1 = arith.constant 0 : i32
    return %c0_i32, %c0_i32_0 : i32, i32
  }
  func.func @transform_3(%arg0: i32) -> (i32, i32) {
    %c0_i32 = arith.constant 0 : i32
    %c0_i32_0 = arith.constant 0 : i32
    return %arg0, %c0_i32 : i32, i32
  }
}

module attributes {stable_mosaic.version = 11 : i64} {
  func.func @_conv_mm_stats_kernel(%arg0: i32, %arg1: memref<512x36xf32, #tpu.memory_space<vmem>>, %arg2: memref<36x128xf32, #tpu.memory_space<vmem>>, %arg3: memref<1x128xf32, #tpu.memory_space<vmem>>, %arg4: memref<512x128xf32, #tpu.memory_space<vmem>>, %arg5: memref<1x1x128xf32, #tpu.memory_space<vmem>>, %arg6: memref<1x1x128xf32, #tpu.memory_space<vmem>>) attributes {dimension_semantics = [#tpu.dimension_semantics<parallel>], iteration_bounds = array<i64: 1>, scalar_prefetch = 0 : i64, scratch_operands = 0 : i64, tpu.core_type = #tpu.core_type<tc>, window_params = [{transform_indices = @transform_0, window_bounds = array<i64: 512, 36>}, {pipeline_mode = #tpu.pipeline_mode<synchronous>, transform_indices = @transform_1, window_bounds = array<i64: 36, 128>}, {pipeline_mode = #tpu.pipeline_mode<synchronous>, transform_indices = @transform_2, window_bounds = array<i64: 1, 128>}, {transform_indices = @transform_3, window_bounds = array<i64: 512, 128>}, {transform_indices = @transform_4, window_bounds = array<i64: 1, 1, 128>}, {transform_indices = @transform_5, window_bounds = array<i64: 1, 1, 128>}]} {
    %c0 = arith.constant 0 : index
    %c0_0 = arith.constant 0 : index
    %0 = vector.load %arg3[%c0, %c0_0] : memref<1x128xf32, #tpu.memory_space<vmem>>, vector<1x128xf32>
    %1 = vector.shape_cast %0 : vector<1x128xf32> to vector<1x128xf32>
    %2 = vector.broadcast %1 : vector<1x128xf32> to vector<512x128xf32>
    %c0_1 = arith.constant 0 : index
    %c0_2 = arith.constant 0 : index
    %3 = vector.load %arg1[%c0_1, %c0_2] : memref<512x36xf32, #tpu.memory_space<vmem>>, vector<512x36xf32>
    %c0_3 = arith.constant 0 : index
    %c0_4 = arith.constant 0 : index
    %4 = vector.load %arg2[%c0_3, %c0_4] : memref<36x128xf32, #tpu.memory_space<vmem>>, vector<36x128xf32>
    %cst = arith.constant dense<0.000000e+00> : vector<512x128xf32>
    %5 = tpu.matmul %3, %4, %cst {dimension_numbers = #tpu.dot_dimension_numbers<[1], [0], [0], [1], [0, 0, 1, 1], [], []>} : vector<512x36xf32>, vector<36x128xf32>, vector<512x128xf32> -> vector<512x128xf32>
    %6 = arith.addf %2, %5 : vector<512x128xf32>
    %c0_5 = arith.constant 0 : index
    %c0_6 = arith.constant 0 : index
    %7 = vector.load %arg4[%c0_5, %c0_6] : memref<512x128xf32, #tpu.memory_space<vmem>>, vector<512x128xf32>
    tpu.vector_store %arg4[%c0_5, %c0_6], %6 {strides = array<i32>} : memref<512x128xf32, #tpu.memory_space<vmem>>, vector<512x128xf32>,
    %c512_i32 = arith.constant 512 : i32
    %8 = arith.muli %arg0, %c512_i32 : i32
    %9 = tpu.iota {dimensions = array<i32: 0>} : vector<512x1xi32>
    %10 = vector.broadcast %8 : i32 to vector<512x1xi32>
    %11 = arith.addi %10, %9 : vector<512x1xi32>
    %c512_i32_7 = arith.constant 512 : i32
    %12 = vector.broadcast %c512_i32_7 : i32 to vector<512x1xi32>
    %13 = arith.cmpi slt, %11, %12 : vector<512x1xi32>
    %14 = arith.extui %13 : vector<512x1xi1> to vector<512x1xi32>
    %15 = arith.sitofp %14 : vector<512x1xi32> to vector<512x1xf32>
    %16 = vector.broadcast %15 : vector<512x1xf32> to vector<512x128xf32>
    %17 = arith.mulf %6, %16 : vector<512x128xf32>
    %cst_8 = arith.constant dense<0.000000e+00> : vector<128xf32>
    %18 = vector.multi_reduction <add>, %17, %cst_8 [0] : vector<512x128xf32> to vector<128xf32>
    %19 = vector.shape_cast %18 : vector<128xf32> to vector<1x128xf32>
    %c0_9 = arith.constant 0 : index
    %c0_10 = arith.constant 0 : index
    %c0_11 = arith.constant 0 : index
    %20 = vector.load %arg5[%c0_9, %c0_10, %c0_11] : memref<1x1x128xf32, #tpu.memory_space<vmem>>, vector<1x1x128xf32>
    %21 = vector.shape_cast %20 : vector<1x1x128xf32> to vector<1x128xf32>
    %22 = vector.shape_cast %19 : vector<1x128xf32> to vector<1x1x128xf32>
    tpu.vector_store %arg5[%c0_9, %c0_10, %c0_11], %22 {strides = array<i32>} : memref<1x1x128xf32, #tpu.memory_space<vmem>>, vector<1x1x128xf32>,
    %23 = arith.mulf %17, %6 : vector<512x128xf32>
    %cst_12 = arith.constant dense<0.000000e+00> : vector<128xf32>
    %24 = vector.multi_reduction <add>, %23, %cst_12 [0] : vector<512x128xf32> to vector<128xf32>
    %25 = vector.shape_cast %24 : vector<128xf32> to vector<1x128xf32>
    %c0_13 = arith.constant 0 : index
    %c0_14 = arith.constant 0 : index
    %c0_15 = arith.constant 0 : index
    %26 = vector.load %arg6[%c0_13, %c0_14, %c0_15] : memref<1x1x128xf32, #tpu.memory_space<vmem>>, vector<1x1x128xf32>
    %27 = vector.shape_cast %26 : vector<1x1x128xf32> to vector<1x128xf32>
    %28 = vector.shape_cast %25 : vector<1x128xf32> to vector<1x1x128xf32>
    tpu.vector_store %arg6[%c0_13, %c0_14, %c0_15], %28 {strides = array<i32>} : memref<1x1x128xf32, #tpu.memory_space<vmem>>, vector<1x1x128xf32>,
    return
  }
  func.func @transform_0(%arg0: i32) -> (i32, i32) {
    %c0_i32 = arith.constant 0 : i32
    %c0_i32_0 = arith.constant 0 : i32
    return %arg0, %c0_i32 : i32, i32
  }
  func.func @transform_1(%arg0: i32) -> (i32, i32) {
    %c0_i32 = arith.constant 0 : i32
    %c0_i32_0 = arith.constant 0 : i32
    %c0_i32_1 = arith.constant 0 : i32
    return %c0_i32, %c0_i32_0 : i32, i32
  }
  func.func @transform_2(%arg0: i32) -> (i32, i32) {
    %c0_i32 = arith.constant 0 : i32
    %c0_i32_0 = arith.constant 0 : i32
    %c0_i32_1 = arith.constant 0 : i32
    return %c0_i32, %c0_i32_0 : i32, i32
  }
  func.func @transform_3(%arg0: i32) -> (i32, i32) {
    %c0_i32 = arith.constant 0 : i32
    %c0_i32_0 = arith.constant 0 : i32
    return %arg0, %c0_i32 : i32, i32
  }
  func.func @transform_4(%arg0: i32) -> (i32, i32, i32) {
    %c0_i32 = arith.constant 0 : i32
    %c0_i32_0 = arith.constant 0 : i32
    %c0_i32_1 = arith.constant 0 : i32
    return %arg0, %c0_i32, %c0_i32_0 : i32, i32, i32
  }
  func.func @transform_5(%arg0: i32) -> (i32, i32, i32) {
    %c0_i32 = arith.constant 0 : i32
    %c0_i32_0 = arith.constant 0 : i32
    %c0_i32_1 = arith.constant 0 : i32
    return %arg0, %c0_i32, %c0_i32_0 : i32, i32, i32
  }
}

</mosaic_0001>

<bundles_post_ra>
// kernel: tile.8
= control target key start
LH: loop header
LB: loop body
LE: loop exit
PB: predicated region body
PF: predicated region fallthrough
CT: control target
= control target key end

     0   :  { %s22_s0 = inlined_call_operand.vmem [shape: f32[4], index: 0, kind: input, shape index: {}]   ;;  %s23_s1 = inlined_call_operand.vmem [shape: f32[4,4], index: 1, kind: output, shape index: {}]  }
   0x1   :  { %v4_v0 = vld [vmem:[%s22_s0] ss:$0 sm:$0xff] }
   0x2   :  { %5 = vst [vmem:[%s23_s1] sm:$0xf] %v4_v0 }

// kernel: tile.9
= control target key start
LH: loop header
LB: loop body
LE: loop exit
PB: predicated region body
PF: predicated region fallthrough
CT: control target
= control target key end

     0   :  { %s37_s8 = smov 4   ;;  %s38_s9 = smov 8   ;;  %vm7_vm0 = vcmask 31744   ;;  %vm13_vm1 = vcmask 130144   ;;  %vm19_vm2 = vcmask 97344   ;;  %vm25_vm3 = vcmask 64544   ;;  %s55_s0 = inlined_call_operand.vmem [shape: f32[4,4], index: 0, kind: input, shape index: {}]   ;;  %s56_s1 = inlined_call_operand.vmem [shape: f32[16], index: 1, kind: output, shape index: {}]  }
   0x1   :  { %v4_v0 = vld [vmem:[%s55_s0] sm:$0xf]  ;;  %s36_s0 = smov 12  }
   0x2   :  { %5 = vst [vmem:[#allocation1] sm:$0xf] %v4_v0 }
   0x9   :  { %v10_v1 = vld [vmem:[#allocation1 + $0x3] sm:$0x1]   ;;  %v22_v2 = vld [vmem:[#allocation1 + $0x1] sm:$0x1]   ;;  %v16_v3 = vld [vmem:[#allocation1 + $0x2] sm:$0x1]  }
   0xa   :  { %11 = vrot.lane.b32.xlu0 %v10_v1, %s36_s0  ;;  %23 = vrot.lane.b32.xlu1 %v22_v2, %s37_s8  ;;  %v6_v4 = vld [vmem:[#allocation1] sm:$0x1]  }
   0xb   :  { %8 = vst.msk [vmem:[#allocation0] sm:$0x1] %vm7_vm0, %v6_v4  }
  0x12   :  { %17 = vrot.lane.b32.xlu0 %v16_v3, %s38_s9 }
  0x7c   :  { %v12_v5 = vpop.permute.xlu0 %11   ;;  %v24_v6 = vpop.permute.xlu1 %23  }
  0x7d   :  { %14 = vst.msk [vmem:[#allocation0] sm:$0x1] %vm13_vm1, %v12_v5  }
  0x84   :  { %v18_v7 = vpop.permute.xlu0 %17  }
  0x85   :  { %20 = vst.msk [vmem:[#allocation0] sm:$0x1] %vm19_vm2, %v18_v7  }
  0x86   :  { %26 = vst.msk [vmem:[#allocation0] sm:$0x1] %vm25_vm3, %v24_v6  }
  0x8d   :  { %v29_v8 = vld [vmem:[#allocation0] sm:$0x1] }
  0x8e   :  { %32 = vst [vmem:[%s56_s1] sm:$0x1] %v29_v8 }

// kernel: upconv_forward.5
= control target key start
LH: loop header
LB: loop body
LE: loop exit
PB: predicated region body
PF: predicated region fallthrough
CT: control target
= control target key end

     0   :  { %vm35_vm0 = vcmask 64512   ;;  %s343_s1 = inlined_call_operand.vmem [shape: f32[8,128], index: 1, kind: input, shape index: {}]   ;;  %s344_s0 = inlined_call_operand.vmem [shape: f32[128,8], index: 0, kind: input, shape index: {}]   ;;  %s345_s2 = inlined_call_operand.vmem [shape: f32[1,128], index: 2, kind: input, shape index: {}]   ;;  %s346_s3 = inlined_call_operand.vmem [shape: f32[128,128], index: 3, kind: output, shape index: {}]  }
   0x1   :  { %v34_v0 = vld [vmem:[%s343_s1] sm:$0xff]  ;;  %v27_v5 = vld [vmem:[%s344_s0 + $0x48] sm:$0xff]  ;;  %v28_v9 = vld [vmem:[%s344_s0 + $0x50] sm:$0xff] }
   0x2   :  { %v26_v1 = vld [vmem:[%s344_s0 + $0x40] sm:$0xff]  ;;  %202 = vmatpush.msra.mxu2 %v34_v0  ;;  %203 = vmatpush.msra.mxu3 %v34_v0  ;;  %v31_v6 = vld [vmem:[%s344_s0 + $0x68] sm:$0xff]  ;;  %v32_v10 = vld [vmem:[%s344_s0 + $0x70] sm:$0xff] }
   0x3   :  { %v30_v2 = vld [vmem:[%s344_s0 + $0x60] sm:$0xff]  ;;  %193 = vmatmul.msk.f32.vlgmr.msra.gmra.mxu2 %vm35_vm0, %v26_v1  ;;  %99 = vmatpush.msra.mxu0 %v34_v0  ;;  %v19_v7 = vld [vmem:[%s344_s0 + $0x8] sm:$0xff]  ;;  %v20_v11 = vld [vmem:[%s344_s0 + $0x10] sm:$0xff] }
   0x4   :  { %v18_v3 = vld [vmem:[%s344_s0] sm:$0xff]  ;;  %197 = vmatmul.msk.f32.vlgmr.msra.gmra.mxu3 %vm35_vm0, %v30_v2  ;;  %201 = vmatpush.msra.mxu1 %v34_v0  ;;  %v23_v8 = vld [vmem:[%s344_s0 + $0x28] sm:$0xff]  ;;  %v24_v12 = vld [vmem:[%s344_s0 + $0x30] sm:$0xff] }
   0x5   :  { %v22_v4 = vld [vmem:[%s344_s0 + $0x20] sm:$0xff]  ;;  %185 = vmatmul.msk.f32.vlgmr.msra.gmra.mxu0 %vm35_vm0, %v18_v3  ;;  %v29_v13 = vld [vmem:[%s344_s0 + $0x58] sm:$0xff] }
   0x6   :  { %189 = vmatmul.msk.f32.vlgmr.msra.gmra.mxu1 %vm35_vm0, %v22_v4  ;;  %v33_v14 = vld [vmem:[%s344_s0 + $0x78] sm:$0xff]  ;;  %v204_v17 = vld [vmem:[%s345_s2] ss:$0 sm:$0xff] }
   0x7   :  { %v21_v15 = vld [vmem:[%s344_s0 + $0x18] sm:$0xff] }
   0x8   :  { %v25_v16 = vld [vmem:[%s344_s0 + $0x38] sm:$0xff] }
   0xb   :  { %194 = vmatmul.msk.f32.gmra.mxu2 %vm35_vm0, %v27_v5 }
   0xc   :  { %198 = vmatmul.msk.f32.gmra.mxu3 %vm35_vm0, %v31_v6 }
   0xd   :  { %186 = vmatmul.msk.f32.gmra.mxu0 %vm35_vm0, %v19_v7 }
   0xe   :  { %190 = vmatmul.msk.f32.gmra.mxu1 %vm35_vm0, %v23_v8 }
  0x13   :  { %195 = vmatmul.msk.f32.gmra.mxu2 %vm35_vm0, %v28_v9 }
  0x14   :  { %199 = vmatmul.msk.f32.gmra.mxu3 %vm35_vm0, %v32_v10 }
  0x15   :  { %187 = vmatmul.msk.f32.gmra.mxu0 %vm35_vm0, %v20_v11 }
  0x16   :  { %191 = vmatmul.msk.f32.gmra.mxu1 %vm35_vm0, %v24_v12 }
  0x1b   :  { %196 = vmatmul.msk.f32.gmra.mxu2 %vm35_vm0, %v29_v13 }
  0x1c   :  { %200 = vmatmul.msk.f32.gmra.mxu3 %vm35_vm0, %v33_v14 }
  0x1d   :  { %188 = vmatmul.msk.f32.gmra.mxu0 %vm35_vm0, %v21_v15 }
  0x1e   :  { %192 = vmatmul.msk.f32.gmra.mxu1 %vm35_vm0, %v25_v16 }
  0x82   :  { %v101_v18 = vpop.f32.mrf.mxu0 }
  0x83   :  { %v113_v19 = vpop.f32.mrf.mxu1  ;;  %v149_v20 = vadd.f32 %v204_v17, %v101_v18 }
  0x84   :  { %v153_v21 = vadd.f32 %v204_v17, %v113_v19 }
  0x85   :  { %165 = vst [vmem:[%s346_s3] sm:$0xff] %v149_v20 }
  0x86   :  { %169 = vst [vmem:[%s346_s3 + $0x20] sm:$0xff] %v153_v21  ;;  %v125_v22 = vpop.f32.mrf.mxu2 }
  0x87   :  { %v137_v23 = vpop.f32.mrf.mxu3  ;;  %v157_v24 = vadd.f32 %v204_v17, %v125_v22 }
  0x88   :  { %v161_v25 = vadd.f32 %v204_v17, %v137_v23 }
  0x89   :  { %173 = vst [vmem:[%s346_s3 + $0x40] sm:$0xff] %v157_v24 }
  0x8a   :  { %177 = vst [vmem:[%s346_s3 + $0x60] sm:$0xff] %v161_v25  ;;  %v104_v26 = vpop.f32.mrf.mxu0 }
  0x8b   :  { %v116_v27 = vpop.f32.mrf.mxu1  ;;  %v150_v28 = vadd.f32 %v204_v17, %v104_v26 }
  0x8c   :  { %v154_v29 = vadd.f32 %v204_v17, %v116_v27 }
  0x8d   :  { %166 = vst [vmem:[%s346_s3 + $0x8] sm:$0xff] %v150_v28 }
  0x8e   :  { %170 = vst [vmem:[%s346_s3 + $0x28] sm:$0xff] %v154_v29  ;;  %v128_v30 = vpop.f32.mrf.mxu2 }
  0x8f   :  { %v140_v31 = vpop.f32.mrf.mxu3  ;;  %v158_v32 = vadd.f32 %v204_v17, %v128_v30 }
  0x90   :  { %v162_v33 = vadd.f32 %v204_v17, %v140_v31 }
  0x91   :  { %174 = vst [vmem:[%s346_s3 + $0x48] sm:$0xff] %v158_v32 }
  0x92   :  { %178 = vst [vmem:[%s346_s3 + $0x68] sm:$0xff] %v162_v33  ;;  %v107_v34 = vpop.f32.mrf.mxu0 }
  0x93   :  { %v119_v35 = vpop.f32.mrf.mxu1  ;;  %v151_v36 = vadd.f32 %v204_v17, %v107_v34 }
  0x94   :  { %v155_v37 = vadd.f32 %v204_v17, %v119_v35 }
  0x95   :  { %167 = vst [vmem:[%s346_s3 + $0x10] sm:$0xff] %v151_v36 }
  0x96   :  { %171 = vst [vmem:[%s346_s3 + $0x30] sm:$0xff] %v155_v37  ;;  %v131_v38 = vpop.f32.mrf.mxu2 }
  0x97   :  { %v143_v39 = vpop.f32.mrf.mxu3  ;;  %v159_v40 = vadd.f32 %v204_v17, %v131_v38 }
  0x98   :  { %v163_v41 = vadd.f32 %v204_v17, %v143_v39 }
  0x99   :  { %175 = vst [vmem:[%s346_s3 + $0x50] sm:$0xff] %v159_v40 }
  0x9a   :  { %179 = vst [vmem:[%s346_s3 + $0x70] sm:$0xff] %v163_v41  ;;  %v110_v42 = vpop.f32.mrf.mxu0 }
  0x9b   :  { %v122_v43 = vpop.f32.mrf.mxu1  ;;  %v152_v44 = vadd.f32 %v204_v17, %v110_v42 }
  0x9c   :  { %v156_v45 = vadd.f32 %v204_v17, %v122_v43 }
  0x9d   :  { %168 = vst [vmem:[%s346_s3 + $0x18] sm:$0xff] %v152_v44 }
  0x9e   :  { %172 = vst [vmem:[%s346_s3 + $0x38] sm:$0xff] %v156_v45  ;;  %v134_v46 = vpop.f32.mrf.mxu2 }
  0x9f   :  { %v146_v47 = vpop.f32.mrf.mxu3  ;;  %v160_v48 = vadd.f32 %v204_v17, %v134_v46 }
  0xa0   :  { %v164_v49 = vadd.f32 %v204_v17, %v146_v47 }
  0xa1   :  { %176 = vst [vmem:[%s346_s3 + $0x58] sm:$0xff] %v160_v48 }
  0xa2   :  { %180 = vst [vmem:[%s346_s3 + $0x78] sm:$0xff] %v164_v49 }

// kernel: upconv_forward.7
= control target key start
LH: loop header
LB: loop body
LE: loop exit
PB: predicated region body
PF: predicated region fallthrough
CT: control target
= control target key end

     0   :  { %s1020_s0 = inlined_call_operand.vmem [shape: f32[512,128], index: 0, kind: input, shape index: {}]   ;;  %s1021_s1 = inlined_call_operand.vmem [shape: f32[1,128], index: 1, kind: input, shape index: {}]   ;;  %s1022_s2 = inlined_call_operand.vmem [shape: f32[1,128], index: 2, kind: input, shape index: {}]   ;;  %s1023_s3 = inlined_call_operand.vmem [shape: f32[512,128], index: 3, kind: output, shape index: {}]  }
   0x1   :  { %v14_v0 = vld [vmem:[%s1020_s0] sm:$0xff]  ;;  %v15_v3 = vld [vmem:[%s1020_s0 + $0x8] sm:$0xff]  ;;  %v16_v6 = vld [vmem:[%s1020_s0 + $0x10] sm:$0xff] }
   0x2   :  { %v502_v1 = vld [vmem:[%s1021_s1] ss:$0 sm:$0xff]  ;;  %v17_v7 = vld [vmem:[%s1020_s0 + $0x18] sm:$0xff]  ;;  %v19_v12 = vld [vmem:[%s1020_s0 + $0x28] sm:$0xff] }
   0x3   :  { %v507_v2 = vld [vmem:[%s1022_s2] ss:$0 sm:$0xff]  ;;  %v82_v4 = vmul.f32 %v502_v1, %v14_v0  ;;  %v83_v5 = vmul.f32 %v502_v1, %v15_v3  ;;  %v84_v9 = vmul.f32 %v502_v1, %v16_v6  ;;  %v85_v10 = vmul.f32 %v502_v1, %v17_v7  ;;  %v20_v13 = vld [vmem:[%s1020_s0 + $0x30] sm:$0xff]  ;;  %v21_v14 = vld [vmem:[%s1020_s0 + $0x38] sm:$0xff] }
   0x4   :  { %v18_v8 = vld [vmem:[%s1020_s0 + $0x20] sm:$0xff]  ;;  %v87_v17 = vmul.f32 %v502_v1, %v19_v12  ;;  %v88_v18 = vmul.f32 %v502_v1, %v20_v13  ;;  %v89_v22 = vmul.f32 %v502_v1, %v21_v14  ;;  %v23_v24 = vld [vmem:[%s1020_s0 + $0x48] sm:$0xff]  ;;  %v24_v32 = vld [vmem:[%s1020_s0 + $0x50] sm:$0xff] }
   0x5   :  { %v86_v11 = vmul.f32 %v502_v1, %v18_v8  ;;  %v150_v15 = vadd.f32 %v507_v2, %v82_v4  ;;  %v151_v16 = vadd.f32 %v507_v2, %v83_v5  ;;  %v152_v19 = vadd.f32 %v507_v2, %v84_v9  ;;  %v22_v23 = vld [vmem:[%s1020_s0 + $0x40] sm:$0xff]  ;;  %v25_v41 = vld [vmem:[%s1020_s0 + $0x58] sm:$0xff]  ;;  %v27_v52 = vld [vmem:[%s1020_s0 + $0x68] sm:$0xff] }
   0x6   :  { %v153_v20 = vadd.f32 %v507_v2, %v85_v10  ;;  %v155_v35 = vadd.f32 %v507_v2, %v87_v17  ;;  %v156_v36 = vadd.f32 %v507_v2, %v88_v18  ;;  %v157_v38 = vadd.f32 %v507_v2, %v89_v22  ;;  %v26_v51 = vld [vmem:[%s1020_s0 + $0x60] sm:$0xff]  ;;  %v28_v56 = vld [vmem:[%s1020_s0 + $0x70] sm:$0xff]  ;;  %v29_v59 = vld [vmem:[%s1020_s0 + $0x78] sm:$0xff] }
   0x7   :  { %v154_v21 = vadd.f32 %v507_v2, %v86_v11  ;;  %vm214_vm0 = vcmp.ge.f32.partialorder %v150_v15, 0.0  ;;  %v278_v25 = vmul.f32 0.1, %v150_v15  ;;  %vm215_vm1 = vcmp.ge.f32.partialorder %v151_v16, 0.0  ;;  %v30_v0 = vld [vmem:[%s1020_s0 + $0x80] sm:$0xff]  ;;  %v31_v3 = vld [vmem:[%s1020_s0 + $0x88] sm:$0xff] }
   0x8   :  { %v279_v26 = vmul.f32 0.1, %v151_v16  ;;  %vm216_vm2 = vcmp.ge.f32.partialorder %v152_v19, 0.0  ;;  %v280_v27 = vmul.f32 0.1, %v152_v19  ;;  %vm217_vm3 = vcmp.ge.f32.partialorder %v153_v20, 0.0 }
   0x9   :  { %v281_v28 = vmul.f32 0.1, %v153_v20  ;;  %v342_v29 = vsel %vm214_vm0, %v150_v15, %v278_v25  ;;  %vm218_vm4 = vcmp.ge.f32.partialorder %v154_v21, 0.0  ;;  %v282_v31 = vmul.f32 0.1, %v154_v21  ;;  %v34_v25 = vld [vmem:[%s1020_s0 + $0xa0] sm:$0xff] }
   0xa   :  { %v343_v30 = vsel %vm215_vm1, %v151_v16, %v279_v26  ;;  %406 = vst [vmem:[%s1023_s3] sm:$0xff] %v342_v29  ;;  %v344_v33 = vsel %vm216_vm2, %v152_v19, %v280_v27  ;;  %v90_v39 = vmul.f32 %v502_v1, %v22_v23  ;;  %v91_v40 = vmul.f32 %v502_v1, %v23_v24  ;;  %v33_v24 = vld [vmem:[%s1020_s0 + $0x98] sm:$0xff]  ;;  %v35_v26 = vld [vmem:[%s1020_s0 + $0xa8] sm:$0xff] }
   0xb   :  { %v345_v34 = vsel %vm217_vm3, %v153_v20, %v281_v28  ;;  %407 = vst [vmem:[%s1023_s3 + $0x8] sm:$0xff] %v343_v30  ;;  %v346_v37 = vsel %vm218_vm4, %v154_v21, %v282_v31  ;;  %vm219_vm5 = vcmp.ge.f32.partialorder %v155_v35, 0.0  ;;  %v283_v42 = vmul.f32 0.1, %v155_v35  ;;  %v32_v20 = vld [vmem:[%s1020_s0 + $0x90] sm:$0xff]  ;;  %v37_v31 = vld [vmem:[%s1020_s0 + $0xb8] sm:$0xff] }
   0xc   :  { %408 = vst [vmem:[%s1023_s3 + $0x10] sm:$0xff] %v344_v33  ;;  %vm220_vm6 = vcmp.ge.f32.partialorder %v156_v36, 0.0  ;;  %v92_v43 = vmul.f32 %v502_v1, %v24_v32  ;;  %v284_v44 = vmul.f32 0.1, %v156_v36  ;;  %vm221_vm7 = vcmp.ge.f32.partialorder %v157_v38, 0.0  ;;  %v36_v30 = vld [vmem:[%s1020_s0 + $0xb0] sm:$0xff] }
   0xd   :  { %409 = vst [vmem:[%s1023_s3 + $0x18] sm:$0xff] %v345_v34  ;;  %v285_v45 = vmul.f32 0.1, %v157_v38  ;;  %v158_v46 = vadd.f32 %v507_v2, %v90_v39  ;;  %v347_v47 = vsel %vm219_vm5, %v155_v35, %v283_v42  ;;  %v159_v48 = vadd.f32 %v507_v2, %v91_v40  ;;  %v38_v35 = vld [vmem:[%s1020_s0 + $0xc0] sm:$0xff] }
   0xe   :  { %410 = vst [vmem:[%s1023_s3 + $0x20] sm:$0xff] %v346_v37  ;;  %v160_v49 = vadd.f32 %v507_v2, %v92_v43  ;;  %v93_v50 = vmul.f32 %v502_v1, %v25_v41  ;;  %v348_v53 = vsel %vm220_vm6, %v156_v36, %v284_v44  ;;  %v94_v62 = vmul.f32 %v502_v1, %v26_v51  ;;  %v39_v51 = vld [vmem:[%s1020_s0 + $0xc8] sm:$0xff] }
   0xf   :  { %411 = vst [vmem:[%s1023_s3 + $0x28] sm:$0xff] %v347_v47  ;;  %v349_v54 = vsel %vm221_vm7, %v157_v38, %v285_v45  ;;  %vm222_vm8 = vcmp.ge.f32.partialorder %v158_v46, 0.0  ;;  %v286_v55 = vmul.f32 0.1, %v158_v46  ;;  %vm223_vm9 = vcmp.ge.f32.partialorder %v159_v48, 0.0 }
  0x10   :  { %412 = vst [vmem:[%s1023_s3 + $0x30] sm:$0xff] %v348_v53  ;;  %v287_v57 = vmul.f32 0.1, %v159_v48  ;;  %vm224_vm10 = vcmp.ge.f32.partialorder %v160_v49, 0.0  ;;  %v161_v58 = vadd.f32 %v507_v2, %v93_v50  ;;  %v288_v61 = vmul.f32 0.1, %v160_v49 }
  0x11   :  { %413 = vst [vmem:[%s1023_s3 + $0x38] sm:$0xff] %v349_v54  ;;  %v350_v60 = vsel %vm222_vm8, %v158_v46, %v286_v55  ;;  %v95_v63 = vmul.f32 %v502_v1, %v27_v52  ;;  %v96_v6 = vmul.f32 %v502_v1, %v28_v56  ;;  %v162_v8 = vadd.f32 %v507_v2, %v94_v62  ;;  %v40_v52 = vld [vmem:[%s1020_s0 + $0xd0] sm:$0xff] }
  0x12   :  { %414 = vst [vmem:[%s1023_s3 + $0x40] sm:$0xff] %v350_v60  ;;  %v351_v4 = vsel %vm223_vm9, %v159_v48, %v287_v57  ;;  %vm225_vm11 = vcmp.ge.f32.partialorder %v161_v58, 0.0  ;;  %v289_v5 = vmul.f32 0.1, %v161_v58  ;;  %v352_v7 = vsel %vm224_vm10, %v160_v49, %v288_v61  ;;  %v41_v57 = vld [vmem:[%s1020_s0 + $0xd8] sm:$0xff] }
  0x13   :  { %415 = vst [vmem:[%s1023_s3 + $0x48] sm:$0xff] %v351_v4  ;;  %v163_v9 = vadd.f32 %v507_v2, %v95_v63  ;;  %v97_v10 = vmul.f32 %v502_v1, %v29_v59  ;;  %v164_v12 = vadd.f32 %v507_v2, %v96_v6  ;;  %v98_v13 = vmul.f32 %v502_v1, %v30_v0  ;;  %v43_v4 = vld [vmem:[%s1020_s0 + $0xe8] sm:$0xff] }
  0x14   :  { %416 = vst [vmem:[%s1023_s3 + $0x50] sm:$0xff] %v352_v7  ;;  %v353_v11 = vsel %vm225_vm11, %v161_v58, %v289_v5  ;;  %v99_v14 = vmul.f32 %v502_v1, %v31_v3  ;;  %vm226_vm12 = vcmp.ge.f32.partialorder %v162_v8, 0.0  ;;  %v290_v15 = vmul.f32 0.1, %v162_v8  ;;  %v42_v58 = vld [vmem:[%s1020_s0 + $0xe0] sm:$0xff] }
  0x15   :  { %417 = vst [vmem:[%s1023_s3 + $0x58] sm:$0xff] %v353_v11  ;;  %vm227_vm13 = vcmp.ge.f32.partialorder %v163_v9, 0.0  ;;  %v165_v16 = vadd.f32 %v507_v2, %v97_v10  ;;  %v291_v17 = vmul.f32 0.1, %v163_v9  ;;  %vm228_vm14 = vcmp.ge.f32.partialorder %v164_v12, 0.0 }
  0x16   :  { %v292_v18 = vmul.f32 0.1, %v164_v12  ;;  %v166_v19 = vadd.f32 %v507_v2, %v98_v13  ;;  %v354_v21 = vsel %vm226_vm12, %v162_v8, %v290_v15  ;;  %v167_v23 = vadd.f32 %v507_v2, %v99_v14 }
  0x17   :  { %vm229_vm15 = vcmp.ge.f32.partialorder %v165_v16, 0.0  ;;  %v293_v22 = vmul.f32 0.1, %v165_v16  ;;  %418 = vst [vmem:[%s1023_s3 + $0x60] sm:$0xff] %v354_v21  ;;  %v355_v27 = vsel %vm227_vm13, %v163_v9, %v291_v17  ;;  %v100_v34 = vmul.f32 %v502_v1, %v32_v20  ;;  %v44_v9 = vld [vmem:[%s1020_s0 + $0xf0] sm:$0xff]  ;;  %v45_v20 = vld [vmem:[%s1020_s0 + $0xf8] sm:$0xff] }
  0x18   :  { %v356_v28 = vsel %vm228_vm14, %v164_v12, %v292_v18  ;;  %vm230_vm0 = vcmp.ge.f32.partialorder %v166_v19, 0.0  ;;  %v294_v29 = vmul.f32 0.1, %v166_v19  ;;  %419 = vst [vmem:[%s1023_s3 + $0x68] sm:$0xff] %v355_v27  ;;  %vm231_vm1 = vcmp.ge.f32.partialorder %v167_v23, 0.0  ;;  %v46_v21 = vld [vmem:[%s1020_s0 + $0x100] sm:$0xff] }
  0x19   :  { %v357_v32 = vsel %vm229_vm15, %v165_v16, %v293_v22  ;;  %v295_v33 = vmul.f32 0.1, %v167_v23  ;;  %420 = vst [vmem:[%s1023_s3 + $0x70] sm:$0xff] %v356_v28  ;;  %v101_v37 = vmul.f32 %v502_v1, %v33_v24  ;;  %v102_v38 = vmul.f32 %v502_v1, %v34_v25 }
  0x1a   :  { %v358_v36 = vsel %vm230_vm0, %v166_v19, %v294_v29  ;;  %v103_v39 = vmul.f32 %v502_v1, %v35_v26  ;;  %421 = vst [vmem:[%s1023_s3 + $0x78] sm:$0xff] %v357_v32  ;;  %v168_v41 = vadd.f32 %v507_v2, %v100_v34  ;;  %v104_v42 = vmul.f32 %v502_v1, %v36_v30  ;;  %v48_v32 = vld [vmem:[%s1020_s0 + $0x110] sm:$0xff] }
  0x1b   :  { %v359_v40 = vsel %vm231_vm1, %v167_v23, %v295_v33  ;;  %v105_v43 = vmul.f32 %v502_v1, %v37_v31  ;;  %422 = vst [vmem:[%s1023_s3 + $0x80] sm:$0xff] %v358_v36  ;;  %v169_v44 = vadd.f32 %v507_v2, %v101_v37  ;;  %v170_v45 = vadd.f32 %v507_v2, %v102_v38  ;;  %v47_v31 = vld [vmem:[%s1020_s0 + $0x108] sm:$0xff]  ;;  %v49_v33 = vld [vmem:[%s1020_s0 + $0x118] sm:$0xff] }
  0x1c   :  { %v171_v46 = vadd.f32 %v507_v2, %v103_v39  ;;  %v106_v47 = vmul.f32 %v502_v1, %v38_v35  ;;  %423 = vst [vmem:[%s1023_s3 + $0x88] sm:$0xff] %v359_v40  ;;  %vm232_vm2 = vcmp.ge.f32.partialorder %v168_v41, 0.0  ;;  %v296_v48 = vmul.f32 0.1, %v168_v41 }
  0x1d   :  { %v172_v49 = vadd.f32 %v507_v2, %v104_v42  ;;  %v173_v50 = vadd.f32 %v507_v2, %v105_v43  ;;  %vm233_vm3 = vcmp.ge.f32.partialorder %v169_v44, 0.0  ;;  %v297_v53 = vmul.f32 0.1, %v169_v44 }
  0x1e   :  { %vm234_vm4 = vcmp.ge.f32.partialorder %v170_v45, 0.0  ;;  %v298_v54 = vmul.f32 0.1, %v170_v45  ;;  %v360_v55 = vsel %vm232_vm2, %v168_v41, %v296_v48  ;;  %vm235_vm5 = vcmp.ge.f32.partialorder %v171_v46, 0.0 }
  0x1f   :  { %v299_v56 = vmul.f32 0.1, %v171_v46  ;;  %vm236_vm6 = vcmp.ge.f32.partialorder %v172_v49, 0.0  ;;  %424 = vst [vmem:[%s1023_s3 + $0x90] sm:$0xff] %v360_v55  ;;  %v361_v59 = vsel %vm233_vm3, %v169_v44, %v297_v53  ;;  %v300_v61 = vmul.f32 0.1, %v172_v49 }
  0x20   :  { %v362_v60 = vsel %vm234_vm4, %v170_v45, %v298_v54  ;;  %vm237_vm7 = vcmp.ge.f32.partialorder %v173_v50, 0.0  ;;  %425 = vst [vmem:[%s1023_s3 + $0x98] sm:$0xff] %v361_v59  ;;  %v301_v63 = vmul.f32 0.1, %v173_v50  ;;  %v174_v0 = vadd.f32 %v507_v2, %v106_v47  ;;  %v50_v44 = vld [vmem:[%s1020_s0 + $0x120] sm:$0xff]  ;;  %v51_v45 = vld [vmem:[%s1020_s0 + $0x128] sm:$0xff] }
  0x21   :  { %v363_v62 = vsel %vm235_vm5, %v171_v46, %v299_v56  ;;  %v107_v3 = vmul.f32 %v502_v1, %v39_v51  ;;  %426 = vst [vmem:[%s1023_s3 + $0xa0] sm:$0xff] %v362_v60  ;;  %v364_v5 = vsel %vm236_vm6, %v172_v49, %v300_v61  ;;  %v108_v6 = vmul.f32 %v502_v1, %v40_v52  ;;  %v52_v46 = vld [vmem:[%s1020_s0 + $0x130] sm:$0xff] }
  0x22   :  { %v109_v7 = vmul.f32 %v502_v1, %v41_v57  ;;  %v110_v8 = vmul.f32 %v502_v1, %v42_v58  ;;  %427 = vst [vmem:[%s1023_s3 + $0xa8] sm:$0xff] %v363_v62  ;;  %v365_v10 = vsel %vm237_vm7, %v173_v50, %v301_v63  ;;  %vm238_vm8 = vcmp.ge.f32.partialorder %v174_v0, 0.0  ;;  %v53_v57 = vld [vmem:[%s1020_s0 + $0x138] sm:$0xff] }
  0x23   :  { %v302_v11 = vmul.f32 0.1, %v174_v0  ;;  %v175_v12 = vadd.f32 %v507_v2, %v107_v3  ;;  %428 = vst [vmem:[%s1023_s3 + $0xb0] sm:$0xff] %v364_v5  ;;  %v176_v13 = vadd.f32 %v507_v2, %v108_v6  ;;  %v111_v16 = vmul.f32 %v502_v1, %v43_v4  ;;  %v54_v5 = vld [vmem:[%s1020_s0 + $0x140] sm:$0xff]  ;;  %v55_v6 = vld [vmem:[%s1020_s0 + $0x148] sm:$0xff] }
  0x24   :  { %v177_v14 = vadd.f32 %v507_v2, %v109_v7  ;;  %v178_v15 = vadd.f32 %v507_v2, %v110_v8  ;;  %429 = vst [vmem:[%s1023_s3 + $0xb8] sm:$0xff] %v365_v10  ;;  %v112_v19 = vmul.f32 %v502_v1, %v44_v9  ;;  %v113_v29 = vmul.f32 %v502_v1, %v45_v20  ;;  %v56_v10 = vld [vmem:[%s1020_s0 + $0x150] sm:$0xff] }
  0x25   :  { %v366_v17 = vsel %vm238_vm8, %v174_v0, %v302_v11  ;;  %vm239_vm9 = vcmp.ge.f32.partialorder %v175_v12, 0.0  ;;  %v303_v18 = vmul.f32 0.1, %v175_v12  ;;  %vm240_vm10 = vcmp.ge.f32.partialorder %v176_v13, 0.0 }
  0x26   :  { %430 = vst [vmem:[%s1023_s3 + $0xc0] sm:$0xff] %v366_v17  ;;  %v304_v22 = vmul.f32 0.1, %v176_v13  ;;  %vm241_vm11 = vcmp.ge.f32.partialorder %v177_v14, 0.0  ;;  %vm242_vm12 = vcmp.ge.f32.partialorder %v178_v15, 0.0  ;;  %v179_v26 = vadd.f32 %v507_v2, %v111_v16 }
  0x27   :  { %v367_v23 = vsel %vm239_vm9, %v175_v12, %v303_v18  ;;  %v305_v24 = vmul.f32 0.1, %v177_v14  ;;  %v306_v25 = vmul.f32 0.1, %v178_v15  ;;  %v180_v28 = vadd.f32 %v507_v2, %v112_v19  ;;  %v58_v18 = vld [vmem:[%s1020_s0 + $0x160] sm:$0xff]  ;;  %v59_v19 = vld [vmem:[%s1020_s0 + $0x168] sm:$0xff] }
  0x28   :  { %431 = vst [vmem:[%s1023_s3 + $0xc8] sm:$0xff] %v367_v23  ;;  %v368_v27 = vsel %vm240_vm10, %v176_v13, %v304_v22  ;;  %v114_v30 = vmul.f32 %v502_v1, %v46_v21  ;;  %vm243_vm13 = vcmp.ge.f32.partialorder %v179_v26, 0.0  ;;  %v307_v36 = vmul.f32 0.1, %v179_v26  ;;  %v57_v13 = vld [vmem:[%s1020_s0 + $0x158] sm:$0xff] }
  0x29   :  { %432 = vst [vmem:[%s1023_s3 + $0xd0] sm:$0xff] %v368_v27  ;;  %v369_v34 = vsel %vm241_vm11, %v177_v14, %v305_v24  ;;  %v370_v35 = vsel %vm242_vm12, %v178_v15, %v306_v25  ;;  %vm244_vm14 = vcmp.ge.f32.partialorder %v180_v28, 0.0  ;;  %v308_v37 = vmul.f32 0.1, %v180_v28 }
  0x2a   :  { %433 = vst [vmem:[%s1023_s3 + $0xd8] sm:$0xff] %v369_v34  ;;  %v181_v38 = vadd.f32 %v507_v2, %v113_v29  ;;  %v182_v39 = vadd.f32 %v507_v2, %v114_v30  ;;  %v371_v40 = vsel %vm243_vm13, %v179_v26, %v307_v36  ;;  %v115_v41 = vmul.f32 %v502_v1, %v47_v31  ;;  %v60_v36 = vld [vmem:[%s1020_s0 + $0x170] sm:$0xff] }
  0x2b   :  { %434 = vst [vmem:[%s1023_s3 + $0xe0] sm:$0xff] %v370_v35  ;;  %v116_v42 = vmul.f32 %v502_v1, %v48_v32  ;;  %v117_v43 = vmul.f32 %v502_v1, %v49_v33  ;;  %v372_v47 = vsel %vm244_vm14, %v180_v28, %v308_v37  ;;  %v118_v54 = vmul.f32 %v502_v1, %v50_v44 }
  0x2c   :  { %435 = vst [vmem:[%s1023_s3 + $0xe8] sm:$0xff] %v371_v40  ;;  %vm245_vm15 = vcmp.ge.f32.partialorder %v181_v38, 0.0  ;;  %v309_v48 = vmul.f32 0.1, %v181_v38  ;;  %vm246_vm0 = vcmp.ge.f32.partialorder %v182_v39, 0.0  ;;  %v183_v50 = vadd.f32 %v507_v2, %v115_v41  ;;  %v61_v40 = vld [vmem:[%s1020_s0 + $0x178] sm:$0xff] }
  0x2d   :  { %436 = vst [vmem:[%s1023_s3 + $0xf0] sm:$0xff] %v372_v47  ;;  %v310_v49 = vmul.f32 0.1, %v182_v39  ;;  %v184_v51 = vadd.f32 %v507_v2, %v116_v42  ;;  %v185_v52 = vadd.f32 %v507_v2, %v117_v43  ;;  %v119_v55 = vmul.f32 %v502_v1, %v51_v45  ;;  %v62_v41 = vld [vmem:[%s1020_s0 + $0x180] sm:$0xff]  ;;  %v63_v42 = vld [vmem:[%s1020_s0 + $0x188] sm:$0xff]  ;;  %v65_v47 = vld [vmem:[%s1020_s0 + $0x198] sm:$0xff] }
  0x2e   :  { %v373_v53 = vsel %vm245_vm15, %v181_v38, %v309_v48  ;;  %v120_v56 = vmul.f32 %v502_v1, %v52_v46  ;;  %vm247_vm1 = vcmp.ge.f32.partialorder %v183_v50, 0.0  ;;  %v311_v59 = vmul.f32 0.1, %v183_v50  ;;  %v64_v46 = vld [vmem:[%s1020_s0 + $0x190] sm:$0xff] }
  0x2f   :  { %437 = vst [vmem:[%s1023_s3 + $0xf8] sm:$0xff] %v373_v53  ;;  %v374_v58 = vsel %vm246_vm0, %v182_v39, %v310_v49  ;;  %vm248_vm2 = vcmp.ge.f32.partialorder %v184_v51, 0.0  ;;  %v312_v60 = vmul.f32 0.1, %v184_v51  ;;  %vm249_vm3 = vcmp.ge.f32.partialorder %v185_v52, 0.0 }
  0x30   :  { %438 = vst [vmem:[%s1023_s3 + $0x100] sm:$0xff] %v374_v58  ;;  %v313_v61 = vmul.f32 0.1, %v185_v52  ;;  %v186_v62 = vadd.f32 %v507_v2, %v118_v54  ;;  %v375_v63 = vsel %vm247_vm1, %v183_v50, %v311_v59  ;;  %v187_v0 = vadd.f32 %v507_v2, %v119_v55 }
  0x31   :  { %v188_v3 = vadd.f32 %v507_v2, %v120_v56  ;;  %v121_v4 = vmul.f32 %v502_v1, %v53_v57  ;;  %439 = vst [vmem:[%s1023_s3 + $0x108] sm:$0xff] %v375_v63  ;;  %v376_v7 = vsel %vm248_vm2, %v184_v51, %v312_v60  ;;  %v122_v16 = vmul.f32 %v502_v1, %v54_v5  ;;  %v66_v51 = vld [vmem:[%s1020_s0 + $0x1a0] sm:$0xff]  ;;  %v67_v5 = vld [vmem:[%s1020_s0 + $0x1a8] sm:$0xff] }
  0x32   :  { %v377_v8 = vsel %vm249_vm3, %v185_v52, %v313_v61  ;;  %vm250_vm4 = vcmp.ge.f32.partialorder %v186_v62, 0.0  ;;  %v314_v9 = vmul.f32 0.1, %v186_v62  ;;  %440 = vst [vmem:[%s1023_s3 + $0x110] sm:$0xff] %v376_v7  ;;  %vm251_vm5 = vcmp.ge.f32.partialorder %v187_v0, 0.0 }
  0x33   :  { %v315_v11 = vmul.f32 0.1, %v187_v0  ;;  %vm252_vm6 = vcmp.ge.f32.partialorder %v188_v3, 0.0  ;;  %v189_v12 = vadd.f32 %v507_v2, %v121_v4  ;;  %441 = vst [vmem:[%s1023_s3 + $0x118] sm:$0xff] %v377_v8  ;;  %v316_v15 = vmul.f32 0.1, %v188_v3 }
  0x34   :  { %v378_v14 = vsel %vm250_vm4, %v186_v62, %v314_v9  ;;  %v123_v17 = vmul.f32 %v502_v1, %v55_v6  ;;  %v124_v22 = vmul.f32 %v502_v1, %v56_v10  ;;  %v190_v24 = vadd.f32 %v507_v2, %v122_v16  ;;  %v68_v6 = vld [vmem:[%s1020_s0 + $0x1b0] sm:$0xff] }
  0x35   :  { %442 = vst [vmem:[%s1023_s3 + $0x120] sm:$0xff] %v378_v14  ;;  %v379_v20 = vsel %vm251_vm5, %v187_v0, %v315_v11  ;;  %vm253_vm7 = vcmp.ge.f32.partialorder %v189_v12, 0.0  ;;  %v317_v21 = vmul.f32 0.1, %v189_v12  ;;  %v380_v23 = vsel %vm252_vm6, %v188_v3, %v316_v15  ;;  %v69_v11 = vld [vmem:[%s1020_s0 + $0x1b8] sm:$0xff] }
  0x36   :  { %443 = vst [vmem:[%s1023_s3 + $0x128] sm:$0xff] %v379_v20  ;;  %v191_v25 = vadd.f32 %v507_v2, %v123_v17  ;;  %v125_v26 = vmul.f32 %v502_v1, %v57_v13  ;;  %v192_v28 = vadd.f32 %v507_v2, %v124_v22  ;;  %v126_v29 = vmul.f32 %v502_v1, %v58_v18  ;;  %v71_v20 = vld [vmem:[%s1020_s0 + $0x1c8] sm:$0xff] }
  0x37   :  { %444 = vst [vmem:[%s1023_s3 + $0x130] sm:$0xff] %v380_v23  ;;  %v381_v27 = vsel %vm253_vm7, %v189_v12, %v317_v21  ;;  %v127_v30 = vmul.f32 %v502_v1, %v59_v19  ;;  %vm254_vm8 = vcmp.ge.f32.partialorder %v190_v24, 0.0  ;;  %v318_v31 = vmul.f32 0.1, %v190_v24  ;;  %v70_v12 = vld [vmem:[%s1020_s0 + $0x1c0] sm:$0xff] }
  0x38   :  { %445 = vst [vmem:[%s1023_s3 + $0x138] sm:$0xff] %v381_v27  ;;  %vm255_vm9 = vcmp.ge.f32.partialorder %v191_v25, 0.0  ;;  %v193_v32 = vadd.f32 %v507_v2, %v125_v26  ;;  %v319_v33 = vmul.f32 0.1, %v191_v25  ;;  %vm256_vm10 = vcmp.ge.f32.partialorder %v192_v28, 0.0 }
  0x39   :  { %v320_v34 = vmul.f32 0.1, %v192_v28  ;;  %v194_v35 = vadd.f32 %v507_v2, %v126_v29  ;;  %v382_v37 = vsel %vm254_vm8, %v190_v24, %v318_v31  ;;  %v195_v39 = vadd.f32 %v507_v2, %v127_v30 }
  0x3a   :  { %vm257_vm11 = vcmp.ge.f32.partialorder %v193_v32, 0.0  ;;  %v321_v38 = vmul.f32 0.1, %v193_v32  ;;  %446 = vst [vmem:[%s1023_s3 + $0x140] sm:$0xff] %v382_v37  ;;  %v383_v43 = vsel %vm255_vm9, %v191_v25, %v319_v33  ;;  %v128_v50 = vmul.f32 %v502_v1, %v60_v36  ;;  %v72_v25 = vld [vmem:[%s1020_s0 + $0x1d0] sm:$0xff]  ;;  %v73_v36 = vld [vmem:[%s1020_s0 + $0x1d8] sm:$0xff] }
  0x3b   :  { %v384_v44 = vsel %vm256_vm10, %v192_v28, %v320_v34  ;;  %vm258_vm12 = vcmp.ge.f32.partialorder %v194_v35, 0.0  ;;  %v322_v45 = vmul.f32 0.1, %v194_v35  ;;  %447 = vst [vmem:[%s1023_s3 + $0x148] sm:$0xff] %v383_v43  ;;  %vm259_vm13 = vcmp.ge.f32.partialorder %v195_v39, 0.0  ;;  %v74_v37 = vld [vmem:[%s1020_s0 + $0x1e0] sm:$0xff] }
  0x3c   :  { %v385_v48 = vsel %vm257_vm11, %v193_v32, %v321_v38  ;;  %v323_v49 = vmul.f32 0.1, %v195_v39  ;;  %448 = vst [vmem:[%s1023_s3 + $0x150] sm:$0xff] %v384_v44  ;;  %v129_v53 = vmul.f32 %v502_v1, %v61_v40  ;;  %v130_v54 = vmul.f32 %v502_v1, %v62_v41 }
  0x3d   :  { %v386_v52 = vsel %vm258_vm12, %v194_v35, %v322_v45  ;;  %v131_v55 = vmul.f32 %v502_v1, %v63_v42  ;;  %449 = vst [vmem:[%s1023_s3 + $0x158] sm:$0xff] %v385_v48  ;;  %v196_v57 = vadd.f32 %v507_v2, %v128_v50  ;;  %v132_v58 = vmul.f32 %v502_v1, %v64_v46  ;;  %v76_v48 = vld [vmem:[%s1020_s0 + $0x1f0] sm:$0xff] }
  0x3e   :  { %v387_v56 = vsel %vm259_vm13, %v195_v39, %v323_v49  ;;  %v133_v59 = vmul.f32 %v502_v1, %v65_v47  ;;  %450 = vst [vmem:[%s1023_s3 + $0x160] sm:$0xff] %v386_v52  ;;  %v197_v60 = vadd.f32 %v507_v2, %v129_v53  ;;  %v198_v61 = vadd.f32 %v507_v2, %v130_v54  ;;  %v75_v47 = vld [vmem:[%s1020_s0 + $0x1e8] sm:$0xff]  ;;  %v77_v49 = vld [vmem:[%s1020_s0 + $0x1f8] sm:$0xff] }
  0x3f   :  { %v199_v62 = vadd.f32 %v507_v2, %v131_v55  ;;  %v134_v63 = vmul.f32 %v502_v1, %v66_v51  ;;  %451 = vst [vmem:[%s1023_s3 + $0x168] sm:$0xff] %v387_v56  ;;  %vm260_vm14 = vcmp.ge.f32.partialorder %v196_v57, 0.0  ;;  %v324_v0 = vmul.f32 0.1, %v196_v57 }
  0x40   :  { %v200_v3 = vadd.f32 %v507_v2, %v132_v58  ;;  %v201_v4 = vadd.f32 %v507_v2, %v133_v59  ;;  %vm261_vm15 = vcmp.ge.f32.partialorder %v197_v60, 0.0  ;;  %v325_v7 = vmul.f32 0.1, %v197_v60 }
  0x41   :  { %vm262_vm0 = vcmp.ge.f32.partialorder %v198_v61, 0.0  ;;  %v326_v8 = vmul.f32 0.1, %v198_v61  ;;  %v388_v9 = vsel %vm260_vm14, %v196_v57, %v324_v0  ;;  %vm263_vm1 = vcmp.ge.f32.partialorder %v199_v62, 0.0 }
  0x42   :  { %v327_v10 = vmul.f32 0.1, %v199_v62  ;;  %vm264_vm2 = vcmp.ge.f32.partialorder %v200_v3, 0.0  ;;  %452 = vst [vmem:[%s1023_s3 + $0x170] sm:$0xff] %v388_v9  ;;  %v389_v13 = vsel %vm261_vm15, %v197_v60, %v325_v7  ;;  %v328_v15 = vmul.f32 0.1, %v200_v3 }
  0x43   :  { %v390_v14 = vsel %vm262_vm0, %v198_v61, %v326_v8  ;;  %vm265_vm3 = vcmp.ge.f32.partialorder %v201_v4, 0.0  ;;  %453 = vst [vmem:[%s1023_s3 + $0x178] sm:$0xff] %v389_v13  ;;  %v329_v17 = vmul.f32 0.1, %v201_v4  ;;  %v202_v18 = vadd.f32 %v507_v2, %v134_v63 }
  0x44   :  { %v391_v16 = vsel %vm263_vm1, %v199_v62, %v327_v10  ;;  %v135_v19 = vmul.f32 %v502_v1, %v67_v5  ;;  %454 = vst [vmem:[%s1023_s3 + $0x180] sm:$0xff] %v390_v14  ;;  %v392_v21 = vsel %vm264_vm2, %v200_v3, %v328_v15  ;;  %v136_v22 = vmul.f32 %v502_v1, %v68_v6 }
  0x45   :  { %v137_v23 = vmul.f32 %v502_v1, %v69_v11  ;;  %v138_v24 = vmul.f32 %v502_v1, %v70_v12  ;;  %455 = vst [vmem:[%s1023_s3 + $0x188] sm:$0xff] %v391_v16  ;;  %v393_v26 = vsel %vm265_vm3, %v201_v4, %v329_v17  ;;  %vm266_vm4 = vcmp.ge.f32.partialorder %v202_v18, 0.0 }
  0x46   :  { %v330_v27 = vmul.f32 0.1, %v202_v18  ;;  %v203_v28 = vadd.f32 %v507_v2, %v135_v19  ;;  %456 = vst [vmem:[%s1023_s3 + $0x190] sm:$0xff] %v392_v21  ;;  %v204_v29 = vadd.f32 %v507_v2, %v136_v22  ;;  %v139_v32 = vmul.f32 %v502_v1, %v71_v20 }
  0x47   :  { %v205_v30 = vadd.f32 %v507_v2, %v137_v23  ;;  %v206_v31 = vadd.f32 %v507_v2, %v138_v24  ;;  %457 = vst [vmem:[%s1023_s3 + $0x198] sm:$0xff] %v393_v26  ;;  %v140_v35 = vmul.f32 %v502_v1, %v72_v25  ;;  %v141_v45 = vmul.f32 %v502_v1, %v73_v36 }
  0x48   :  { %v394_v33 = vsel %vm266_vm4, %v202_v18, %v330_v27  ;;  %vm267_vm5 = vcmp.ge.f32.partialorder %v203_v28, 0.0  ;;  %v331_v34 = vmul.f32 0.1, %v203_v28  ;;  %vm268_vm6 = vcmp.ge.f32.partialorder %v204_v29, 0.0 }
  0x49   :  { %458 = vst [vmem:[%s1023_s3 + $0x1a0] sm:$0xff] %v394_v33  ;;  %v332_v38 = vmul.f32 0.1, %v204_v29  ;;  %vm269_vm7 = vcmp.ge.f32.partialorder %v205_v30, 0.0  ;;  %vm270_vm8 = vcmp.ge.f32.partialorder %v206_v31, 0.0  ;;  %v207_v42 = vadd.f32 %v507_v2, %v139_v32 }
  0x4a   :  { %v395_v39 = vsel %vm267_vm5, %v203_v28, %v331_v34  ;;  %v333_v40 = vmul.f32 0.1, %v205_v30  ;;  %v334_v41 = vmul.f32 0.1, %v206_v31  ;;  %v208_v44 = vadd.f32 %v507_v2, %v140_v35 }
  0x4b   :  { %459 = vst [vmem:[%s1023_s3 + $0x1a8] sm:$0xff] %v395_v39  ;;  %v396_v43 = vsel %vm268_vm6, %v204_v29, %v332_v38  ;;  %v142_v46 = vmul.f32 %v502_v1, %v74_v37  ;;  %vm271_vm9 = vcmp.ge.f32.partialorder %v207_v42, 0.0  ;;  %v335_v52 = vmul.f32 0.1, %v207_v42 }
  0x4c   :  { %460 = vst [vmem:[%s1023_s3 + $0x1b0] sm:$0xff] %v396_v43  ;;  %v397_v50 = vsel %vm269_vm7, %v205_v30, %v333_v40  ;;  %v398_v51 = vsel %vm270_vm8, %v206_v31, %v334_v41  ;;  %vm272_vm10 = vcmp.ge.f32.partialorder %v208_v44, 0.0  ;;  %v336_v53 = vmul.f32 0.1, %v208_v44 }
  0x4d   :  { %461 = vst [vmem:[%s1023_s3 + $0x1b8] sm:$0xff] %v397_v50  ;;  %v209_v54 = vadd.f32 %v507_v2, %v141_v45  ;;  %v210_v55 = vadd.f32 %v507_v2, %v142_v46  ;;  %v399_v56 = vsel %vm271_vm9, %v207_v42, %v335_v52  ;;  %v143_v57 = vmul.f32 %v502_v1, %v75_v47 }
  0x4e   :  { %462 = vst [vmem:[%s1023_s3 + $0x1c0] sm:$0xff] %v398_v51  ;;  %v144_v58 = vmul.f32 %v502_v1, %v76_v48  ;;  %v145_v59 = vmul.f32 %v502_v1, %v77_v49  ;;  %v400_v60 = vsel %vm272_vm10, %v208_v44, %v336_v53 }
  0x4f   :  { %463 = vst [vmem:[%s1023_s3 + $0x1c8] sm:$0xff] %v399_v56  ;;  %vm273_vm11 = vcmp.ge.f32.partialorder %v209_v54, 0.0  ;;  %v337_v61 = vmul.f32 0.1, %v209_v54  ;;  %vm274_vm12 = vcmp.ge.f32.partialorder %v210_v55, 0.0  ;;  %v211_v63 = vadd.f32 %v507_v2, %v143_v57 }
  0x50   :  { %464 = vst [vmem:[%s1023_s3 + $0x1d0] sm:$0xff] %v400_v60  ;;  %v338_v62 = vmul.f32 0.1, %v210_v55  ;;  %v212_v0 = vadd.f32 %v507_v2, %v144_v58  ;;  %v213_v3 = vadd.f32 %v507_v2, %v145_v59 }
  0x51   :  { %v401_v1 = vsel %vm273_vm11, %v209_v54, %v337_v61  ;;  %vm275_vm13 = vcmp.ge.f32.partialorder %v211_v63, 0.0  ;;  %v339_v5 = vmul.f32 0.1, %v211_v63 }
  0x52   :  { %465 = vst [vmem:[%s1023_s3 + $0x1d8] sm:$0xff] %v401_v1  ;;  %v402_v4 = vsel %vm274_vm12, %v210_v55, %v338_v62  ;;  %vm276_vm14 = vcmp.ge.f32.partialorder %v212_v0, 0.0  ;;  %v340_v6 = vmul.f32 0.1, %v212_v0  ;;  %vm277_vm15 = vcmp.ge.f32.partialorder %v213_v3, 0.0 }
  0x53   :  { %466 = vst [vmem:[%s1023_s3 + $0x1e0] sm:$0xff] %v402_v4  ;;  %v341_v7 = vmul.f32 0.1, %v213_v3  ;;  %v403_v8 = vsel %vm275_vm13, %v211_v63, %v339_v5 }
  0x54   :  { %467 = vst [vmem:[%s1023_s3 + $0x1e8] sm:$0xff] %v403_v8  ;;  %v404_v2 = vsel %vm276_vm14, %v212_v0, %v340_v6 }
  0x55   :  { %v405_v9 = vsel %vm277_vm15, %v213_v3, %v341_v7  ;;  %468 = vst [vmem:[%s1023_s3 + $0x1f0] sm:$0xff] %v404_v2 }
  0x56   :  { %469 = vst [vmem:[%s1023_s3 + $0x1f8] sm:$0xff] %v405_v9 }

// kernel: upconv_forward.6
= control target key start
LH: loop header
LB: loop body
LE: loop exit
PB: predicated region body
PF: predicated region fallthrough
CT: control target
= control target key end

     0   :  { %vm94_vm0 = vcmask 588800   ;;  %s2223_s1 = inlined_call_operand.vmem [shape: f32[72,128], index: 1, kind: input, shape index: {}]   ;;  %s2224_s2 = inlined_call_operand.vmem [shape: f32[1,128], index: 2, kind: input, shape index: {}]   ;;  %s2225_s0 = inlined_call_operand.vmem [shape: f32[512,72], index: 0, kind: input, shape index: {}]   ;;  %s2226_s3 = inlined_call_operand.vmem [shape: f32[512,128], index: 3, kind: output, shape index: {0}]   ;;  %s2227_s4 = inlined_call_operand.vmem [shape: f32[1,1,128], index: 4, kind: output, shape index: {1}]   ;;  %s2228_s5 = inlined_call_operand.vmem [shape: f32[1,1,128], index: 5, kind: output, shape index: {2}]  }
   0x1   :  { %v93_v0 = vld [vmem:[%s2223_s1 + $0x40] sm:$0xff]  ;;  %v92_v1 = vld [vmem:[%s2223_s1 + $0x38] sm:$0xff]  ;;  %v91_v2 = vld [vmem:[%s2223_s1 + $0x30] sm:$0xff] }
   0x2   :  { %294 = vmatpush.msra.mxu0 %v93_v0  ;;  %1291 = vmatpush.msra.mxu1 %v93_v0  ;;  %v90_v3 = vld [vmem:[%s2223_s1 + $0x28] sm:$0xff]  ;;  %v89_v4 = vld [vmem:[%s2223_s1 + $0x20] sm:$0xff]  ;;  %v88_v5 = vld [vmem:[%s2223_s1 + $0x18] sm:$0xff] }
   0x3   :  { %1292 = vmatpush.msra.mxu2 %v93_v0  ;;  %1293 = vmatpush.msra.mxu3 %v93_v0  ;;  %v87_v6 = vld [vmem:[%s2223_s1 + $0x10] sm:$0xff]  ;;  %v86_v7 = vld [vmem:[%s2223_s1 + $0x8] sm:$0xff]  ;;  %v85_v8 = vld [vmem:[%s2223_s1] sm:$0xff] }
   0x4   :  { %295 = vmatpush.msra.mxu0 %v92_v1  ;;  %1294 = vmatpush.msra.mxu1 %v92_v1  ;;  %v21_v9 = vld [vmem:[%s2225_s0] sm:$0xff]  ;;  %v22_v11 = vld [vmem:[%s2225_s0 + $0x8] sm:$0xff]  ;;  %v23_v13 = vld [vmem:[%s2225_s0 + $0x10] sm:$0xff] }
   0x5   :  { %1295 = vmatpush.msra.mxu2 %v92_v1  ;;  %1296 = vmatpush.msra.mxu3 %v92_v1  ;;  %v37_v10 = vld [vmem:[%s2225_s0 + $0x80] sm:$0xff]  ;;  %v38_v12 = vld [vmem:[%s2225_s0 + $0x88] sm:$0xff]  ;;  %v39_v14 = vld [vmem:[%s2225_s0 + $0x90] sm:$0xff] }
   0x6   :  { %296 = vmatpush.msra.mxu0 %v91_v2  ;;  %1297 = vmatpush.msra.mxu1 %v91_v2  ;;  %v24_v15 = vld [vmem:[%s2225_s0 + $0x18] sm:$0xff]  ;;  %v53_v17 = vld [vmem:[%s2225_s0 + $0x100] sm:$0xff]  ;;  %v54_v20 = vld [vmem:[%s2225_s0 + $0x108] sm:$0xff] }
   0x7   :  { %1298 = vmatpush.msra.mxu2 %v91_v2  ;;  %1299 = vmatpush.msra.mxu3 %v91_v2  ;;  %v40_v16 = vld [vmem:[%s2225_s0 + $0x98] sm:$0xff]  ;;  %v25_v18 = vld [vmem:[%s2225_s0 + $0x20] sm:$0xff]  ;;  %v26_v21 = vld [vmem:[%s2225_s0 + $0x28] sm:$0xff] }
   0x8   :  { %297 = vmatpush.msra.mxu0 %v90_v3  ;;  %1300 = vmatpush.msra.mxu1 %v90_v3  ;;  %v41_v19 = vld [vmem:[%s2225_s0 + $0xa0] sm:$0xff]  ;;  %v42_v22 = vld [vmem:[%s2225_s0 + $0xa8] sm:$0xff]  ;;  %v55_v23 = vld [vmem:[%s2225_s0 + $0x110] sm:$0xff] }
   0x9   :  { %1301 = vmatpush.msra.mxu2 %v90_v3  ;;  %1302 = vmatpush.msra.mxu3 %v90_v3  ;;  %v27_v24 = vld [vmem:[%s2225_s0 + $0x30] sm:$0xff]  ;;  %v56_v26 = vld [vmem:[%s2225_s0 + $0x118] sm:$0xff]  ;;  %v57_v29 = vld [vmem:[%s2225_s0 + $0x120] sm:$0xff] }
   0xa   :  { %298 = vmatpush.msra.mxu0 %v89_v4  ;;  %1303 = vmatpush.msra.mxu1 %v89_v4  ;;  %v43_v25 = vld [vmem:[%s2225_s0 + $0xb0] sm:$0xff]  ;;  %v28_v27 = vld [vmem:[%s2225_s0 + $0x38] sm:$0xff]  ;;  %v69_v30 = vld [vmem:[%s2225_s0 + $0x180] sm:$0xff] }
   0xb   :  { %1304 = vmatpush.msra.mxu2 %v89_v4  ;;  %1305 = vmatpush.msra.mxu3 %v89_v4  ;;  %v44_v28 = vld [vmem:[%s2225_s0 + $0xb8] sm:$0xff]  ;;  %v29_v31 = vld [vmem:[%s2225_s0 + $0x40] sm:$0xff]  ;;  %v58_v33 = vld [vmem:[%s2225_s0 + $0x128] sm:$0xff] }
   0xc   :  { %299 = vmatpush.msra.mxu0 %v88_v5  ;;  %1306 = vmatpush.msra.mxu1 %v88_v5  ;;  %v45_v32 = vld [vmem:[%s2225_s0 + $0xc0] sm:$0xff]  ;;  %v70_v34 = vld [vmem:[%s2225_s0 + $0x188] sm:$0xff]  ;;  %v59_v37 = vld [vmem:[%s2225_s0 + $0x130] sm:$0xff] }
   0xd   :  { %1307 = vmatpush.msra.mxu2 %v88_v5  ;;  %1308 = vmatpush.msra.mxu3 %v88_v5  ;;  %v30_v35 = vld [vmem:[%s2225_s0 + $0x48] sm:$0xff]  ;;  %v71_v38 = vld [vmem:[%s2225_s0 + $0x190] sm:$0xff]  ;;  %v60_v41 = vld [vmem:[%s2225_s0 + $0x138] sm:$0xff] }
   0xe   :  { %300 = vmatpush.msra.mxu0 %v87_v6  ;;  %1309 = vmatpush.msra.mxu1 %v87_v6  ;;  %v46_v36 = vld [vmem:[%s2225_s0 + $0xc8] sm:$0xff]  ;;  %v31_v39 = vld [vmem:[%s2225_s0 + $0x50] sm:$0xff]  ;;  %v72_v42 = vld [vmem:[%s2225_s0 + $0x198] sm:$0xff] }
   0xf   :  { %1310 = vmatpush.msra.mxu2 %v87_v6  ;;  %1311 = vmatpush.msra.mxu3 %v87_v6  ;;  %v47_v40 = vld [vmem:[%s2225_s0 + $0xd0] sm:$0xff]  ;;  %v32_v43 = vld [vmem:[%s2225_s0 + $0x58] sm:$0xff]  ;;  %v61_v45 = vld [vmem:[%s2225_s0 + $0x140] sm:$0xff] }
  0x10   :  { %301 = vmatpush.msra.mxu0 %v86_v7  ;;  %1312 = vmatpush.msra.mxu1 %v86_v7  ;;  %v48_v44 = vld [vmem:[%s2225_s0 + $0xd8] sm:$0xff]  ;;  %v73_v46 = vld [vmem:[%s2225_s0 + $0x1a0] sm:$0xff]  ;;  %v62_v49 = vld [vmem:[%s2225_s0 + $0x148] sm:$0xff] }
  0x11   :  { %1313 = vmatpush.msra.mxu2 %v86_v7  ;;  %1314 = vmatpush.msra.mxu3 %v86_v7  ;;  %v33_v47 = vld [vmem:[%s2225_s0 + $0x60] sm:$0xff]  ;;  %v74_v50 = vld [vmem:[%s2225_s0 + $0x1a8] sm:$0xff]  ;;  %v63_v53 = vld [vmem:[%s2225_s0 + $0x150] sm:$0xff] }
  0x12   :  { %302 = vmatpush.msra.mxu0 %v85_v8  ;;  %1315 = vmatpush.msra.mxu1 %v85_v8  ;;  %v49_v48 = vld [vmem:[%s2225_s0 + $0xe0] sm:$0xff]  ;;  %v34_v51 = vld [vmem:[%s2225_s0 + $0x68] sm:$0xff]  ;;  %v75_v54 = vld [vmem:[%s2225_s0 + $0x1b0] sm:$0xff] }
  0x13   :  { %1227 = vmatmul.msk.f32.vlgmr.msra.gmra.mxu0 %vm94_vm0, %v21_v9  ;;  %1243 = vmatmul.msk.f32.vlgmr.msra.gmra.mxu1 %vm94_vm0, %v37_v10  ;;  %v50_v52 = vld [vmem:[%s2225_s0 + $0xe8] sm:$0xff]  ;;  %v35_v55 = vld [vmem:[%s2225_s0 + $0x70] sm:$0xff]  ;;  %v64_v57 = vld [vmem:[%s2225_s0 + $0x158] sm:$0xff] }
  0x14   :  { %1316 = vmatpush.msra.mxu2 %v85_v8  ;;  %1317 = vmatpush.msra.mxu3 %v85_v8  ;;  %v51_v56 = vld [vmem:[%s2225_s0 + $0xf0] sm:$0xff]  ;;  %v76_v58 = vld [vmem:[%s2225_s0 + $0x1b8] sm:$0xff]  ;;  %v65_v61 = vld [vmem:[%s2225_s0 + $0x160] sm:$0xff] }
  0x15   :  { %1259 = vmatmul.msk.f32.vlgmr.msra.gmra.mxu2 %vm94_vm0, %v53_v17  ;;  %1275 = vmatmul.msk.f32.vlgmr.msra.gmra.mxu3 %vm94_vm0, %v69_v30  ;;  %v36_v59 = vld [vmem:[%s2225_s0 + $0x78] sm:$0xff]  ;;  %v77_v62 = vld [vmem:[%s2225_s0 + $0x1c0] sm:$0xff]  ;;  %v66_v4 = vld [vmem:[%s2225_s0 + $0x168] sm:$0xff] }
  0x16   :  { %v52_v60 = vld [vmem:[%s2225_s0 + $0xf8] sm:$0xff]  ;;  %v1593_v63 = vld [vmem:[%s2224_s2] ss:$0 sm:$0xff]  ;;  %v78_v5 = vld [vmem:[%s2225_s0 + $0x1c8] sm:$0xff] }
  0x1b   :  { %1228 = vmatmul.msk.f32.gmra.mxu0 %vm94_vm0, %v22_v11  ;;  %1244 = vmatmul.msk.f32.gmra.mxu1 %vm94_vm0, %v38_v12 }
  0x1d   :  { %1260 = vmatmul.msk.f32.gmra.mxu2 %vm94_vm0, %v54_v20  ;;  %1276 = vmatmul.msk.f32.gmra.mxu3 %vm94_vm0, %v70_v34 }
  0x23   :  { %1229 = vmatmul.msk.f32.gmra.mxu0 %vm94_vm0, %v23_v13  ;;  %1245 = vmatmul.msk.f32.gmra.mxu1 %vm94_vm0, %v39_v14  ;;  %v67_v13 = vld [vmem:[%s2225_s0 + $0x170] sm:$0xff] }
  0x24   :  { %v79_v14 = vld [vmem:[%s2225_s0 + $0x1d0] sm:$0xff] }
  0x25   :  { %1261 = vmatmul.msk.f32.gmra.mxu2 %vm94_vm0, %v55_v23  ;;  %1277 = vmatmul.msk.f32.gmra.mxu3 %vm94_vm0, %v71_v38  ;;  %v80_v23 = vld [vmem:[%s2225_s0 + $0x1d8] sm:$0xff] }
  0x2b   :  { %1230 = vmatmul.msk.f32.gmra.mxu0 %vm94_vm0, %v24_v15  ;;  %1246 = vmatmul.msk.f32.gmra.mxu1 %vm94_vm0, %v40_v16 }
  0x2d   :  { %1262 = vmatmul.msk.f32.gmra.mxu2 %vm94_vm0, %v56_v26  ;;  %1278 = vmatmul.msk.f32.gmra.mxu3 %vm94_vm0, %v72_v42 }
  0x33   :  { %1231 = vmatmul.msk.f32.gmra.mxu0 %vm94_vm0, %v25_v18  ;;  %1247 = vmatmul.msk.f32.gmra.mxu1 %vm94_vm0, %v41_v19 }
  0x35   :  { %1263 = vmatmul.msk.f32.gmra.mxu2 %vm94_vm0, %v57_v29  ;;  %1279 = vmatmul.msk.f32.gmra.mxu3 %vm94_vm0, %v73_v46 }
  0x3b   :  { %1232 = vmatmul.msk.f32.gmra.mxu0 %vm94_vm0, %v26_v21  ;;  %1248 = vmatmul.msk.f32.gmra.mxu1 %vm94_vm0, %v42_v22  ;;  %v68_v22 = vld [vmem:[%s2225_s0 + $0x178] sm:$0xff] }
  0x3d   :  { %1264 = vmatmul.msk.f32.gmra.mxu2 %vm94_vm0, %v58_v33  ;;  %1280 = vmatmul.msk.f32.gmra.mxu3 %vm94_vm0, %v74_v50 }
  0x43   :  { %1233 = vmatmul.msk.f32.gmra.mxu0 %vm94_vm0, %v27_v24  ;;  %1249 = vmatmul.msk.f32.gmra.mxu1 %vm94_vm0, %v43_v25 }
  0x45   :  { %1265 = vmatmul.msk.f32.gmra.mxu2 %vm94_vm0, %v59_v37  ;;  %1281 = vmatmul.msk.f32.gmra.mxu3 %vm94_vm0, %v75_v54 }
  0x4b   :  { %1234 = vmatmul.msk.f32.gmra.mxu0 %vm94_vm0, %v28_v27  ;;  %1250 = vmatmul.msk.f32.gmra.mxu1 %vm94_vm0, %v44_v28 }
  0x4d   :  { %1266 = vmatmul.msk.f32.gmra.mxu2 %vm94_vm0, %v60_v41  ;;  %1282 = vmatmul.msk.f32.gmra.mxu3 %vm94_vm0, %v76_v58  ;;  %v82_v41 = vld [vmem:[%s2225_s0 + $0x1e8] sm:$0xff] }
  0x53   :  { %1235 = vmatmul.msk.f32.gmra.mxu0 %vm94_vm0, %v29_v31  ;;  %1251 = vmatmul.msk.f32.gmra.mxu1 %vm94_vm0, %v45_v32  ;;  %v81_v31 = vld [vmem:[%s2225_s0 + $0x1e0] sm:$0xff] }
  0x55   :  { %1267 = vmatmul.msk.f32.gmra.mxu2 %vm94_vm0, %v61_v45  ;;  %1283 = vmatmul.msk.f32.gmra.mxu3 %vm94_vm0, %v77_v62 }
  0x5b   :  { %1236 = vmatmul.msk.f32.gmra.mxu0 %vm94_vm0, %v30_v35  ;;  %1252 = vmatmul.msk.f32.gmra.mxu1 %vm94_vm0, %v46_v36 }
  0x5d   :  { %1268 = vmatmul.msk.f32.gmra.mxu2 %vm94_vm0, %v62_v49  ;;  %1284 = vmatmul.msk.f32.gmra.mxu3 %vm94_vm0, %v78_v5  ;;  %v83_v49 = vld [vmem:[%s2225_s0 + $0x1f0] sm:$0xff] }
  0x63   :  { %1237 = vmatmul.msk.f32.gmra.mxu0 %vm94_vm0, %v31_v39  ;;  %1253 = vmatmul.msk.f32.gmra.mxu1 %vm94_vm0, %v47_v40 }
  0x65   :  { %1269 = vmatmul.msk.f32.gmra.mxu2 %vm94_vm0, %v63_v53  ;;  %1285 = vmatmul.msk.f32.gmra.mxu3 %vm94_vm0, %v79_v14 }
  0x6b   :  { %1238 = vmatmul.msk.f32.gmra.mxu0 %vm94_vm0, %v32_v43  ;;  %1254 = vmatmul.msk.f32.gmra.mxu1 %vm94_vm0, %v48_v44 }
  0x6d   :  { %1270 = vmatmul.msk.f32.gmra.mxu2 %vm94_vm0, %v64_v57  ;;  %1286 = vmatmul.msk.f32.gmra.mxu3 %vm94_vm0, %v80_v23 }
  0x73   :  { %1239 = vmatmul.msk.f32.gmra.mxu0 %vm94_vm0, %v33_v47  ;;  %1255 = vmatmul.msk.f32.gmra.mxu1 %vm94_vm0, %v49_v48 }
  0x75   :  { %1271 = vmatmul.msk.f32.gmra.mxu2 %vm94_vm0, %v65_v61  ;;  %1287 = vmatmul.msk.f32.gmra.mxu3 %vm94_vm0, %v81_v31 }
  0x7b   :  { %1240 = vmatmul.msk.f32.gmra.mxu0 %vm94_vm0, %v34_v51  ;;  %1256 = vmatmul.msk.f32.gmra.mxu1 %vm94_vm0, %v50_v52 }
  0x7d   :  { %1272 = vmatmul.msk.f32.gmra.mxu2 %vm94_vm0, %v66_v4  ;;  %1288 = vmatmul.msk.f32.gmra.mxu3 %vm94_vm0, %v82_v41 }
  0x83   :  { %1241 = vmatmul.msk.f32.gmra.mxu0 %vm94_vm0, %v35_v55  ;;  %1257 = vmatmul.msk.f32.gmra.mxu1 %vm94_vm0, %v51_v56  ;;  %v84_v56 = vld [vmem:[%s2225_s0 + $0x1f8] sm:$0xff] }
  0x85   :  { %1273 = vmatmul.msk.f32.gmra.mxu2 %vm94_vm0, %v67_v13  ;;  %1289 = vmatmul.msk.f32.gmra.mxu3 %vm94_vm0, %v83_v49 }
  0x8b   :  { %1242 = vmatmul.msk.f32.gmra.mxu0 %vm94_vm0, %v36_v59  ;;  %1258 = vmatmul.msk.f32.gmra.mxu1 %vm94_vm0, %v52_v60 }
  0x8d   :  { %1274 = vmatmul.msk.f32.gmra.mxu2 %vm94_vm0, %v68_v22  ;;  %1290 = vmatmul.msk.f32.gmra.mxu3 %vm94_vm0, %v84_v56 }
  0x90   :  { %v304_v0 = vpop.f32.mrf.mxu0  ;;  %v352_v1 = vpop.f32.mrf.mxu1 }
  0x91   :  { %v496_v2 = vadd.f32 %v1593_v63, %v304_v0  ;;  %v1599_v3 = vadd.f32 %v1593_v63, %v352_v1 }
  0x93   :  { %560 = vst [vmem:[%s2226_s3] sm:$0xff] %v496_v2  ;;  %v1081_v10 = vmul.f32 %v496_v2, %v496_v2 }
  0x94   :  { %576 = vst [vmem:[%s2226_s3 + $0x80] sm:$0xff] %v1599_v3 }
  0x98   :  { %v307_v6 = vpop.f32.mrf.mxu0  ;;  %v355_v7 = vpop.f32.mrf.mxu1 }
  0x99   :  { %v497_v8 = vadd.f32 %v1593_v63, %v307_v6  ;;  %v1618_v9 = vadd.f32 %v1593_v63, %v355_v7  ;;  %v400_v37 = vpop.f32.mrf.mxu2  ;;  %v448_v6 = vpop.f32.mrf.mxu3 }
  0x9a   :  { %v1674_v38 = vadd.f32 %v1593_v63, %v400_v37 }
  0x9b   :  { %561 = vst [vmem:[%s2226_s3 + $0x8] sm:$0xff] %v497_v8  ;;  %v1011_v11 = vadd.f32 %v497_v8, %v496_v2  ;;  %v1082_v12 = vmul.f32 %v497_v8, %v497_v8  ;;  %v1776_v8 = vadd.f32 %v1593_v63, %v448_v6 }
  0x9c   :  { %577 = vst [vmem:[%s2226_s3 + $0x88] sm:$0xff] %v1618_v9 }
  0x9d   :  { %v1145_v15 = vadd.f32 %v1082_v12, %v1081_v10  ;;  %592 = vst [vmem:[%s2226_s3 + $0x100] sm:$0xff] %v1674_v38 }
  0x9e   :  { %608 = vst [vmem:[%s2226_s3 + $0x180] sm:$0xff] %v1776_v8 }
  0xa0   :  { %v310_v16 = vpop.f32.mrf.mxu0  ;;  %v358_v17 = vpop.f32.mrf.mxu1 }
  0xa1   :  { %v498_v18 = vadd.f32 %v1593_v63, %v310_v16  ;;  %v1637_v19 = vadd.f32 %v1593_v63, %v358_v17  ;;  %v403_v47 = vpop.f32.mrf.mxu2 }
  0xa2   :  { %v1702_v48 = vadd.f32 %v1593_v63, %v403_v47 }
  0xa3   :  { %562 = vst [vmem:[%s2226_s3 + $0x10] sm:$0xff] %v498_v18  ;;  %v1012_v20 = vadd.f32 %v1011_v11, %v498_v18  ;;  %v1083_v21 = vmul.f32 %v498_v18, %v498_v18 }
  0xa4   :  { %578 = vst [vmem:[%s2226_s3 + $0x90] sm:$0xff] %v1637_v19 }
  0xa5   :  { %v1146_v24 = vadd.f32 %v1145_v15, %v1083_v21  ;;  %593 = vst [vmem:[%s2226_s3 + $0x108] sm:$0xff] %v1702_v48  ;;  %v451_v15 = vpop.f32.mrf.mxu3 }
  0xa6   :  { %v1804_v17 = vadd.f32 %v1593_v63, %v451_v15 }
  0xa8   :  { %v313_v25 = vpop.f32.mrf.mxu0  ;;  %v361_v26 = vpop.f32.mrf.mxu1  ;;  %609 = vst [vmem:[%s2226_s3 + $0x188] sm:$0xff] %v1804_v17 }
  0xa9   :  { %v499_v27 = vadd.f32 %v1593_v63, %v313_v25  ;;  %v1656_v28 = vadd.f32 %v1593_v63, %v361_v26  ;;  %v406_v54 = vpop.f32.mrf.mxu2 }
  0xaa   :  { %v1727_v55 = vadd.f32 %v1593_v63, %v406_v54 }
  0xab   :  { %563 = vst [vmem:[%s2226_s3 + $0x18] sm:$0xff] %v499_v27  ;;  %v1013_v29 = vadd.f32 %v1012_v20, %v499_v27  ;;  %v1084_v30 = vmul.f32 %v499_v27, %v499_v27 }
  0xac   :  { %579 = vst [vmem:[%s2226_s3 + $0x98] sm:$0xff] %v1656_v28 }
  0xad   :  { %v1147_v32 = vadd.f32 %v1146_v24, %v1084_v30  ;;  %594 = vst [vmem:[%s2226_s3 + $0x110] sm:$0xff] %v1727_v55  ;;  %v454_v24 = vpop.f32.mrf.mxu3 }
  0xae   :  { %v1832_v26 = vadd.f32 %v1593_v63, %v454_v24 }
  0xb0   :  { %v316_v33 = vpop.f32.mrf.mxu0  ;;  %v364_v34 = vpop.f32.mrf.mxu1  ;;  %610 = vst [vmem:[%s2226_s3 + $0x190] sm:$0xff] %v1832_v26 }
  0xb1   :  { %v500_v35 = vadd.f32 %v1593_v63, %v316_v33  ;;  %v1671_v36 = vadd.f32 %v1593_v63, %v364_v34  ;;  %v409_v61 = vpop.f32.mrf.mxu2 }
  0xb2   :  { %v1752_v62 = vadd.f32 %v1593_v63, %v409_v61 }
  0xb3   :  { %564 = vst [vmem:[%s2226_s3 + $0x20] sm:$0xff] %v500_v35  ;;  %v1679_v39 = vadd.f32 %v1013_v29, %v500_v35  ;;  %v1085_v40 = vmul.f32 %v500_v35, %v500_v35 }
  0xb4   :  { %580 = vst [vmem:[%s2226_s3 + $0xa0] sm:$0xff] %v1671_v36 }
  0xb5   :  { %v1688_v42 = vadd.f32 %v1147_v32, %v1085_v40  ;;  %595 = vst [vmem:[%s2226_s3 + $0x118] sm:$0xff] %v1752_v62  ;;  %v457_v33 = vpop.f32.mrf.mxu3 }
  0xb6   :  { %v1858_v35 = vadd.f32 %v1593_v63, %v457_v33 }
  0xb8   :  { %v319_v43 = vpop.f32.mrf.mxu0  ;;  %v367_v44 = vpop.f32.mrf.mxu1  ;;  %611 = vst [vmem:[%s2226_s3 + $0x198] sm:$0xff] %v1858_v35 }
  0xb9   :  { %v1696_v45 = vadd.f32 %v1593_v63, %v319_v43  ;;  %v1699_v46 = vadd.f32 %v1593_v63, %v367_v44  ;;  %v412_v5 = vpop.f32.mrf.mxu2 }
  0xba   :  { %v1773_v7 = vadd.f32 %v1593_v63, %v412_v5 }
  0xbb   :  { %565 = vst [vmem:[%s2226_s3 + $0x28] sm:$0xff] %v1696_v45  ;;  %v1015_v56 = vadd.f32 %v1679_v39, %v1696_v45 }
  0xbc   :  { %581 = vst [vmem:[%s2226_s3 + $0xa8] sm:$0xff] %v1699_v46 }
  0xbd   :  { %596 = vst [vmem:[%s2226_s3 + $0x120] sm:$0xff] %v1773_v7  ;;  %v460_v47 = vpop.f32.mrf.mxu3 }
  0xc0   :  { %v322_v50 = vpop.f32.mrf.mxu0  ;;  %v370_v51 = vpop.f32.mrf.mxu1 }
  0xc1   :  { %v1721_v52 = vadd.f32 %v1593_v63, %v322_v50  ;;  %v1724_v53 = vadd.f32 %v1593_v63, %v370_v51  ;;  %v415_v14 = vpop.f32.mrf.mxu2  ;;  %v1883_v50 = vadd.f32 %v1593_v63, %v460_v47  ;;  %v1086_v51 = vmul.f32 %v1696_v45, %v1696_v45 }
  0xc2   :  { %v1801_v16 = vadd.f32 %v1593_v63, %v415_v14 }
  0xc3   :  { %566 = vst [vmem:[%s2226_s3 + $0x30] sm:$0xff] %v1721_v52  ;;  %v1087_v54 = vmul.f32 %v1721_v52, %v1721_v52 }
  0xc4   :  { %582 = vst [vmem:[%s2226_s3 + $0xb0] sm:$0xff] %v1724_v53 }
  0xc5   :  { %597 = vst [vmem:[%s2226_s3 + $0x128] sm:$0xff] %v1801_v16 }
  0xc6   :  { %612 = vst [vmem:[%s2226_s3 + $0x1a0] sm:$0xff] %v1883_v50 }
  0xc8   :  { %v325_v57 = vpop.f32.mrf.mxu0  ;;  %v373_v58 = vpop.f32.mrf.mxu1 }
  0xc9   :  { %v1746_v59 = vadd.f32 %v1593_v63, %v325_v57  ;;  %v1749_v60 = vadd.f32 %v1593_v63, %v373_v58  ;;  %v418_v23 = vpop.f32.mrf.mxu2  ;;  %v1149_v57 = vadd.f32 %v1688_v42, %v1086_v51 }
  0xca   :  { %v1829_v25 = vadd.f32 %v1593_v63, %v418_v23 }
  0xcb   :  { %567 = vst [vmem:[%s2226_s3 + $0x38] sm:$0xff] %v1746_v59  ;;  %v1088_v58 = vmul.f32 %v1746_v59, %v1746_v59  ;;  %v1150_v14 = vadd.f32 %v1149_v57, %v1087_v54 }
  0xcc   :  { %583 = vst [vmem:[%s2226_s3 + $0xb8] sm:$0xff] %v1749_v60 }
  0xcd   :  { %598 = vst [vmem:[%s2226_s3 + $0x130] sm:$0xff] %v1829_v25 }
  0xd0   :  { %v328_v0 = vpop.f32.mrf.mxu0  ;;  %v376_v1 = vpop.f32.mrf.mxu1 }
  0xd1   :  { %v1767_v2 = vadd.f32 %v1593_v63, %v328_v0  ;;  %v1770_v4 = vadd.f32 %v1593_v63, %v376_v1  ;;  %v421_v32 = vpop.f32.mrf.mxu2  ;;  %v1016_v1 = vadd.f32 %v1015_v56, %v1721_v52  ;;  %v1151_v52 = vadd.f32 %v1150_v14, %v1088_v58 }
  0xd2   :  { %v1855_v34 = vadd.f32 %v1593_v63, %v421_v32 }
  0xd3   :  { %568 = vst [vmem:[%s2226_s3 + $0x40] sm:$0xff] %v1767_v2  ;;  %v1089_v39 = vmul.f32 %v1767_v2, %v1767_v2  ;;  %v1017_v15 = vadd.f32 %v1016_v1, %v1746_v59 }
  0xd4   :  { %584 = vst [vmem:[%s2226_s3 + $0xc0] sm:$0xff] %v1770_v4 }
  0xd5   :  { %599 = vst [vmem:[%s2226_s3 + $0x138] sm:$0xff] %v1855_v34  ;;  %v1152_v59 = vadd.f32 %v1151_v52, %v1089_v39 }
  0xd8   :  { %v331_v10 = vpop.f32.mrf.mxu0  ;;  %v379_v11 = vpop.f32.mrf.mxu1 }
  0xd9   :  { %v1795_v12 = vadd.f32 %v1593_v63, %v331_v10  ;;  %v1798_v13 = vadd.f32 %v1593_v63, %v379_v11  ;;  %v424_v44 = vpop.f32.mrf.mxu2  ;;  %v463_v11 = vpop.f32.mrf.mxu3 }
  0xda   :  { %v1880_v49 = vadd.f32 %v1593_v63, %v424_v44  ;;  %v1920_v45 = vadd.f32 %v1593_v63, %v463_v11 }
  0xdb   :  { %569 = vst [vmem:[%s2226_s3 + $0x48] sm:$0xff] %v1795_v12 }
  0xdc   :  { %585 = vst [vmem:[%s2226_s3 + $0xc8] sm:$0xff] %v1798_v13 }
  0xdd   :  { %600 = vst [vmem:[%s2226_s3 + $0x140] sm:$0xff] %v1880_v49 }
  0xde   :  { %613 = vst [vmem:[%s2226_s3 + $0x1a8] sm:$0xff] %v1920_v45 }
  0xe0   :  { %v334_v18 = vpop.f32.mrf.mxu0  ;;  %v382_v20 = vpop.f32.mrf.mxu1 }
  0xe1   :  { %v1823_v21 = vadd.f32 %v1593_v63, %v334_v18  ;;  %v1826_v22 = vadd.f32 %v1593_v63, %v382_v20  ;;  %v427_v10 = vpop.f32.mrf.mxu2  ;;  %v1090_v18 = vmul.f32 %v1795_v12, %v1795_v12  ;;  %v1018_v20 = vadd.f32 %v1017_v15, %v1767_v2  ;;  %v466_v47 = vpop.f32.mrf.mxu3 }
  0xe2   :  { %v1917_v42 = vadd.f32 %v1593_v63, %v427_v10 }
  0xe3   :  { %570 = vst [vmem:[%s2226_s3 + $0x50] sm:$0xff] %v1823_v21  ;;  %v1019_v23 = vadd.f32 %v1018_v20, %v1795_v12  ;;  %v1091_v24 = vmul.f32 %v1823_v21, %v1823_v21  ;;  %v1953_v12 = vadd.f32 %v1593_v63, %v466_v47 }
  0xe4   :  { %586 = vst [vmem:[%s2226_s3 + $0xd0] sm:$0xff] %v1826_v22 }
  0xe5   :  { %601 = vst [vmem:[%s2226_s3 + $0x148] sm:$0xff] %v1917_v42  ;;  %v1020_v2 = vadd.f32 %v1019_v23, %v1823_v21 }
  0xe6   :  { %614 = vst [vmem:[%s2226_s3 + $0x1b0] sm:$0xff] %v1953_v12 }
  0xe8   :  { %v337_v27 = vpop.f32.mrf.mxu0  ;;  %v385_v29 = vpop.f32.mrf.mxu1 }
  0xe9   :  { %v507_v30 = vadd.f32 %v1593_v63, %v337_v27  ;;  %v1852_v31 = vadd.f32 %v1593_v63, %v385_v29  ;;  %v1153_v27 = vadd.f32 %v1152_v59, %v1090_v18  ;;  %v430_v44 = vpop.f32.mrf.mxu2  ;;  %v469_v18 = vpop.f32.mrf.mxu3 }
  0xea   :  { %v1950_v51 = vadd.f32 %v1593_v63, %v430_v44  ;;  %v1978_v59 = vadd.f32 %v1593_v63, %v469_v18 }
  0xeb   :  { %571 = vst [vmem:[%s2226_s3 + $0x58] sm:$0xff] %v507_v30  ;;  %v1092_v33 = vmul.f32 %v507_v30, %v507_v30  ;;  %v1154_v54 = vadd.f32 %v1153_v27, %v1091_v24  ;;  %v1021_v56 = vadd.f32 %v1020_v2, %v507_v30  ;;  %v1097_v27 = vmul.f32 %v1599_v3, %v1599_v3 }
  0xec   :  { %587 = vst [vmem:[%s2226_s3 + $0xd8] sm:$0xff] %v1852_v31  ;;  %v1098_v2 = vmul.f32 %v1618_v9, %v1618_v9 }
  0xed   :  { %v1155_v21 = vadd.f32 %v1154_v54, %v1092_v33  ;;  %602 = vst [vmem:[%s2226_s3 + $0x150] sm:$0xff] %v1950_v51 }
  0xee   :  { %615 = vst [vmem:[%s2226_s3 + $0x1b8] sm:$0xff] %v1978_v59 }
  0xf0   :  { %v340_v37 = vpop.f32.mrf.mxu0  ;;  %v388_v40 = vpop.f32.mrf.mxu1 }
  0xf1   :  { %v508_v41 = vadd.f32 %v1593_v63, %v340_v37  ;;  %v1877_v43 = vadd.f32 %v1593_v63, %v388_v40  ;;  %v433_v52 = vpop.f32.mrf.mxu2 }
  0xf2   :  { %v1975_v20 = vadd.f32 %v1593_v63, %v433_v52 }
  0xf3   :  { %572 = vst [vmem:[%s2226_s3 + $0x60] sm:$0xff] %v508_v41  ;;  %v1093_v57 = vmul.f32 %v508_v41, %v508_v41  ;;  %v1022_v58 = vadd.f32 %v1021_v56, %v508_v41  ;;  %v472_v56 = vpop.f32.mrf.mxu3 }
  0xf4   :  { %588 = vst [vmem:[%s2226_s3 + $0xe0] sm:$0xff] %v1877_v43 }
  0xf5   :  { %v1156_v30 = vadd.f32 %v1155_v21, %v1093_v57  ;;  %603 = vst [vmem:[%s2226_s3 + $0x158] sm:$0xff] %v1975_v20  ;;  %v2008_v21 = vadd.f32 %v1593_v63, %v472_v56 }
  0xf7   :  { %616 = vst [vmem:[%s2226_s3 + $0x1c0] sm:$0xff] %v2008_v21 }
  0xf8   :  { %v343_v61 = vpop.f32.mrf.mxu0  ;;  %v391_v0 = vpop.f32.mrf.mxu1 }
  0xf9   :  { %v509_v5 = vadd.f32 %v1593_v63, %v343_v61  ;;  %v1912_v6 = vadd.f32 %v1593_v63, %v391_v0  ;;  %v436_v54 = vpop.f32.mrf.mxu2 }
  0xfa   :  { %v2005_v57 = vadd.f32 %v1593_v63, %v436_v54 }
  0xfb   :  { %573 = vst [vmem:[%s2226_s3 + $0x68] sm:$0xff] %v509_v5  ;;  %v1094_v61 = vmul.f32 %v509_v5, %v509_v5  ;;  %v1023_v0 = vadd.f32 %v1022_v58, %v509_v5  ;;  %v1100_v58 = vmul.f32 %v1656_v28, %v1656_v28 }
  0xfc   :  { %589 = vst [vmem:[%s2226_s3 + $0xe8] sm:$0xff] %v1912_v6 }
  0xfd   :  { %v1157_v14 = vadd.f32 %v1156_v30, %v1094_v61  ;;  %604 = vst [vmem:[%s2226_s3 + $0x160] sm:$0xff] %v2005_v57 }
 0x100   :  { %v346_v29 = vpop.f32.mrf.mxu0  ;;  %v394_v32 = vpop.f32.mrf.mxu1 }
 0x101   :  { %v510_v37 = vadd.f32 %v1593_v63, %v346_v29  ;;  %v1947_v40 = vadd.f32 %v1593_v63, %v394_v32 }
 0x103   :  { %574 = vst [vmem:[%s2226_s3 + $0x70] sm:$0xff] %v510_v37  ;;  %v1095_v1 = vmul.f32 %v510_v37, %v510_v37  ;;  %v1024_v39 = vadd.f32 %v1023_v0, %v510_v37 }
 0x104   :  { %590 = vst [vmem:[%s2226_s3 + $0xf0] sm:$0xff] %v1947_v40 }
 0x105   :  { %v1158_v23 = vadd.f32 %v1157_v14, %v1095_v1 }
 0x108   :  { %v349_v10 = vpop.f32.mrf.mxu0  ;;  %v397_v11 = vpop.f32.mrf.mxu1 }
 0x109   :  { %v511_v41 = vadd.f32 %v1593_v63, %v349_v10  ;;  %v1972_v15 = vadd.f32 %v1593_v63, %v397_v11  ;;  %v1103_v11 = vmul.f32 %v1724_v53, %v1724_v53 }
 0x10b   :  { %575 = vst [vmem:[%s2226_s3 + $0x78] sm:$0xff] %v511_v41  ;;  %v1025_v5 = vadd.f32 %v1024_v39, %v511_v41  ;;  %v1096_v24 = vmul.f32 %v511_v41, %v511_v41  ;;  %v439_v41 = vpop.f32.mrf.mxu2 }
 0x10c   :  { %591 = vst [vmem:[%s2226_s3 + $0xf8] sm:$0xff] %v1972_v15  ;;  %v2031_v52 = vadd.f32 %v1593_v63, %v439_v41 }
 0x10d   :  { %v1026_v29 = vadd.f32 %v1025_v5, %v1599_v3  ;;  %v1159_v32 = vadd.f32 %v1158_v23, %v1096_v24  ;;  %v1099_v3 = vmul.f32 %v1637_v19, %v1637_v19  ;;  %v1104_v23 = vmul.f32 %v1749_v60, %v1749_v60 }
 0x10e   :  { %605 = vst [vmem:[%s2226_s3 + $0x168] sm:$0xff] %v2031_v52 }
 0x10f   :  { %v1027_v33 = vadd.f32 %v1026_v29, %v1618_v9  ;;  %v1160_v37 = vadd.f32 %v1159_v32, %v1097_v27 }
 0x111   :  { %v1028_v44 = vadd.f32 %v1027_v33, %v1637_v19  ;;  %v1161_v47 = vadd.f32 %v1160_v37, %v1098_v2  ;;  %v1101_v19 = vmul.f32 %v1671_v36, %v1671_v36  ;;  %v1107_v2 = vmul.f32 %v1826_v22, %v1826_v22 }
 0x113   :  { %v1029_v9 = vadd.f32 %v1028_v44, %v1656_v28  ;;  %v1162_v61 = vadd.f32 %v1161_v47, %v1099_v3  ;;  %v1102_v28 = vmul.f32 %v1699_v46, %v1699_v46  ;;  %v442_v3 = vpop.f32.mrf.mxu2 }
 0x114   :  { %v2057_v44 = vadd.f32 %v1593_v63, %v442_v3 }
 0x115   :  { %v1030_v30 = vadd.f32 %v1029_v9, %v1671_v36  ;;  %v1163_v0 = vadd.f32 %v1162_v61, %v1100_v58  ;;  %v475_v36 = vpop.f32.mrf.mxu3  ;;  %v1109_v9 = vmul.f32 %v1877_v43, %v1877_v43 }
 0x116   :  { %v2034_v18 = vadd.f32 %v1593_v63, %v475_v36  ;;  %606 = vst [vmem:[%s2226_s3 + $0x170] sm:$0xff] %v2057_v44 }
 0x117   :  { %v1164_v1 = vadd.f32 %v1163_v0, %v1101_v19  ;;  %v1031_v10 = vadd.f32 %v1030_v30, %v1699_v46  ;;  %v1110_v19 = vmul.f32 %v1912_v6, %v1912_v6 }
 0x118   :  { %617 = vst [vmem:[%s2226_s3 + $0x1c8] sm:$0xff] %v2034_v18 }
 0x119   :  { %v1032_v14 = vadd.f32 %v1031_v10, %v1724_v53  ;;  %v1165_v39 = vadd.f32 %v1164_v1, %v1102_v28  ;;  %v1105_v53 = vmul.f32 %v1770_v4, %v1770_v4  ;;  %v1111_v28 = vmul.f32 %v1947_v40, %v1947_v40 }
 0x11b   :  { %v1033_v5 = vadd.f32 %v1032_v14, %v1749_v60  ;;  %v1166_v46 = vadd.f32 %v1165_v39, %v1103_v11  ;;  %v1106_v60 = vmul.f32 %v1798_v13, %v1798_v13  ;;  %v445_v1 = vpop.f32.mrf.mxu2 }
 0x11c   :  { %v2085_v11 = vadd.f32 %v1593_v63, %v445_v1 }
 0x11d   :  { %v1034_v24 = vadd.f32 %v1033_v5, %v1770_v4  ;;  %v1167_v27 = vadd.f32 %v1166_v46, %v1104_v23  ;;  %v478_v4 = vpop.f32.mrf.mxu3  ;;  %v1114_v23 = vmul.f32 %v1702_v48, %v1702_v48  ;;  %v1115_v46 = vmul.f32 %v1727_v55, %v1727_v55 }
 0x11e   :  { %v2060_v47 = vadd.f32 %v1593_v63, %v478_v4  ;;  %607 = vst [vmem:[%s2226_s3 + $0x178] sm:$0xff] %v2085_v11 }
 0x11f   :  { %v1035_v29 = vadd.f32 %v1034_v24, %v1798_v13  ;;  %v1168_v32 = vadd.f32 %v1167_v27, %v1105_v53  ;;  %v1108_v13 = vmul.f32 %v1852_v31, %v1852_v31 }
 0x120   :  { %618 = vst [vmem:[%s2226_s3 + $0x1d0] sm:$0xff] %v2060_v47 }
 0x121   :  { %v1036_v33 = vadd.f32 %v1035_v29, %v1826_v22  ;;  %v1169_v37 = vadd.f32 %v1168_v32, %v1106_v60  ;;  %v1116_v60 = vmul.f32 %v1752_v62, %v1752_v62 }
 0x123   :  { %v1037_v54 = vadd.f32 %v1036_v33, %v1852_v31  ;;  %v1170_v56 = vadd.f32 %v1169_v37, %v1107_v2  ;;  %v1118_v33 = vmul.f32 %v1801_v16, %v1801_v16 }
 0x125   :  { %v1171_v22 = vadd.f32 %v1170_v56, %v1108_v13  ;;  %v1038_v58 = vadd.f32 %v1037_v54, %v1877_v43  ;;  %v1112_v43 = vmul.f32 %v1972_v15, %v1972_v15  ;;  %v481_v10 = vpop.f32.mrf.mxu3 }
 0x126   :  { %v2088_v14 = vadd.f32 %v1593_v63, %v481_v10 }
 0x127   :  { %v1172_v61 = vadd.f32 %v1171_v22, %v1109_v9  ;;  %v1039_v31 = vadd.f32 %v1038_v58, %v1912_v6 }
 0x128   :  { %619 = vst [vmem:[%s2226_s3 + $0x1d8] sm:$0xff] %v2088_v14 }
 0x129   :  { %v1173_v30 = vadd.f32 %v1172_v61, %v1110_v19  ;;  %v1040_v0 = vadd.f32 %v1039_v31, %v1947_v40  ;;  %v1113_v40 = vmul.f32 %v1674_v38, %v1674_v38  ;;  %v1122_v61 = vmul.f32 %v1917_v42, %v1917_v42 }
 0x12b   :  { %v1174_v39 = vadd.f32 %v1173_v30, %v1111_v28  ;;  %v1041_v6 = vadd.f32 %v1040_v0, %v1972_v15 }
 0x12d   :  { %v1042_v41 = vadd.f32 %v1041_v6, %v1674_v38  ;;  %v1175_v36 = vadd.f32 %v1174_v39, %v1112_v43  ;;  %v484_v27 = vpop.f32.mrf.mxu3 }
 0x12e   :  { %v2109_v38 = vadd.f32 %v1593_v63, %v484_v27 }
 0x12f   :  { %v1043_v15 = vadd.f32 %v1042_v41, %v1702_v48  ;;  %v1176_v5 = vadd.f32 %v1175_v36, %v1113_v40  ;;  %v1117_v48 = vmul.f32 %v1773_v7, %v1773_v7  ;;  %v1126_v41 = vmul.f32 %v2031_v52, %v2031_v52 }
 0x130   :  { %620 = vst [vmem:[%s2226_s3 + $0x1e0] sm:$0xff] %v2109_v38 }
 0x131   :  { %v1044_v53 = vadd.f32 %v1043_v15, %v1727_v55  ;;  %v1177_v24 = vadd.f32 %v1176_v5, %v1114_v23  ;;  %v1127_v23 = vmul.f32 %v2057_v44, %v2057_v44  ;;  %v1128_v15 = vmul.f32 %v2085_v11, %v2085_v11 }
 0x133   :  { %v1045_v29 = vadd.f32 %v1044_v53, %v1752_v62  ;;  %v1178_v32 = vadd.f32 %v1177_v24, %v1115_v46  ;;  %v1119_v62 = vmul.f32 %v1829_v25, %v1829_v25 }
 0x135   :  { %v1046_v55 = vadd.f32 %v1045_v29, %v1773_v7  ;;  %v1179_v2 = vadd.f32 %v1178_v32, %v1116_v60  ;;  %v487_v13 = vpop.f32.mrf.mxu3  ;;  %v1120_v7 = vmul.f32 %v1855_v34, %v1855_v34 }
 0x136   :  { %v2128_v56 = vadd.f32 %v1593_v63, %v487_v13 }
 0x137   :  { %v1180_v37 = vadd.f32 %v1179_v2, %v1117_v48  ;;  %v1047_v3 = vadd.f32 %v1046_v55, %v1801_v16  ;;  %v1121_v16 = vmul.f32 %v1880_v49, %v1880_v49  ;;  %v1132_v48 = vmul.f32 %v1858_v35, %v1858_v35 }
 0x138   :  { %621 = vst [vmem:[%s2226_s3 + $0x1e8] sm:$0xff] %v2128_v56 }
 0x139   :  { %v1048_v4 = vadd.f32 %v1047_v3, %v1829_v25  ;;  %v1181_v54 = vadd.f32 %v1180_v37, %v1118_v33 }
 0x13b   :  { %v1049_v22 = vadd.f32 %v1048_v4, %v1855_v34  ;;  %v1182_v58 = vadd.f32 %v1181_v54, %v1119_v62  ;;  %v1123_v34 = vmul.f32 %v1950_v51, %v1950_v51 }
 0x13d   :  { %v1050_v25 = vadd.f32 %v1049_v22, %v1880_v49  ;;  %v1183_v9 = vadd.f32 %v1182_v58, %v1120_v7  ;;  %v490_v28 = vpop.f32.mrf.mxu3  ;;  %v1124_v49 = vmul.f32 %v1975_v20, %v1975_v20 }
 0x13e   :  { %v2147_v43 = vadd.f32 %v1593_v63, %v490_v28  ;;  %v1142_v28 = vmul.f32 %v2128_v56, %v2128_v56 }
 0x13f   :  { %v1051_v31 = vadd.f32 %v1050_v25, %v1917_v42  ;;  %v1184_v19 = vadd.f32 %v1183_v9, %v1121_v16 }
 0x140   :  { %622 = vst [vmem:[%s2226_s3 + $0x1f0] sm:$0xff] %v2147_v43 }
 0x141   :  { %v1052_v30 = vadd.f32 %v1051_v31, %v1950_v51  ;;  %v1185_v0 = vadd.f32 %v1184_v19, %v1122_v61  ;;  %v1125_v51 = vmul.f32 %v2005_v57, %v2005_v57  ;;  %v1140_v31 = vmul.f32 %v2088_v14, %v2088_v14 }
 0x143   :  { %v1053_v1 = vadd.f32 %v1052_v30, %v1975_v20  ;;  %v1186_v10 = vadd.f32 %v1185_v0, %v1123_v34  ;;  %v1141_v30 = vmul.f32 %v2109_v38, %v2109_v38 }
 0x145   :  { %v1187_v42 = vadd.f32 %v1186_v10, %v1124_v49  ;;  %v1054_v39 = vadd.f32 %v1053_v1, %v2005_v57  ;;  %v493_v5 = vpop.f32.mrf.mxu3  ;;  %v1143_v49 = vmul.f32 %v2147_v43, %v2147_v43 }
 0x146   :  { %v559_v46 = vadd.f32 %v1593_v63, %v493_v5  ;;  %v1131_v63 = vmul.f32 %v1832_v26, %v1832_v26 }
 0x147   :  { %v1188_v6 = vadd.f32 %v1187_v42, %v1125_v51  ;;  %v1055_v40 = vadd.f32 %v1054_v39, %v2031_v52  ;;  %v1129_v52 = vmul.f32 %v1776_v8, %v1776_v8 }
 0x148   :  { %623 = vst [vmem:[%s2226_s3 + $0x1f8] sm:$0xff] %v559_v46 }
 0x149   :  { %v1189_v36 = vadd.f32 %v1188_v6, %v1126_v41  ;;  %v1056_v20 = vadd.f32 %v1055_v40, %v2057_v44  ;;  %v1130_v44 = vmul.f32 %v1804_v17, %v1804_v17 }
 0x14b   :  { %v1190_v53 = vadd.f32 %v1189_v36, %v1127_v23  ;;  %v1057_v57 = vadd.f32 %v1056_v20, %v2085_v11 }
 0x14d   :  { %v1058_v24 = vadd.f32 %v1057_v57, %v1776_v8  ;;  %v1191_v27 = vadd.f32 %v1190_v53, %v1128_v15  ;;  %v1133_v8 = vmul.f32 %v1883_v50, %v1883_v50 }
 0x14f   :  { %v1059_v60 = vadd.f32 %v1058_v24, %v1804_v17  ;;  %v1192_v29 = vadd.f32 %v1191_v27, %v1129_v52  ;;  %v1134_v17 = vmul.f32 %v1920_v45, %v1920_v45 }
 0x151   :  { %v1060_v11 = vadd.f32 %v1059_v60, %v1832_v26  ;;  %v1193_v32 = vadd.f32 %v1192_v29, %v1130_v44  ;;  %v1135_v26 = vmul.f32 %v1953_v12, %v1953_v12 }
 0x153   :  { %v1061_v55 = vadd.f32 %v1060_v11, %v1858_v35  ;;  %v1194_v2 = vadd.f32 %v1193_v32, %v1131_v63  ;;  %v1136_v35 = vmul.f32 %v1978_v59, %v1978_v59 }
 0x155   :  { %v1062_v33 = vadd.f32 %v1061_v55, %v1883_v50  ;;  %v1195_v37 = vadd.f32 %v1194_v2, %v1132_v48  ;;  %v1137_v50 = vmul.f32 %v2008_v21, %v2008_v21 }
 0x157   :  { %v1196_v3 = vadd.f32 %v1195_v37, %v1133_v8  ;;  %v1063_v62 = vadd.f32 %v1062_v33, %v1920_v45  ;;  %v1138_v45 = vmul.f32 %v2034_v18, %v2034_v18 }
 0x159   :  { %v1064_v4 = vadd.f32 %v1063_v62, %v1953_v12  ;;  %v1197_v54 = vadd.f32 %v1196_v3, %v1134_v17  ;;  %v1139_v12 = vmul.f32 %v2060_v47, %v2060_v47 }
 0x15b   :  { %v1065_v13 = vadd.f32 %v1064_v4, %v1978_v59  ;;  %v1198_v7 = vadd.f32 %v1197_v54, %v1135_v26 }
 0x15d   :  { %v1066_v22 = vadd.f32 %v1065_v13, %v2008_v21  ;;  %v1199_v58 = vadd.f32 %v1198_v7, %v1136_v35 }
 0x15f   :  { %v1067_v16 = vadd.f32 %v1066_v22, %v2034_v18  ;;  %v1200_v25 = vadd.f32 %v1199_v58, %v1137_v50 }
 0x161   :  { %v1068_v9 = vadd.f32 %v1067_v16, %v2060_v47  ;;  %v1201_v61 = vadd.f32 %v1200_v25, %v1138_v45 }
 0x163   :  { %v1069_v59 = vadd.f32 %v1068_v9, %v2088_v14  ;;  %v1202_v19 = vadd.f32 %v1201_v61, %v1139_v12  ;;  %v1144_v14 = vmul.f32 %v559_v46, %v559_v46 }
 0x165   :  { %v1203_v21 = vadd.f32 %v1202_v19, %v1140_v31  ;;  %v1070_v34 = vadd.f32 %v1069_v59, %v2109_v38 }
 0x167   :  { %v1204_v18 = vadd.f32 %v1203_v21, %v1141_v30  ;;  %v1071_v0 = vadd.f32 %v1070_v34, %v2128_v56 }
 0x169   :  { %v1205_v47 = vadd.f32 %v1204_v18, %v1142_v28  ;;  %v1072_v1 = vadd.f32 %v1071_v0, %v2147_v43 }
 0x16b   :  { %v1206_v10 = vadd.f32 %v1205_v47, %v1143_v49  ;;  %v1073_v42 = vadd.f32 %v1072_v1, %v559_v46 }
 0x16d   :  { %v1074_v39 = vrot.slane %v1073_v42, 4  ;;  %v1207_v51 = vadd.f32 %v1206_v10, %v1144_v14 }
 0x16f   :  { %v1075_v6 = vadd.f32 %v1074_v39, %v1073_v42  ;;  %v1208_v40 = vrot.slane %v1207_v51, 4 }
 0x171   :  { %v1076_v38 = vrot.slane %v1075_v6, 2  ;;  %v1209_v41 = vadd.f32 %v1208_v40, %v1207_v51 }
 0x173   :  { %v1077_v36 = vadd.f32 %v1076_v38, %v1075_v6  ;;  %v1210_v20 = vrot.slane %v1209_v41, 2 }
 0x175   :  { %v1078_v23 = vrot.slane %v1077_v36, 1  ;;  %v1211_v15 = vadd.f32 %v1210_v20, %v1209_v41 }
 0x177   :  { %v1079_v56 = vadd.f32 %v1078_v23, %v1077_v36  ;;  %v1212_v5 = vrot.slane %v1211_v15, 1 }
 0x179   :  { %1080 = vst [vmem:[%s2227_s4] sm:$0x1] %v1079_v56  ;;  %v1213_v43 = vadd.f32 %v1212_v5, %v1211_v15 }
 0x17b   :  { %1214 = vst [vmem:[%s2228_s5] sm:$0x1] %v1213_v43 }

// kernel: upconv_forward.8
= control target key start
LH: loop header
LB: loop body
LE: loop exit
PB: predicated region body
PF: predicated region fallthrough
CT: control target
= control target key end

     0   :  { %vm283_vm0 = vcmask 1043456   ;;  %vm90_vm1 = vcmask 293888   ;;  %s2200_s1 = inlined_call_operand.vmem [shape: f32[36,128], index: 1, kind: input, shape index: {}]   ;;  %s2201_s2 = inlined_call_operand.vmem [shape: f32[1,128], index: 2, kind: input, shape index: {}]   ;;  %s2202_s0 = inlined_call_operand.vmem [shape: f32[512,36], index: 0, kind: input, shape index: {}]   ;;  %s2203_s3 = inlined_call_operand.vmem [shape: f32[512,128], index: 3, kind: output, shape index: {0}]   ;;  %s2204_s4 = inlined_call_operand.vmem [shape: f32[1,1,128], index: 4, kind: output, shape index: {1}]   ;;  %s2205_s5 = inlined_call_operand.vmem [shape: f32[1,1,128], index: 5, kind: output, shape index: {2}]  }
   0x1   :  { %v89_v0 = vld [vmem:[%s2200_s1 + $0x20] sm:$0xf]  ;;  %v88_v1 = vld [vmem:[%s2200_s1 + $0x18] sm:$0xff]  ;;  %v87_v2 = vld [vmem:[%s2200_s1 + $0x10] sm:$0xff] }
   0x2   :  { %1227 = vmatpush.msk.msra.mxu0 %vm283_vm0, %v89_v0  ;;  %1292 = vmatpush.msk.msra.mxu1 %vm283_vm0, %v89_v0  ;;  %v86_v3 = vld [vmem:[%s2200_s1 + $0x8] sm:$0xff]  ;;  %v85_v4 = vld [vmem:[%s2200_s1] sm:$0xff]  ;;  %v23_v9 = vld [vmem:[%s2202_s0 + $0x10] sm:$0xff] }
   0x3   :  { %1293 = vmatpush.msk.msra.mxu2 %vm283_vm0, %v89_v0  ;;  %1294 = vmatpush.msk.msra.mxu3 %vm283_vm0, %v89_v0  ;;  %v21_v5 = vld [vmem:[%s2202_s0] sm:$0xff]  ;;  %v22_v7 = vld [vmem:[%s2202_s0 + $0x8] sm:$0xff]  ;;  %v39_v10 = vld [vmem:[%s2202_s0 + $0x90] sm:$0xff] }
   0x4   :  { %299 = vmatpush.msra.mxu0 %v88_v1  ;;  %1295 = vmatpush.msra.mxu1 %v88_v1  ;;  %v37_v6 = vld [vmem:[%s2202_s0 + $0x80] sm:$0xff]  ;;  %v38_v8 = vld [vmem:[%s2202_s0 + $0x88] sm:$0xff]  ;;  %v24_v11 = vld [vmem:[%s2202_s0 + $0x18] sm:$0xff] }
   0x5   :  { %1296 = vmatpush.msra.mxu2 %v88_v1  ;;  %1297 = vmatpush.msra.mxu3 %v88_v1  ;;  %v40_v12 = vld [vmem:[%s2202_s0 + $0x98] sm:$0xff]  ;;  %v53_v13 = vld [vmem:[%s2202_s0 + $0x100] sm:$0xff]  ;;  %v54_v16 = vld [vmem:[%s2202_s0 + $0x108] sm:$0xff] }
   0x6   :  { %300 = vmatpush.msra.mxu0 %v87_v2  ;;  %1298 = vmatpush.msra.mxu1 %v87_v2  ;;  %v25_v14 = vld [vmem:[%s2202_s0 + $0x20] sm:$0xff]  ;;  %v26_v17 = vld [vmem:[%s2202_s0 + $0x28] sm:$0xff]  ;;  %v55_v19 = vld [vmem:[%s2202_s0 + $0x110] sm:$0xff] }
   0x7   :  { %1299 = vmatpush.msra.mxu2 %v87_v2  ;;  %1300 = vmatpush.msra.mxu3 %v87_v2  ;;  %v41_v15 = vld [vmem:[%s2202_s0 + $0xa0] sm:$0xff]  ;;  %v42_v18 = vld [vmem:[%s2202_s0 + $0xa8] sm:$0xff]  ;;  %v27_v20 = vld [vmem:[%s2202_s0 + $0x30] sm:$0xff] }
   0x8   :  { %301 = vmatpush.msra.mxu0 %v86_v3  ;;  %1301 = vmatpush.msra.mxu1 %v86_v3  ;;  %v43_v21 = vld [vmem:[%s2202_s0 + $0xb0] sm:$0xff]  ;;  %v56_v22 = vld [vmem:[%s2202_s0 + $0x118] sm:$0xff]  ;;  %v57_v25 = vld [vmem:[%s2202_s0 + $0x120] sm:$0xff] }
   0x9   :  { %1302 = vmatpush.msra.mxu2 %v86_v3  ;;  %1303 = vmatpush.msra.mxu3 %v86_v3  ;;  %v28_v23 = vld [vmem:[%s2202_s0 + $0x38] sm:$0xff]  ;;  %v69_v26 = vld [vmem:[%s2202_s0 + $0x180] sm:$0xff]  ;;  %v58_v29 = vld [vmem:[%s2202_s0 + $0x128] sm:$0xff] }
   0xa   :  { %302 = vmatpush.msra.mxu0 %v85_v4  ;;  %1304 = vmatpush.msra.mxu1 %v85_v4  ;;  %v44_v24 = vld [vmem:[%s2202_s0 + $0xb8] sm:$0xff]  ;;  %v29_v27 = vld [vmem:[%s2202_s0 + $0x40] sm:$0xff]  ;;  %v70_v30 = vld [vmem:[%s2202_s0 + $0x188] sm:$0xff] }
   0xb   :  { %1228 = vmatmul.msk.f32.vlgmr.msra.gmra.mxu0 %vm90_vm1, %v21_v5  ;;  %1244 = vmatmul.msk.f32.vlgmr.msra.gmra.mxu1 %vm90_vm1, %v37_v6  ;;  %v45_v28 = vld [vmem:[%s2202_s0 + $0xc0] sm:$0xff]  ;;  %v30_v31 = vld [vmem:[%s2202_s0 + $0x48] sm:$0xff]  ;;  %v59_v33 = vld [vmem:[%s2202_s0 + $0x130] sm:$0xff] }
   0xc   :  { %1305 = vmatpush.msra.mxu2 %v85_v4  ;;  %1306 = vmatpush.msra.mxu3 %v85_v4  ;;  %v46_v32 = vld [vmem:[%s2202_s0 + $0xc8] sm:$0xff]  ;;  %v71_v34 = vld [vmem:[%s2202_s0 + $0x190] sm:$0xff]  ;;  %v60_v37 = vld [vmem:[%s2202_s0 + $0x138] sm:$0xff] }
   0xd   :  { %1260 = vmatmul.msk.f32.vlgmr.msra.gmra.mxu2 %vm90_vm1, %v53_v13  ;;  %1276 = vmatmul.msk.f32.vlgmr.msra.gmra.mxu3 %vm90_vm1, %v69_v26  ;;  %v31_v35 = vld [vmem:[%s2202_s0 + $0x50] sm:$0xff]  ;;  %v72_v38 = vld [vmem:[%s2202_s0 + $0x198] sm:$0xff]  ;;  %v61_v41 = vld [vmem:[%s2202_s0 + $0x140] sm:$0xff] }
   0xe   :  { %v47_v36 = vld [vmem:[%s2202_s0 + $0xd0] sm:$0xff]  ;;  %v32_v39 = vld [vmem:[%s2202_s0 + $0x58] sm:$0xff]  ;;  %v73_v42 = vld [vmem:[%s2202_s0 + $0x1a0] sm:$0xff] }
   0xf   :  { %v48_v40 = vld [vmem:[%s2202_s0 + $0xd8] sm:$0xff]  ;;  %v33_v43 = vld [vmem:[%s2202_s0 + $0x60] sm:$0xff]  ;;  %v62_v45 = vld [vmem:[%s2202_s0 + $0x148] sm:$0xff] }
  0x10   :  { %v49_v44 = vld [vmem:[%s2202_s0 + $0xe0] sm:$0xff]  ;;  %v74_v46 = vld [vmem:[%s2202_s0 + $0x1a8] sm:$0xff]  ;;  %v63_v49 = vld [vmem:[%s2202_s0 + $0x150] sm:$0xff] }
  0x11   :  { %v34_v47 = vld [vmem:[%s2202_s0 + $0x68] sm:$0xff]  ;;  %v75_v50 = vld [vmem:[%s2202_s0 + $0x1b0] sm:$0xff]  ;;  %v64_v53 = vld [vmem:[%s2202_s0 + $0x158] sm:$0xff] }
  0x12   :  { %v50_v48 = vld [vmem:[%s2202_s0 + $0xe8] sm:$0xff]  ;;  %v35_v51 = vld [vmem:[%s2202_s0 + $0x70] sm:$0xff]  ;;  %v76_v54 = vld [vmem:[%s2202_s0 + $0x1b8] sm:$0xff] }
  0x13   :  { %1229 = vmatmul.msk.f32.gmra.mxu0 %vm90_vm1, %v22_v7  ;;  %1245 = vmatmul.msk.f32.gmra.mxu1 %vm90_vm1, %v38_v8  ;;  %v51_v52 = vld [vmem:[%s2202_s0 + $0xf0] sm:$0xff]  ;;  %v36_v55 = vld [vmem:[%s2202_s0 + $0x78] sm:$0xff]  ;;  %v65_v57 = vld [vmem:[%s2202_s0 + $0x160] sm:$0xff] }
  0x14   :  { %v52_v56 = vld [vmem:[%s2202_s0 + $0xf8] sm:$0xff]  ;;  %v77_v58 = vld [vmem:[%s2202_s0 + $0x1c0] sm:$0xff]  ;;  %v66_v0 = vld [vmem:[%s2202_s0 + $0x168] sm:$0xff] }
  0x15   :  { %1261 = vmatmul.msk.f32.gmra.mxu2 %vm90_vm1, %v54_v16  ;;  %1277 = vmatmul.msk.f32.gmra.mxu3 %vm90_vm1, %v70_v30  ;;  %v1570_v59 = vld [vmem:[%s2201_s2] ss:$0 sm:$0xff]  ;;  %v78_v1 = vld [vmem:[%s2202_s0 + $0x1c8] sm:$0xff] }
  0x1b   :  { %1230 = vmatmul.msk.f32.gmra.mxu0 %vm90_vm1, %v23_v9  ;;  %1246 = vmatmul.msk.f32.gmra.mxu1 %vm90_vm1, %v39_v10  ;;  %v67_v9 = vld [vmem:[%s2202_s0 + $0x170] sm:$0xff] }
  0x1c   :  { %v79_v10 = vld [vmem:[%s2202_s0 + $0x1d0] sm:$0xff] }
  0x1d   :  { %1262 = vmatmul.msk.f32.gmra.mxu2 %vm90_vm1, %v55_v19  ;;  %1278 = vmatmul.msk.f32.gmra.mxu3 %vm90_vm1, %v71_v34  ;;  %v80_v19 = vld [vmem:[%s2202_s0 + $0x1d8] sm:$0xff] }
  0x23   :  { %1231 = vmatmul.msk.f32.gmra.mxu0 %vm90_vm1, %v24_v11  ;;  %1247 = vmatmul.msk.f32.gmra.mxu1 %vm90_vm1, %v40_v12 }
  0x25   :  { %1263 = vmatmul.msk.f32.gmra.mxu2 %vm90_vm1, %v56_v22  ;;  %1279 = vmatmul.msk.f32.gmra.mxu3 %vm90_vm1, %v72_v38 }
  0x2b   :  { %1232 = vmatmul.msk.f32.gmra.mxu0 %vm90_vm1, %v25_v14  ;;  %1248 = vmatmul.msk.f32.gmra.mxu1 %vm90_vm1, %v41_v15 }
  0x2d   :  { %1264 = vmatmul.msk.f32.gmra.mxu2 %vm90_vm1, %v57_v25  ;;  %1280 = vmatmul.msk.f32.gmra.mxu3 %vm90_vm1, %v73_v42 }
  0x33   :  { %1233 = vmatmul.msk.f32.gmra.mxu0 %vm90_vm1, %v26_v17  ;;  %1249 = vmatmul.msk.f32.gmra.mxu1 %vm90_vm1, %v42_v18  ;;  %v68_v18 = vld [vmem:[%s2202_s0 + $0x178] sm:$0xff] }
  0x35   :  { %1265 = vmatmul.msk.f32.gmra.mxu2 %vm90_vm1, %v58_v29  ;;  %1281 = vmatmul.msk.f32.gmra.mxu3 %vm90_vm1, %v74_v46 }
  0x3b   :  { %1234 = vmatmul.msk.f32.gmra.mxu0 %vm90_vm1, %v27_v20  ;;  %1250 = vmatmul.msk.f32.gmra.mxu1 %vm90_vm1, %v43_v21 }
  0x3d   :  { %1266 = vmatmul.msk.f32.gmra.mxu2 %vm90_vm1, %v59_v33  ;;  %1282 = vmatmul.msk.f32.gmra.mxu3 %vm90_vm1, %v75_v50 }
  0x43   :  { %1235 = vmatmul.msk.f32.gmra.mxu0 %vm90_vm1, %v28_v23  ;;  %1251 = vmatmul.msk.f32.gmra.mxu1 %vm90_vm1, %v44_v24 }
  0x45   :  { %1267 = vmatmul.msk.f32.gmra.mxu2 %vm90_vm1, %v60_v37  ;;  %1283 = vmatmul.msk.f32.gmra.mxu3 %vm90_vm1, %v76_v54  ;;  %v82_v37 = vld [vmem:[%s2202_s0 + $0x1e8] sm:$0xff] }
  0x4b   :  { %1236 = vmatmul.msk.f32.gmra.mxu0 %vm90_vm1, %v29_v27  ;;  %1252 = vmatmul.msk.f32.gmra.mxu1 %vm90_vm1, %v45_v28  ;;  %v81_v27 = vld [vmem:[%s2202_s0 + $0x1e0] sm:$0xff] }
  0x4d   :  { %1268 = vmatmul.msk.f32.gmra.mxu2 %vm90_vm1, %v61_v41  ;;  %1284 = vmatmul.msk.f32.gmra.mxu3 %vm90_vm1, %v77_v58 }
  0x53   :  { %1237 = vmatmul.msk.f32.gmra.mxu0 %vm90_vm1, %v30_v31  ;;  %1253 = vmatmul.msk.f32.gmra.mxu1 %vm90_vm1, %v46_v32 }
  0x55   :  { %1269 = vmatmul.msk.f32.gmra.mxu2 %vm90_vm1, %v62_v45  ;;  %1285 = vmatmul.msk.f32.gmra.mxu3 %vm90_vm1, %v78_v1  ;;  %v83_v45 = vld [vmem:[%s2202_s0 + $0x1f0] sm:$0xff] }
  0x5b   :  { %1238 = vmatmul.msk.f32.gmra.mxu0 %vm90_vm1, %v31_v35  ;;  %1254 = vmatmul.msk.f32.gmra.mxu1 %vm90_vm1, %v47_v36 }
  0x5d   :  { %1270 = vmatmul.msk.f32.gmra.mxu2 %vm90_vm1, %v63_v49  ;;  %1286 = vmatmul.msk.f32.gmra.mxu3 %vm90_vm1, %v79_v10 }
  0x63   :  { %1239 = vmatmul.msk.f32.gmra.mxu0 %vm90_vm1, %v32_v39  ;;  %1255 = vmatmul.msk.f32.gmra.mxu1 %vm90_vm1, %v48_v40 }
  0x65   :  { %1271 = vmatmul.msk.f32.gmra.mxu2 %vm90_vm1, %v64_v53  ;;  %1287 = vmatmul.msk.f32.gmra.mxu3 %vm90_vm1, %v80_v19 }
  0x6b   :  { %1240 = vmatmul.msk.f32.gmra.mxu0 %vm90_vm1, %v33_v43  ;;  %1256 = vmatmul.msk.f32.gmra.mxu1 %vm90_vm1, %v49_v44 }
  0x6d   :  { %1272 = vmatmul.msk.f32.gmra.mxu2 %vm90_vm1, %v65_v57  ;;  %1288 = vmatmul.msk.f32.gmra.mxu3 %vm90_vm1, %v81_v27 }
  0x73   :  { %1241 = vmatmul.msk.f32.gmra.mxu0 %vm90_vm1, %v34_v47  ;;  %1257 = vmatmul.msk.f32.gmra.mxu1 %vm90_vm1, %v50_v48 }
  0x75   :  { %1273 = vmatmul.msk.f32.gmra.mxu2 %vm90_vm1, %v66_v0  ;;  %1289 = vmatmul.msk.f32.gmra.mxu3 %vm90_vm1, %v82_v37 }
  0x7b   :  { %1242 = vmatmul.msk.f32.gmra.mxu0 %vm90_vm1, %v35_v51  ;;  %1258 = vmatmul.msk.f32.gmra.mxu1 %vm90_vm1, %v51_v52  ;;  %v84_v52 = vld [vmem:[%s2202_s0 + $0x1f8] sm:$0xff] }
  0x7d   :  { %1274 = vmatmul.msk.f32.gmra.mxu2 %vm90_vm1, %v67_v9  ;;  %1290 = vmatmul.msk.f32.gmra.mxu3 %vm90_vm1, %v83_v45 }
  0x83   :  { %1243 = vmatmul.msk.f32.gmra.mxu0 %vm90_vm1, %v36_v55  ;;  %1259 = vmatmul.msk.f32.gmra.mxu1 %vm90_vm1, %v52_v56 }
  0x85   :  { %1275 = vmatmul.msk.f32.gmra.mxu2 %vm90_vm1, %v68_v18  ;;  %1291 = vmatmul.msk.f32.gmra.mxu3 %vm90_vm1, %v84_v52 }
  0x88   :  { %v304_v60 = vpop.f32.mrf.mxu0  ;;  %v352_v61 = vpop.f32.mrf.mxu1 }
  0x89   :  { %v496_v62 = vadd.f32 %v1570_v59, %v304_v60  ;;  %v1576_v63 = vadd.f32 %v1570_v59, %v352_v61 }
  0x8b   :  { %560 = vst [vmem:[%s2203_s3] sm:$0xff] %v496_v62  ;;  %v1081_v6 = vmul.f32 %v496_v62, %v496_v62 }
  0x8c   :  { %576 = vst [vmem:[%s2203_s3 + $0x80] sm:$0xff] %v1576_v63 }
  0x90   :  { %v307_v2 = vpop.f32.mrf.mxu0  ;;  %v355_v3 = vpop.f32.mrf.mxu1 }
  0x91   :  { %v497_v4 = vadd.f32 %v1570_v59, %v307_v2  ;;  %v1595_v5 = vadd.f32 %v1570_v59, %v355_v3  ;;  %v400_v33 = vpop.f32.mrf.mxu2  ;;  %v448_v2 = vpop.f32.mrf.mxu3 }
  0x92   :  { %v1651_v34 = vadd.f32 %v1570_v59, %v400_v33 }
  0x93   :  { %561 = vst [vmem:[%s2203_s3 + $0x8] sm:$0xff] %v497_v4  ;;  %v1011_v7 = vadd.f32 %v497_v4, %v496_v62  ;;  %v1082_v8 = vmul.f32 %v497_v4, %v497_v4  ;;  %v1753_v4 = vadd.f32 %v1570_v59, %v448_v2 }
  0x94   :  { %577 = vst [vmem:[%s2203_s3 + $0x88] sm:$0xff] %v1595_v5 }
  0x95   :  { %v1145_v11 = vadd.f32 %v1082_v8, %v1081_v6  ;;  %592 = vst [vmem:[%s2203_s3 + $0x100] sm:$0xff] %v1651_v34 }
  0x96   :  { %608 = vst [vmem:[%s2203_s3 + $0x180] sm:$0xff] %v1753_v4 }
  0x98   :  { %v310_v12 = vpop.f32.mrf.mxu0  ;;  %v358_v13 = vpop.f32.mrf.mxu1 }
  0x99   :  { %v498_v14 = vadd.f32 %v1570_v59, %v310_v12  ;;  %v1614_v15 = vadd.f32 %v1570_v59, %v358_v13  ;;  %v403_v43 = vpop.f32.mrf.mxu2 }
  0x9a   :  { %v1679_v44 = vadd.f32 %v1570_v59, %v403_v43 }
  0x9b   :  { %562 = vst [vmem:[%s2203_s3 + $0x10] sm:$0xff] %v498_v14  ;;  %v1012_v16 = vadd.f32 %v1011_v7, %v498_v14  ;;  %v1083_v17 = vmul.f32 %v498_v14, %v498_v14 }
  0x9c   :  { %578 = vst [vmem:[%s2203_s3 + $0x90] sm:$0xff] %v1614_v15 }
  0x9d   :  { %v1146_v20 = vadd.f32 %v1145_v11, %v1083_v17  ;;  %593 = vst [vmem:[%s2203_s3 + $0x108] sm:$0xff] %v1679_v44  ;;  %v451_v11 = vpop.f32.mrf.mxu3 }
  0x9e   :  { %v1781_v13 = vadd.f32 %v1570_v59, %v451_v11 }
  0xa0   :  { %v313_v21 = vpop.f32.mrf.mxu0  ;;  %v361_v22 = vpop.f32.mrf.mxu1  ;;  %609 = vst [vmem:[%s2203_s3 + $0x188] sm:$0xff] %v1781_v13 }
  0xa1   :  { %v499_v23 = vadd.f32 %v1570_v59, %v313_v21  ;;  %v1633_v24 = vadd.f32 %v1570_v59, %v361_v22  ;;  %v406_v50 = vpop.f32.mrf.mxu2 }
  0xa2   :  { %v1704_v51 = vadd.f32 %v1570_v59, %v406_v50 }
  0xa3   :  { %563 = vst [vmem:[%s2203_s3 + $0x18] sm:$0xff] %v499_v23  ;;  %v1013_v25 = vadd.f32 %v1012_v16, %v499_v23  ;;  %v1084_v26 = vmul.f32 %v499_v23, %v499_v23 }
  0xa4   :  { %579 = vst [vmem:[%s2203_s3 + $0x98] sm:$0xff] %v1633_v24 }
  0xa5   :  { %v1147_v28 = vadd.f32 %v1146_v20, %v1084_v26  ;;  %594 = vst [vmem:[%s2203_s3 + $0x110] sm:$0xff] %v1704_v51  ;;  %v454_v20 = vpop.f32.mrf.mxu3 }
  0xa6   :  { %v1809_v22 = vadd.f32 %v1570_v59, %v454_v20 }
  0xa8   :  { %v316_v29 = vpop.f32.mrf.mxu0  ;;  %v364_v30 = vpop.f32.mrf.mxu1  ;;  %610 = vst [vmem:[%s2203_s3 + $0x190] sm:$0xff] %v1809_v22 }
  0xa9   :  { %v500_v31 = vadd.f32 %v1570_v59, %v316_v29  ;;  %v1648_v32 = vadd.f32 %v1570_v59, %v364_v30  ;;  %v409_v57 = vpop.f32.mrf.mxu2 }
  0xaa   :  { %v1729_v58 = vadd.f32 %v1570_v59, %v409_v57 }
  0xab   :  { %564 = vst [vmem:[%s2203_s3 + $0x20] sm:$0xff] %v500_v31  ;;  %v1656_v35 = vadd.f32 %v1013_v25, %v500_v31  ;;  %v1085_v36 = vmul.f32 %v500_v31, %v500_v31 }
  0xac   :  { %580 = vst [vmem:[%s2203_s3 + $0xa0] sm:$0xff] %v1648_v32 }
  0xad   :  { %v1665_v38 = vadd.f32 %v1147_v28, %v1085_v36  ;;  %595 = vst [vmem:[%s2203_s3 + $0x118] sm:$0xff] %v1729_v58  ;;  %v457_v29 = vpop.f32.mrf.mxu3 }
  0xae   :  { %v1835_v31 = vadd.f32 %v1570_v59, %v457_v29 }
  0xb0   :  { %v319_v39 = vpop.f32.mrf.mxu0  ;;  %v367_v40 = vpop.f32.mrf.mxu1  ;;  %611 = vst [vmem:[%s2203_s3 + $0x198] sm:$0xff] %v1835_v31 }
  0xb1   :  { %v1673_v41 = vadd.f32 %v1570_v59, %v319_v39  ;;  %v1676_v42 = vadd.f32 %v1570_v59, %v367_v40  ;;  %v412_v1 = vpop.f32.mrf.mxu2 }
  0xb2   :  { %v1750_v3 = vadd.f32 %v1570_v59, %v412_v1 }
  0xb3   :  { %565 = vst [vmem:[%s2203_s3 + $0x28] sm:$0xff] %v1673_v41  ;;  %v1015_v52 = vadd.f32 %v1656_v35, %v1673_v41 }
  0xb4   :  { %581 = vst [vmem:[%s2203_s3 + $0xa8] sm:$0xff] %v1676_v42 }
  0xb5   :  { %596 = vst [vmem:[%s2203_s3 + $0x120] sm:$0xff] %v1750_v3  ;;  %v460_v43 = vpop.f32.mrf.mxu3 }
  0xb8   :  { %v322_v46 = vpop.f32.mrf.mxu0  ;;  %v370_v47 = vpop.f32.mrf.mxu1 }
  0xb9   :  { %v1698_v48 = vadd.f32 %v1570_v59, %v322_v46  ;;  %v1701_v49 = vadd.f32 %v1570_v59, %v370_v47  ;;  %v415_v10 = vpop.f32.mrf.mxu2  ;;  %v1860_v46 = vadd.f32 %v1570_v59, %v460_v43  ;;  %v1086_v47 = vmul.f32 %v1673_v41, %v1673_v41 }
  0xba   :  { %v1778_v12 = vadd.f32 %v1570_v59, %v415_v10 }
  0xbb   :  { %566 = vst [vmem:[%s2203_s3 + $0x30] sm:$0xff] %v1698_v48  ;;  %v1087_v50 = vmul.f32 %v1698_v48, %v1698_v48 }
  0xbc   :  { %582 = vst [vmem:[%s2203_s3 + $0xb0] sm:$0xff] %v1701_v49 }
  0xbd   :  { %597 = vst [vmem:[%s2203_s3 + $0x128] sm:$0xff] %v1778_v12 }
  0xbe   :  { %612 = vst [vmem:[%s2203_s3 + $0x1a0] sm:$0xff] %v1860_v46 }
  0xc0   :  { %v325_v53 = vpop.f32.mrf.mxu0  ;;  %v373_v54 = vpop.f32.mrf.mxu1 }
  0xc1   :  { %v1723_v55 = vadd.f32 %v1570_v59, %v325_v53  ;;  %v1726_v56 = vadd.f32 %v1570_v59, %v373_v54  ;;  %v418_v19 = vpop.f32.mrf.mxu2  ;;  %v1149_v53 = vadd.f32 %v1665_v38, %v1086_v47 }
  0xc2   :  { %v1806_v21 = vadd.f32 %v1570_v59, %v418_v19 }
  0xc3   :  { %567 = vst [vmem:[%s2203_s3 + $0x38] sm:$0xff] %v1723_v55  ;;  %v1088_v54 = vmul.f32 %v1723_v55, %v1723_v55  ;;  %v1150_v10 = vadd.f32 %v1149_v53, %v1087_v50 }
  0xc4   :  { %583 = vst [vmem:[%s2203_s3 + $0xb8] sm:$0xff] %v1726_v56 }
  0xc5   :  { %598 = vst [vmem:[%s2203_s3 + $0x130] sm:$0xff] %v1806_v21 }
  0xc8   :  { %v328_v60 = vpop.f32.mrf.mxu0  ;;  %v376_v61 = vpop.f32.mrf.mxu1 }
  0xc9   :  { %v1744_v62 = vadd.f32 %v1570_v59, %v328_v60  ;;  %v1747_v0 = vadd.f32 %v1570_v59, %v376_v61  ;;  %v421_v28 = vpop.f32.mrf.mxu2  ;;  %v1016_v61 = vadd.f32 %v1015_v52, %v1698_v48  ;;  %v1151_v48 = vadd.f32 %v1150_v10, %v1088_v54 }
  0xca   :  { %v1832_v30 = vadd.f32 %v1570_v59, %v421_v28 }
  0xcb   :  { %568 = vst [vmem:[%s2203_s3 + $0x40] sm:$0xff] %v1744_v62  ;;  %v1089_v35 = vmul.f32 %v1744_v62, %v1744_v62  ;;  %v1017_v11 = vadd.f32 %v1016_v61, %v1723_v55 }
  0xcc   :  { %584 = vst [vmem:[%s2203_s3 + $0xc0] sm:$0xff] %v1747_v0 }
  0xcd   :  { %599 = vst [vmem:[%s2203_s3 + $0x138] sm:$0xff] %v1832_v30  ;;  %v1152_v55 = vadd.f32 %v1151_v48, %v1089_v35 }
  0xd0   :  { %v331_v6 = vpop.f32.mrf.mxu0  ;;  %v379_v7 = vpop.f32.mrf.mxu1 }
  0xd1   :  { %v1772_v8 = vadd.f32 %v1570_v59, %v331_v6  ;;  %v1775_v9 = vadd.f32 %v1570_v59, %v379_v7  ;;  %v424_v40 = vpop.f32.mrf.mxu2  ;;  %v463_v7 = vpop.f32.mrf.mxu3 }
  0xd2   :  { %v1857_v45 = vadd.f32 %v1570_v59, %v424_v40  ;;  %v1897_v41 = vadd.f32 %v1570_v59, %v463_v7 }
  0xd3   :  { %569 = vst [vmem:[%s2203_s3 + $0x48] sm:$0xff] %v1772_v8 }
  0xd4   :  { %585 = vst [vmem:[%s2203_s3 + $0xc8] sm:$0xff] %v1775_v9 }
  0xd5   :  { %600 = vst [vmem:[%s2203_s3 + $0x140] sm:$0xff] %v1857_v45 }
  0xd6   :  { %613 = vst [vmem:[%s2203_s3 + $0x1a8] sm:$0xff] %v1897_v41 }
  0xd8   :  { %v334_v14 = vpop.f32.mrf.mxu0  ;;  %v382_v16 = vpop.f32.mrf.mxu1 }
  0xd9   :  { %v1800_v17 = vadd.f32 %v1570_v59, %v334_v14  ;;  %v1803_v18 = vadd.f32 %v1570_v59, %v382_v16  ;;  %v427_v6 = vpop.f32.mrf.mxu2  ;;  %v1090_v14 = vmul.f32 %v1772_v8, %v1772_v8  ;;  %v1018_v16 = vadd.f32 %v1017_v11, %v1744_v62  ;;  %v466_v43 = vpop.f32.mrf.mxu3 }
  0xda   :  { %v1894_v38 = vadd.f32 %v1570_v59, %v427_v6 }
  0xdb   :  { %570 = vst [vmem:[%s2203_s3 + $0x50] sm:$0xff] %v1800_v17  ;;  %v1019_v19 = vadd.f32 %v1018_v16, %v1772_v8  ;;  %v1091_v20 = vmul.f32 %v1800_v17, %v1800_v17  ;;  %v1930_v8 = vadd.f32 %v1570_v59, %v466_v43 }
  0xdc   :  { %586 = vst [vmem:[%s2203_s3 + $0xd0] sm:$0xff] %v1803_v18 }
  0xdd   :  { %601 = vst [vmem:[%s2203_s3 + $0x148] sm:$0xff] %v1894_v38  ;;  %v1020_v62 = vadd.f32 %v1019_v19, %v1800_v17 }
  0xde   :  { %614 = vst [vmem:[%s2203_s3 + $0x1b0] sm:$0xff] %v1930_v8 }
  0xe0   :  { %v337_v23 = vpop.f32.mrf.mxu0  ;;  %v385_v25 = vpop.f32.mrf.mxu1 }
  0xe1   :  { %v507_v26 = vadd.f32 %v1570_v59, %v337_v23  ;;  %v1829_v27 = vadd.f32 %v1570_v59, %v385_v25  ;;  %v1153_v23 = vadd.f32 %v1152_v55, %v1090_v14  ;;  %v430_v40 = vpop.f32.mrf.mxu2  ;;  %v469_v14 = vpop.f32.mrf.mxu3 }
  0xe2   :  { %v1927_v47 = vadd.f32 %v1570_v59, %v430_v40  ;;  %v1955_v55 = vadd.f32 %v1570_v59, %v469_v14 }
  0xe3   :  { %571 = vst [vmem:[%s2203_s3 + $0x58] sm:$0xff] %v507_v26  ;;  %v1092_v29 = vmul.f32 %v507_v26, %v507_v26  ;;  %v1154_v50 = vadd.f32 %v1153_v23, %v1091_v20  ;;  %v1021_v52 = vadd.f32 %v1020_v62, %v507_v26  ;;  %v1097_v23 = vmul.f32 %v1576_v63, %v1576_v63 }
  0xe4   :  { %587 = vst [vmem:[%s2203_s3 + $0xd8] sm:$0xff] %v1829_v27  ;;  %v1098_v62 = vmul.f32 %v1595_v5, %v1595_v5 }
  0xe5   :  { %v1155_v17 = vadd.f32 %v1154_v50, %v1092_v29  ;;  %602 = vst [vmem:[%s2203_s3 + $0x150] sm:$0xff] %v1927_v47 }
  0xe6   :  { %615 = vst [vmem:[%s2203_s3 + $0x1b8] sm:$0xff] %v1955_v55 }
  0xe8   :  { %v340_v33 = vpop.f32.mrf.mxu0  ;;  %v388_v36 = vpop.f32.mrf.mxu1 }
  0xe9   :  { %v508_v37 = vadd.f32 %v1570_v59, %v340_v33  ;;  %v1854_v39 = vadd.f32 %v1570_v59, %v388_v36  ;;  %v433_v48 = vpop.f32.mrf.mxu2 }
  0xea   :  { %v1952_v16 = vadd.f32 %v1570_v59, %v433_v48 }
  0xeb   :  { %572 = vst [vmem:[%s2203_s3 + $0x60] sm:$0xff] %v508_v37  ;;  %v1093_v53 = vmul.f32 %v508_v37, %v508_v37  ;;  %v1022_v54 = vadd.f32 %v1021_v52, %v508_v37  ;;  %v472_v52 = vpop.f32.mrf.mxu3 }
  0xec   :  { %588 = vst [vmem:[%s2203_s3 + $0xe0] sm:$0xff] %v1854_v39 }
  0xed   :  { %v1156_v26 = vadd.f32 %v1155_v17, %v1093_v53  ;;  %603 = vst [vmem:[%s2203_s3 + $0x158] sm:$0xff] %v1952_v16  ;;  %v1985_v17 = vadd.f32 %v1570_v59, %v472_v52 }
  0xef   :  { %616 = vst [vmem:[%s2203_s3 + $0x1c0] sm:$0xff] %v1985_v17 }
  0xf0   :  { %v343_v57 = vpop.f32.mrf.mxu0  ;;  %v391_v60 = vpop.f32.mrf.mxu1 }
  0xf1   :  { %v509_v1 = vadd.f32 %v1570_v59, %v343_v57  ;;  %v1889_v2 = vadd.f32 %v1570_v59, %v391_v60  ;;  %v436_v50 = vpop.f32.mrf.mxu2 }
  0xf2   :  { %v1982_v53 = vadd.f32 %v1570_v59, %v436_v50 }
  0xf3   :  { %573 = vst [vmem:[%s2203_s3 + $0x68] sm:$0xff] %v509_v1  ;;  %v1094_v57 = vmul.f32 %v509_v1, %v509_v1  ;;  %v1023_v60 = vadd.f32 %v1022_v54, %v509_v1  ;;  %v1100_v54 = vmul.f32 %v1633_v24, %v1633_v24 }
  0xf4   :  { %589 = vst [vmem:[%s2203_s3 + $0xe8] sm:$0xff] %v1889_v2 }
  0xf5   :  { %v1157_v10 = vadd.f32 %v1156_v26, %v1094_v57  ;;  %604 = vst [vmem:[%s2203_s3 + $0x160] sm:$0xff] %v1982_v53 }
  0xf8   :  { %v346_v25 = vpop.f32.mrf.mxu0  ;;  %v394_v28 = vpop.f32.mrf.mxu1 }
  0xf9   :  { %v510_v33 = vadd.f32 %v1570_v59, %v346_v25  ;;  %v1924_v36 = vadd.f32 %v1570_v59, %v394_v28 }
  0xfb   :  { %574 = vst [vmem:[%s2203_s3 + $0x70] sm:$0xff] %v510_v33  ;;  %v1095_v61 = vmul.f32 %v510_v33, %v510_v33  ;;  %v1024_v35 = vadd.f32 %v1023_v60, %v510_v33 }
  0xfc   :  { %590 = vst [vmem:[%s2203_s3 + $0xf0] sm:$0xff] %v1924_v36 }
  0xfd   :  { %v1158_v19 = vadd.f32 %v1157_v10, %v1095_v61 }
 0x100   :  { %v349_v6 = vpop.f32.mrf.mxu0  ;;  %v397_v7 = vpop.f32.mrf.mxu1 }
 0x101   :  { %v511_v37 = vadd.f32 %v1570_v59, %v349_v6  ;;  %v1949_v11 = vadd.f32 %v1570_v59, %v397_v7  ;;  %v1103_v7 = vmul.f32 %v1701_v49, %v1701_v49 }
 0x103   :  { %575 = vst [vmem:[%s2203_s3 + $0x78] sm:$0xff] %v511_v37  ;;  %v1025_v1 = vadd.f32 %v1024_v35, %v511_v37  ;;  %v1096_v20 = vmul.f32 %v511_v37, %v511_v37  ;;  %v439_v37 = vpop.f32.mrf.mxu2 }
 0x104   :  { %591 = vst [vmem:[%s2203_s3 + $0xf8] sm:$0xff] %v1949_v11  ;;  %v2008_v48 = vadd.f32 %v1570_v59, %v439_v37 }
 0x105   :  { %v1026_v25 = vadd.f32 %v1025_v1, %v1576_v63  ;;  %v1159_v28 = vadd.f32 %v1158_v19, %v1096_v20  ;;  %v1099_v63 = vmul.f32 %v1614_v15, %v1614_v15  ;;  %v1104_v19 = vmul.f32 %v1726_v56, %v1726_v56 }
 0x106   :  { %605 = vst [vmem:[%s2203_s3 + $0x168] sm:$0xff] %v2008_v48 }
 0x107   :  { %v1027_v29 = vadd.f32 %v1026_v25, %v1595_v5  ;;  %v1160_v33 = vadd.f32 %v1159_v28, %v1097_v23 }
 0x109   :  { %v1028_v40 = vadd.f32 %v1027_v29, %v1614_v15  ;;  %v1161_v43 = vadd.f32 %v1160_v33, %v1098_v62  ;;  %v1101_v15 = vmul.f32 %v1648_v32, %v1648_v32  ;;  %v1107_v62 = vmul.f32 %v1803_v18, %v1803_v18 }
 0x10b   :  { %v1029_v5 = vadd.f32 %v1028_v40, %v1633_v24  ;;  %v1162_v57 = vadd.f32 %v1161_v43, %v1099_v63  ;;  %v1102_v24 = vmul.f32 %v1676_v42, %v1676_v42  ;;  %v442_v63 = vpop.f32.mrf.mxu2 }
 0x10c   :  { %v2034_v40 = vadd.f32 %v1570_v59, %v442_v63 }
 0x10d   :  { %v1030_v26 = vadd.f32 %v1029_v5, %v1648_v32  ;;  %v1163_v60 = vadd.f32 %v1162_v57, %v1100_v54  ;;  %v475_v32 = vpop.f32.mrf.mxu3  ;;  %v1109_v5 = vmul.f32 %v1854_v39, %v1854_v39 }
 0x10e   :  { %v2011_v14 = vadd.f32 %v1570_v59, %v475_v32  ;;  %606 = vst [vmem:[%s2203_s3 + $0x170] sm:$0xff] %v2034_v40 }
 0x10f   :  { %v1164_v61 = vadd.f32 %v1163_v60, %v1101_v15  ;;  %v1031_v6 = vadd.f32 %v1030_v26, %v1676_v42  ;;  %v1110_v15 = vmul.f32 %v1889_v2, %v1889_v2 }
 0x110   :  { %617 = vst [vmem:[%s2203_s3 + $0x1c8] sm:$0xff] %v2011_v14 }
 0x111   :  { %v1032_v10 = vadd.f32 %v1031_v6, %v1701_v49  ;;  %v1165_v35 = vadd.f32 %v1164_v61, %v1102_v24  ;;  %v1105_v49 = vmul.f32 %v1747_v0, %v1747_v0  ;;  %v1111_v24 = vmul.f32 %v1924_v36, %v1924_v36 }
 0x113   :  { %v1033_v1 = vadd.f32 %v1032_v10, %v1726_v56  ;;  %v1166_v42 = vadd.f32 %v1165_v35, %v1103_v7  ;;  %v1106_v56 = vmul.f32 %v1775_v9, %v1775_v9  ;;  %v445_v61 = vpop.f32.mrf.mxu2 }
 0x114   :  { %v2062_v7 = vadd.f32 %v1570_v59, %v445_v61 }
 0x115   :  { %v1034_v20 = vadd.f32 %v1033_v1, %v1747_v0  ;;  %v1167_v23 = vadd.f32 %v1166_v42, %v1104_v19  ;;  %v478_v0 = vpop.f32.mrf.mxu3  ;;  %v1114_v19 = vmul.f32 %v1679_v44, %v1679_v44  ;;  %v1115_v42 = vmul.f32 %v1704_v51, %v1704_v51 }
 0x116   :  { %v2037_v43 = vadd.f32 %v1570_v59, %v478_v0  ;;  %607 = vst [vmem:[%s2203_s3 + $0x178] sm:$0xff] %v2062_v7 }
 0x117   :  { %v1035_v25 = vadd.f32 %v1034_v20, %v1775_v9  ;;  %v1168_v28 = vadd.f32 %v1167_v23, %v1105_v49  ;;  %v1108_v9 = vmul.f32 %v1829_v27, %v1829_v27 }
 0x118   :  { %618 = vst [vmem:[%s2203_s3 + $0x1d0] sm:$0xff] %v2037_v43 }
 0x119   :  { %v1036_v29 = vadd.f32 %v1035_v25, %v1803_v18  ;;  %v1169_v33 = vadd.f32 %v1168_v28, %v1106_v56  ;;  %v1116_v56 = vmul.f32 %v1729_v58, %v1729_v58 }
 0x11b   :  { %v1037_v50 = vadd.f32 %v1036_v29, %v1829_v27  ;;  %v1170_v52 = vadd.f32 %v1169_v33, %v1107_v62  ;;  %v1118_v29 = vmul.f32 %v1778_v12, %v1778_v12 }
 0x11d   :  { %v1171_v18 = vadd.f32 %v1170_v52, %v1108_v9  ;;  %v1038_v54 = vadd.f32 %v1037_v50, %v1854_v39  ;;  %v1112_v39 = vmul.f32 %v1949_v11, %v1949_v11  ;;  %v481_v6 = vpop.f32.mrf.mxu3 }
 0x11e   :  { %v2065_v10 = vadd.f32 %v1570_v59, %v481_v6 }
 0x11f   :  { %v1172_v57 = vadd.f32 %v1171_v18, %v1109_v5  ;;  %v1039_v27 = vadd.f32 %v1038_v54, %v1889_v2 }
 0x120   :  { %619 = vst [vmem:[%s2203_s3 + $0x1d8] sm:$0xff] %v2065_v10 }
 0x121   :  { %v1173_v26 = vadd.f32 %v1172_v57, %v1110_v15  ;;  %v1040_v60 = vadd.f32 %v1039_v27, %v1924_v36  ;;  %v1113_v36 = vmul.f32 %v1651_v34, %v1651_v34  ;;  %v1122_v57 = vmul.f32 %v1894_v38, %v1894_v38 }
 0x123   :  { %v1174_v35 = vadd.f32 %v1173_v26, %v1111_v24  ;;  %v1041_v2 = vadd.f32 %v1040_v60, %v1949_v11 }
 0x125   :  { %v1042_v37 = vadd.f32 %v1041_v2, %v1651_v34  ;;  %v1175_v32 = vadd.f32 %v1174_v35, %v1112_v39  ;;  %v484_v23 = vpop.f32.mrf.mxu3 }
 0x126   :  { %v2086_v34 = vadd.f32 %v1570_v59, %v484_v23 }
 0x127   :  { %v1043_v11 = vadd.f32 %v1042_v37, %v1679_v44  ;;  %v1176_v1 = vadd.f32 %v1175_v32, %v1113_v36  ;;  %v1117_v44 = vmul.f32 %v1750_v3, %v1750_v3  ;;  %v1126_v37 = vmul.f32 %v2008_v48, %v2008_v48 }
 0x128   :  { %620 = vst [vmem:[%s2203_s3 + $0x1e0] sm:$0xff] %v2086_v34 }
 0x129   :  { %v1044_v49 = vadd.f32 %v1043_v11, %v1704_v51  ;;  %v1177_v20 = vadd.f32 %v1176_v1, %v1114_v19  ;;  %v1127_v19 = vmul.f32 %v2034_v40, %v2034_v40  ;;  %v1128_v11 = vmul.f32 %v2062_v7, %v2062_v7 }
 0x12b   :  { %v1045_v25 = vadd.f32 %v1044_v49, %v1729_v58  ;;  %v1178_v28 = vadd.f32 %v1177_v20, %v1115_v42  ;;  %v1119_v58 = vmul.f32 %v1806_v21, %v1806_v21 }
 0x12d   :  { %v1046_v51 = vadd.f32 %v1045_v25, %v1750_v3  ;;  %v1179_v62 = vadd.f32 %v1178_v28, %v1116_v56  ;;  %v487_v9 = vpop.f32.mrf.mxu3  ;;  %v1120_v3 = vmul.f32 %v1832_v30, %v1832_v30 }
 0x12e   :  { %v2105_v52 = vadd.f32 %v1570_v59, %v487_v9 }
 0x12f   :  { %v1180_v33 = vadd.f32 %v1179_v62, %v1117_v44  ;;  %v1047_v63 = vadd.f32 %v1046_v51, %v1778_v12  ;;  %v1121_v12 = vmul.f32 %v1857_v45, %v1857_v45  ;;  %v1132_v44 = vmul.f32 %v1835_v31, %v1835_v31 }
 0x130   :  { %621 = vst [vmem:[%s2203_s3 + $0x1e8] sm:$0xff] %v2105_v52 }
 0x131   :  { %v1048_v0 = vadd.f32 %v1047_v63, %v1806_v21  ;;  %v1181_v50 = vadd.f32 %v1180_v33, %v1118_v29 }
 0x133   :  { %v1049_v18 = vadd.f32 %v1048_v0, %v1832_v30  ;;  %v1182_v54 = vadd.f32 %v1181_v50, %v1119_v58  ;;  %v1123_v30 = vmul.f32 %v1927_v47, %v1927_v47 }
 0x135   :  { %v1050_v21 = vadd.f32 %v1049_v18, %v1857_v45  ;;  %v1183_v5 = vadd.f32 %v1182_v54, %v1120_v3  ;;  %v490_v24 = vpop.f32.mrf.mxu3  ;;  %v1124_v45 = vmul.f32 %v1952_v16, %v1952_v16 }
 0x136   :  { %v2124_v39 = vadd.f32 %v1570_v59, %v490_v24  ;;  %v1142_v24 = vmul.f32 %v2105_v52, %v2105_v52 }
 0x137   :  { %v1051_v27 = vadd.f32 %v1050_v21, %v1894_v38  ;;  %v1184_v15 = vadd.f32 %v1183_v5, %v1121_v12 }
 0x138   :  { %622 = vst [vmem:[%s2203_s3 + $0x1f0] sm:$0xff] %v2124_v39 }
 0x139   :  { %v1052_v26 = vadd.f32 %v1051_v27, %v1927_v47  ;;  %v1185_v60 = vadd.f32 %v1184_v15, %v1122_v57  ;;  %v1125_v47 = vmul.f32 %v1982_v53, %v1982_v53  ;;  %v1140_v27 = vmul.f32 %v2065_v10, %v2065_v10 }
 0x13b   :  { %v1053_v61 = vadd.f32 %v1052_v26, %v1952_v16  ;;  %v1186_v6 = vadd.f32 %v1185_v60, %v1123_v30  ;;  %v1141_v26 = vmul.f32 %v2086_v34, %v2086_v34 }
 0x13d   :  { %v1187_v38 = vadd.f32 %v1186_v6, %v1124_v45  ;;  %v1054_v35 = vadd.f32 %v1053_v61, %v1982_v53  ;;  %v493_v1 = vpop.f32.mrf.mxu3  ;;  %v1143_v45 = vmul.f32 %v2124_v39, %v2124_v39 }
 0x13e   :  { %v559_v42 = vadd.f32 %v1570_v59, %v493_v1  ;;  %v1131_v59 = vmul.f32 %v1809_v22, %v1809_v22 }
 0x13f   :  { %v1188_v2 = vadd.f32 %v1187_v38, %v1125_v47  ;;  %v1055_v36 = vadd.f32 %v1054_v35, %v2008_v48  ;;  %v1129_v48 = vmul.f32 %v1753_v4, %v1753_v4 }
 0x140   :  { %623 = vst [vmem:[%s2203_s3 + $0x1f8] sm:$0xff] %v559_v42 }
 0x141   :  { %v1189_v32 = vadd.f32 %v1188_v2, %v1126_v37  ;;  %v1056_v16 = vadd.f32 %v1055_v36, %v2034_v40  ;;  %v1130_v40 = vmul.f32 %v1781_v13, %v1781_v13 }
 0x143   :  { %v1190_v49 = vadd.f32 %v1189_v32, %v1127_v19  ;;  %v1057_v53 = vadd.f32 %v1056_v16, %v2062_v7 }
 0x145   :  { %v1058_v20 = vadd.f32 %v1057_v53, %v1753_v4  ;;  %v1191_v23 = vadd.f32 %v1190_v49, %v1128_v11  ;;  %v1133_v4 = vmul.f32 %v1860_v46, %v1860_v46 }
 0x147   :  { %v1059_v56 = vadd.f32 %v1058_v20, %v1781_v13  ;;  %v1192_v25 = vadd.f32 %v1191_v23, %v1129_v48  ;;  %v1134_v13 = vmul.f32 %v1897_v41, %v1897_v41 }
 0x149   :  { %v1060_v7 = vadd.f32 %v1059_v56, %v1809_v22  ;;  %v1193_v28 = vadd.f32 %v1192_v25, %v1130_v40  ;;  %v1135_v22 = vmul.f32 %v1930_v8, %v1930_v8 }
 0x14b   :  { %v1061_v51 = vadd.f32 %v1060_v7, %v1835_v31  ;;  %v1194_v62 = vadd.f32 %v1193_v28, %v1131_v59  ;;  %v1136_v31 = vmul.f32 %v1955_v55, %v1955_v55 }
 0x14d   :  { %v1062_v29 = vadd.f32 %v1061_v51, %v1860_v46  ;;  %v1195_v33 = vadd.f32 %v1194_v62, %v1132_v44  ;;  %v1137_v46 = vmul.f32 %v1985_v17, %v1985_v17 }
 0x14f   :  { %v1196_v63 = vadd.f32 %v1195_v33, %v1133_v4  ;;  %v1063_v58 = vadd.f32 %v1062_v29, %v1897_v41  ;;  %v1138_v41 = vmul.f32 %v2011_v14, %v2011_v14 }
 0x151   :  { %v1064_v0 = vadd.f32 %v1063_v58, %v1930_v8  ;;  %v1197_v50 = vadd.f32 %v1196_v63, %v1134_v13  ;;  %v1139_v8 = vmul.f32 %v2037_v43, %v2037_v43 }
 0x153   :  { %v1065_v9 = vadd.f32 %v1064_v0, %v1955_v55  ;;  %v1198_v3 = vadd.f32 %v1197_v50, %v1135_v22 }
 0x155   :  { %v1066_v18 = vadd.f32 %v1065_v9, %v1985_v17  ;;  %v1199_v54 = vadd.f32 %v1198_v3, %v1136_v31 }
 0x157   :  { %v1067_v12 = vadd.f32 %v1066_v18, %v2011_v14  ;;  %v1200_v21 = vadd.f32 %v1199_v54, %v1137_v46 }
 0x159   :  { %v1068_v5 = vadd.f32 %v1067_v12, %v2037_v43  ;;  %v1201_v57 = vadd.f32 %v1200_v21, %v1138_v41 }
 0x15b   :  { %v1069_v55 = vadd.f32 %v1068_v5, %v2065_v10  ;;  %v1202_v15 = vadd.f32 %v1201_v57, %v1139_v8  ;;  %v1144_v10 = vmul.f32 %v559_v42, %v559_v42 }
 0x15d   :  { %v1203_v17 = vadd.f32 %v1202_v15, %v1140_v27  ;;  %v1070_v30 = vadd.f32 %v1069_v55, %v2086_v34 }
 0x15f   :  { %v1204_v14 = vadd.f32 %v1203_v17, %v1141_v26  ;;  %v1071_v60 = vadd.f32 %v1070_v30, %v2105_v52 }
 0x161   :  { %v1205_v43 = vadd.f32 %v1204_v14, %v1142_v24  ;;  %v1072_v61 = vadd.f32 %v1071_v60, %v2124_v39 }
 0x163   :  { %v1206_v6 = vadd.f32 %v1205_v43, %v1143_v45  ;;  %v1073_v38 = vadd.f32 %v1072_v61, %v559_v42 }
 0x165   :  { %v1074_v35 = vrot.slane %v1073_v38, 4  ;;  %v1207_v47 = vadd.f32 %v1206_v6, %v1144_v10 }
 0x167   :  { %v1075_v2 = vadd.f32 %v1074_v35, %v1073_v38  ;;  %v1208_v36 = vrot.slane %v1207_v47, 4 }
 0x169   :  { %v1076_v34 = vrot.slane %v1075_v2, 2  ;;  %v1209_v37 = vadd.f32 %v1208_v36, %v1207_v47 }
 0x16b   :  { %v1077_v32 = vadd.f32 %v1076_v34, %v1075_v2  ;;  %v1210_v16 = vrot.slane %v1209_v37, 2 }
 0x16d   :  { %v1078_v19 = vrot.slane %v1077_v32, 1  ;;  %v1211_v11 = vadd.f32 %v1210_v16, %v1209_v37 }
 0x16f   :  { %v1079_v52 = vadd.f32 %v1078_v19, %v1077_v32  ;;  %v1212_v1 = vrot.slane %v1211_v11, 1 }
 0x171   :  { %1080 = vst [vmem:[%s2204_s4] sm:$0x1] %v1079_v52  ;;  %v1213_v39 = vadd.f32 %v1212_v1, %v1211_v11 }
 0x173   :  { %1214 = vst [vmem:[%s2205_s5] sm:$0x1] %v1213_v39 }

</bundles_post_ra>
